<compile_context>
chip_gen: v7x
topology: tpu7x:2x2x1
jax: 0.10.0
libtpu: 0.0.40
codegen_flags: <defaults>
</compile_context>

<pallas_src>
import jax
import jax.numpy as jnp
import numpy as np
from jax import lax
from jax.experimental import pallas as pl
from jax.experimental.pallas import tpu as pltpu

SLOPE = 1e-4      # LeakyReLU negative_slope (module uses 0.0001 explicitly)
BN_EPS = 1e-5
LANE = 128


def _leaky(x):
    return jnp.where(x >= 0, x, SLOPE * x)


def _round_up(x, m):
    return -(-x // m) * m


# --------------------------- offline constant builders ----------------------

def _build_G_taps(K, s, p, H, OH, NB):
    """Per-tap 0/1 row-gather matrices, block-diagonal over the NB-sample tile:
    G[i, n*OH + oh, n*H + h] = 1  iff  h == s*oh + i - p."""
    G = np.zeros((K, NB * OH, NB * H), np.float32)
    for i in range(K):
        for n in range(NB):
            for oh in range(OH):
                h = s * oh + i - p
                if 0 <= h < H:
                    G[i, n * OH + oh, n * H + h] = 1.0
    return G


def _build_B_taps(w_oihw, s, p, W_in, OW, P):
    """Per-kernel-row width-gather/weight matrices (W_in*Cin, P) for the lane
    layout (w, c) -> w*C + c; output lanes (ow, cout) -> ow*Cout + cout."""
    Cout, Cin, K, _ = w_oihw.shape
    mats = []
    for i in range(K):
        B = np.zeros((W_in * Cin, P), np.float32)
        for ow in range(OW):
            for j in range(K):
                w = s * ow + j - p
                if 0 <= w < W_in:
                    B[w * Cin:(w + 1) * Cin, ow * Cout:(ow + 1) * Cout] = \
                        w_oihw[:, :, i, j].T
        mats.append(B)
    return mats


def _kaiming(rng, shape, fan_in, a):
    std = np.sqrt(2.0 / ((1.0 + a * a) * fan_in))
    return (std * rng.standard_normal(size=shape)).astype(np.float32)


def _bn_affine(cout):
    gamma = np.ones((cout,), np.float32)
    beta = np.zeros((cout,), np.float32)
    mean = np.zeros((cout,), np.float32)
    var = np.ones((cout,), np.float32)
    scale = gamma / np.sqrt(var + BN_EPS)
    shift = beta - mean * scale
    return scale, shift


def _make_block(rng, NB, H, W, Cin, Cout, K, stride, in_lanes):
    """Build one residual block's folded constants.  `in_lanes` is the actual
    (lane-padded) width of the incoming activation; its first W*Cin lanes hold
    the (w, c) data, the rest are zero."""
    p = K // 2
    OH = (H + 2 * p - K) // stride + 1
    OW = (W + 2 * p - K) // stride + 1
    WCin = W * Cin
    owc = OW * Cout
    P = _round_up(max(owc, LANE), LANE)
    assert WCin <= in_lanes

    # PyTorch init: kaiming_normal_(a=1e-4) for conv1/downsample, a=0 for
    # conv2, conv biases zeroed, downsample has no bias, BN in eval mode.
    w1 = _kaiming(rng, (Cout, Cin, K, K), Cin * K * K, 1e-4)
    w2 = _kaiming(rng, (Cout, Cout, 3, 3), Cout * 9, 0.0)
    wd = _kaiming(rng, (Cout, Cin, 1, 1), Cin, 1e-4)
    b1 = np.zeros((Cout,), np.float32)
    b2 = np.zeros((Cout,), np.float32)
    s1, t1 = _bn_affine(Cout)
    s2, t2 = _bn_affine(Cout)
    sd, td = _bn_affine(Cout)

    # Fold BN scale into the weights; conv bias + BN shift into one bias row.
    w1f = w1 * s1[:, None, None, None]
    w2f = w2 * s2[:, None, None, None]
    wdf = wd * sd[:, None, None, None]
    bias1 = b1 * s1 + t1
    bias2 = b2 * s2 + t2 + td            # conv2+bn2 shift plus downsample BN shift

    def pad_rows(b, rows):
        return np.pad(b, ((0, rows - b.shape[0]), (0, 0)))

    # conv1: per-tap row gathers + width/weight matrices; drop dead taps offline.
    G1 = _build_G_taps(K, stride, p, H, OH, NB)
    B1 = [pad_rows(b, in_lanes) for b in _build_B_taps(w1f, stride, p, W, OW, P)]
    alive1 = [i for i in range(K) if G1[i].any() and B1[i].any()]
    assert p in alive1                    # center tap also feeds the downsample
    p_pos = alive1.index(p)
    g1_stack = np.stack([G1[i] for i in alive1])               # (n1, NB*OH, NB*H)
    b1_cat = np.concatenate([B1[i] for i in alive1], axis=0)   # (n1*in_lanes, P)

    # conv2 (3x3, stride 1) + fused 1x1 downsample (reuses conv1's center tap).
    G2 = _build_G_taps(3, 1, 1, OH, OH, NB)
    B2 = [pad_rows(b, P) for b in _build_B_taps(w2f, 1, 1, OW, OW, P)]
    Bd = pad_rows(_build_B_taps(wdf, stride, 0, W, OW, P)[0], in_lanes)
    eye = np.eye(NB * OH, dtype=np.float32)
    taps2, g2_list, b2_blocks = [], [], []
    for i in range(3):
        if not (G2[i].any() and B2[i].any()):
            continue                                           # dead tap: dropped offline
        if np.array_equal(G2[i], eye):
            taps2.append(("identity", 0))                      # no gather matmul needed
        else:
            taps2.append(("gather", len(g2_list)))
            g2_list.append(G2[i])
        b2_blocks.append(B2[i])
    b2_blocks.append(Bd)                                       # downsample rows last
    b2_cat = np.concatenate(b2_blocks, axis=0)
    g2_stack = np.stack(g2_list) if g2_list else None

    # Per-channel bias rows tiled over the (ow, cout) lane layout.
    bias1_row = np.zeros((1, P), np.float32)
    bias2_row = np.zeros((1, P), np.float32)
    for ow in range(OW):
        bias1_row[0, ow * Cout:(ow + 1) * Cout] = bias1
        bias2_row[0, ow * Cout:(ow + 1) * Cout] = bias2

    arrays = [jnp.asarray(g1_stack, jnp.bfloat16),
              jnp.asarray(b1_cat, jnp.bfloat16),
              jnp.asarray(bias1_row)]
    if g2_stack is not None:
        arrays.append(jnp.asarray(g2_stack, jnp.bfloat16))
    arrays += [jnp.asarray(b2_cat, jnp.bfloat16),
               jnp.asarray(bias2_row)]

    meta = dict(n1=len(alive1), p_pos=p_pos, taps2=tuple(taps2),
                has_g2=g2_stack is not None, P=P, in_lanes=in_lanes,
                NOH=NB * OH, NH=NB * H, b2_rows=b2_cat.shape[0])
    raw = dict(w1=w1, b1=b1, s1=s1, t1=t1, w2=w2, b2=b2, s2=s2, t2=t2,
               wd=wd, sd=sd, td=td, stride=stride, pad=p)
    return arrays, meta, raw, OH, OW, P


# --------------------------------- kernel -----------------------------------

def _make_kernel(plan):
    def kernel(*refs):
        out_ref = refs[-1]
        x = refs[0][...].astype(jnp.bfloat16)            # (NB*H, in_lanes)
        idx = 1
        for m in plan:
            g1_ref, b1_ref, bias1_ref = refs[idx], refs[idx + 1], refs[idx + 2]
            idx += 3
            g2_ref = None
            if m["has_g2"]:
                g2_ref = refs[idx]
                idx += 1
            b2_ref, bias2_ref = refs[idx], refs[idx + 1]
            idx += 2

            # conv1: per-tap height gather on the narrow (w, c) lanes, then one
            # deep stage-1 matmul over the lane-concatenated taps.
            gathered = [
                jnp.dot(g1_ref[i], x, preferred_element_type=jnp.float32
                        ).astype(jnp.bfloat16)           # exact: G is 0/1
                for i in range(m["n1"])
            ]
            gcat = gathered[0] if m["n1"] == 1 else jnp.concatenate(gathered, axis=1)
            m1 = jnp.dot(gcat, b1_ref[...], preferred_element_type=jnp.float32)
            o1 = _leaky(m1 + bias1_ref[...]).astype(jnp.bfloat16)    # (NB*OH, P)

            # conv2 + residual downsample: gather-first again; the identity tap
            # is o1 itself (no gather); the downsample reuses conv1's center-tap
            # rows and is fused into the same stage-1 matmul (extra rows of b2).
            pieces = []
            for kind, j in m["taps2"]:
                if kind == "identity":
                    pieces.append(o1)
                else:
                    pieces.append(
                        jnp.dot(g2_ref[j], o1, preferred_element_type=jnp.float32
                                ).astype(jnp.bfloat16))
            pieces.append(gathered[m["p_pos"]])
            cat2 = pieces[0] if len(pieces) == 1 else jnp.concatenate(pieces, axis=1)
            m2 = jnp.dot(cat2, b2_ref[...], preferred_element_type=jnp.float32)
            x = _leaky(m2 + bias2_ref[...]).astype(jnp.bfloat16)     # (NB*OH, P)

        # Head: AdaptiveAvgPool2d(1) over a 1x1 map is the identity; the fc is a
        # lane-padded (P_last, 128) matmul so the output tile is lane-dense.
        wfc_ref, bfc_ref = refs[idx], refs[idx + 1]
        logits = jnp.dot(x, wfc_ref[...], preferred_element_type=jnp.float32)
        out_ref[...] = logits + bfc_ref[...]
    return kernel


# ------------------------------- build / wrap --------------------------------

def _estimate_step_flops(plan, NB, P_last):
    flops = 0
    for m in plan:
        flops += 2 * m["n1"] * m["NOH"] * m["NH"] * m["in_lanes"]      # conv1 gathers
        flops += 2 * m["NOH"] * (m["n1"] * m["in_lanes"]) * m["P"]     # conv1 stage-1
        n2g = sum(1 for kind, _ in m["taps2"] if kind == "gather")
        flops += 2 * n2g * m["NOH"] * m["NOH"] * m["P"]                # conv2 gathers
        flops += 2 * m["NOH"] * m["b2_rows"] * m["P"]                  # conv2 + downsample
    flops += 2 * NB * P_last * LANE                                    # fc head
    return int(flops)


def build_audio_classifier(NB=8, C=2, H=32, W=32, seed=0):
    rng = np.random.default_rng(seed)
    cfgs = [(C, 8, 5, 2), (8, 16, 5, 2), (16, 32, 3, 2), (32, 64, 3, 2), (64, 64, 3, 2)]

    in_lanes0 = _round_up(W * C, LANE)          # lane-pad the network input to 128
    params, plan, raws = [], [], []
    h, w, in_lanes = H, W, in_lanes0
    for (ci, co, k, s) in cfgs:
        arrays, meta, raw, oh, ow, P = _make_block(rng, NB, h, w, ci, co, k, s, in_lanes)
        params += arrays
        plan.append(meta)
        raws.append(raw)
        h, w, in_lanes = oh, ow, P
    # The fused head assumes the last block leaves a 1x1 map (avgpool == identity).
    assert h == 1 and w == 1, (h, w)

    # fc head (nn.Linear(64, 10) default init), lane-padded to a dense 128-wide
    # output tile (logits in lanes 0..9, zeros elsewhere).
    P_last = plan[-1]["P"]
    cout_last = cfgs[-1][1]
    bound = 1.0 / np.sqrt(float(cout_last))
    wfc = rng.uniform(-bound, bound, size=(cout_last, 10)).astype(np.float32)
    bfc = rng.uniform(-bound, bound, size=(10,)).astype(np.float32)
    wfc_p = np.zeros((P_last, LANE), np.float32)
    wfc_p[:cout_last, :10] = wfc
    bfc_p = np.zeros((1, LANE), np.float32)
    bfc_p[0, :10] = bfc
    params += [jnp.asarray(wfc_p, jnp.bfloat16), jnp.asarray(bfc_p)]

    kernel = _make_kernel(plan)
    flops_step = _estimate_step_flops(plan, NB, P_last)
    param_bytes = sum(int(a.size) * a.dtype.itemsize for a in params)

    def _const_spec(arr):
        zeros = (0,) * arr.ndim
        return pl.BlockSpec(arr.shape, lambda b, z=zeros: z)   # weights stay resident

    def make_call(n):
        assert n % NB == 0, f"batch {n} must be a multiple of the tile size {NB}"
        steps = n // NB
        in_specs = [pl.BlockSpec((NB * H, in_lanes0), lambda b: (b, 0))]
        in_specs += [_const_spec(a) for a in params]
        out_specs = pl.BlockSpec((NB, LANE), lambda b: (b, 0))
        return pl.pallas_call(
            kernel,
            out_shape=jax.ShapeDtypeStruct((n, LANE), jnp.float32),
            grid_spec=pltpu.PrefetchScalarGridSpec(
                num_scalar_prefetch=0, grid=(steps,),
                in_specs=in_specs, out_specs=out_specs),
            compiler_params=pltpu.CompilerParams(
                dimension_semantics=("parallel",),          # shards tiles over v7x's 2 TCs
                vmem_limit_bytes=32 * 1024 * 1024),         # ample on v5e/v6e/v7x at NB=8
            cost_estimate=pl.CostEstimate(
                flops=flops_step * steps, transcendentals=0,
                bytes_accessed=param_bytes + n * H * in_lanes0 * 4 + n * LANE * 4),
        )

    @jax.jit
    def forward(x_nchw, params):
        n, c, hh, ww = x_nchw.shape
        # NCHW -> kernel layout: rows (n, h), lanes (w, c), lane-padded to 128.
        x2d = jnp.transpose(x_nchw, (0, 2, 3, 1)).reshape(n * hh, ww * c)
        x2d = jnp.pad(x2d, ((0, 0), (0, in_lanes0 - ww * c)))
        out = make_call(n)(x2d, *params)
        return out[:, :10]

    def reference(x_nchw):
        # Pure-JAX f32 reference of the PyTorch forward (eval-mode BN).
        def conv(x, wgt, stride, pad):
            return lax.conv_general_dilated(
                x, wgt, window_strides=(stride, stride),
                padding=[(pad, pad), (pad, pad)],
                dimension_numbers=("NCHW", "OIHW", "NCHW"),
                precision=lax.Precision.HIGHEST)
        x = x_nchw
        for r in raws:
            per = lambda v: v[None, :, None, None]
            idn = conv(x, r["wd"], r["stride"], 0) * per(r["sd"]) + per(r["td"])
            o = conv(x, r["w1"], r["stride"], r["pad"]) + per(r["b1"])
            o = o * per(r["s1"]) + per(r["t1"])
            o = _leaky(o)
            o = conv(o, r["w2"], 1, 1) + per(r["b2"])
            o = o * per(r["s2"]) + per(r["t2"])
            x = _leaky(o + idn)
        x = jnp.mean(x, axis=(2, 3))        # AdaptiveAvgPool2d(1) + flatten
        return jnp.dot(x, wfc, precision=lax.Precision.HIGHEST) + bfc[None, :]

    return forward, params, jax.jit(reference)


# ---------------------------------- main -------------------------------------

if __name__ == "__main__":
    N, C, H, W = 16, 2, 32, 32                  # batch 16 = 2 grid tiles of NB=8
    key = jax.random.PRNGKey(0)
    x = jax.random.normal(key, (N, C, H, W), jnp.float32)   # NCHW, like PyTorch

    forward, params, reference = build_audio_classifier(NB=8, C=C, H=H, W=W, seed=0)
    out = jax.block_until_ready(forward(x, params))

    assert out.shape == (N, 10), out.shape
    assert bool(jnp.all(jnp.isfinite(out)))

    # Explicit tolerance check against an f32 reference (bf16 matmul path).
    ref = jax.block_until_ready(reference(x))
    err = float(jnp.max(jnp.abs(out - ref)))
    scale = float(jnp.max(jnp.abs(ref))) + 1e-6
    assert err <= 0.1 * scale + 1e-2, f"max|diff|={err} vs scale={scale}"

    print("KERNEL_OK")
</pallas_src>

<mosaic_0001>
module attributes {stable_mosaic.version = 11 : i64} {
  func.func @kernel(%arg0: i32, %arg1: memref<256x128xf32, #tpu.memory_space<vmem>>, %arg2: memref<5x128x256xbf16, #tpu.memory_space<vmem>>, %arg3: memref<640x128xbf16, #tpu.memory_space<vmem>>, %arg4: memref<1x128xf32, #tpu.memory_space<vmem>>, %arg5: memref<2x128x128xbf16, #tpu.memory_space<vmem>>, %arg6: memref<512x128xbf16, #tpu.memory_space<vmem>>, %arg7: memref<1x128xf32, #tpu.memory_space<vmem>>, %arg8: memref<5x64x128xbf16, #tpu.memory_space<vmem>>, %arg9: memref<640x128xbf16, #tpu.memory_space<vmem>>, %arg10: memref<1x128xf32, #tpu.memory_space<vmem>>, %arg11: memref<2x64x64xbf16, #tpu.memory_space<vmem>>, %arg12: memref<512x128xbf16, #tpu.memory_space<vmem>>, %arg13: memref<1x128xf32, #tpu.memory_space<vmem>>, %arg14: memref<3x32x64xbf16, #tpu.memory_space<vmem>>, %arg15: memref<384x128xbf16, #tpu.memory_space<vmem>>, %arg16: memref<1x128xf32, #tpu.memory_space<vmem>>, %arg17: memref<2x32x32xbf16, #tpu.memory_space<vmem>>, %arg18: memref<512x128xbf16, #tpu.memory_space<vmem>>, %arg19: memref<1x128xf32, #tpu.memory_space<vmem>>, %arg20: memref<3x16x32xbf16, #tpu.memory_space<vmem>>, %arg21: memref<384x128xbf16, #tpu.memory_space<vmem>>, %arg22: memref<1x128xf32, #tpu.memory_space<vmem>>, %arg23: memref<2x16x16xbf16, #tpu.memory_space<vmem>>, %arg24: memref<512x128xbf16, #tpu.memory_space<vmem>>, %arg25: memref<1x128xf32, #tpu.memory_space<vmem>>, %arg26: memref<2x8x16xbf16, #tpu.memory_space<vmem>>, %arg27: memref<256x128xbf16, #tpu.memory_space<vmem>>, %arg28: memref<1x128xf32, #tpu.memory_space<vmem>>, %arg29: memref<256x128xbf16, #tpu.memory_space<vmem>>, %arg30: memref<1x128xf32, #tpu.memory_space<vmem>>, %arg31: memref<128x128xbf16, #tpu.memory_space<vmem>>, %arg32: memref<1x128xf32, #tpu.memory_space<vmem>>, %arg33: memref<8x128xf32, #tpu.memory_space<vmem>>) attributes {dimension_semantics = [#tpu.dimension_semantics<parallel>], iteration_bounds = array<i64: 2>, scalar_prefetch = 0 : i64, scratch_operands = 0 : i64, tpu.core_type = #tpu.core_type<tc>, window_params = [{transform_indices = @transform_0, window_bounds = array<i64: 256, 128>}, {pipeline_mode = #tpu.pipeline_mode<synchronous>, transform_indices = @transform_1, window_bounds = array<i64: 5, 128, 256>}, {pipeline_mode = #tpu.pipeline_mode<synchronous>, transform_indices = @transform_2, window_bounds = array<i64: 640, 128>}, {pipeline_mode = #tpu.pipeline_mode<synchronous>, transform_indices = @transform_3, window_bounds = array<i64: 1, 128>}, {pipeline_mode = #tpu.pipeline_mode<synchronous>, transform_indices = @transform_4, window_bounds = array<i64: 2, 128, 128>}, {pipeline_mode = #tpu.pipeline_mode<synchronous>, transform_indices = @transform_5, window_bounds = array<i64: 512, 128>}, {pipeline_mode = #tpu.pipeline_mode<synchronous>, transform_indices = @transform_6, window_bounds = array<i64: 1, 128>}, {pipeline_mode = #tpu.pipeline_mode<synchronous>, transform_indices = @transform_7, window_bounds = array<i64: 5, 64, 128>}, {pipeline_mode = #tpu.pipeline_mode<synchronous>, transform_indices = @transform_8, window_bounds = array<i64: 640, 128>}, {pipeline_mode = #tpu.pipeline_mode<synchronous>, transform_indices = @transform_9, window_bounds = array<i64: 1, 128>}, {pipeline_mode = #tpu.pipeline_mode<synchronous>, transform_indices = @transform_10, window_bounds = array<i64: 2, 64, 64>}, {pipeline_mode = #tpu.pipeline_mode<synchronous>, transform_indices = @transform_11, window_bounds = array<i64: 512, 128>}, {pipeline_mode = #tpu.pipeline_mode<synchronous>, transform_indices = @transform_12, window_bounds = array<i64: 1, 128>}, {pipeline_mode = #tpu.pipeline_mode<synchronous>, transform_indices = @transform_13, window_bounds = array<i64: 3, 32, 64>}, {pipeline_mode = #tpu.pipeline_mode<synchronous>, transform_indices = @transform_14, window_bounds = array<i64: 384, 128>}, {pipeline_mode = #tpu.pipeline_mode<synchronous>, transform_indices = @transform_15, window_bounds = array<i64: 1, 128>}, {pipeline_mode = #tpu.pipeline_mode<synchronous>, transform_indices = @transform_16, window_bounds = array<i64: 2, 32, 32>}, {pipeline_mode = #tpu.pipeline_mode<synchronous>, transform_indices = @transform_17, window_bounds = array<i64: 512, 128>}, {pipeline_mode = #tpu.pipeline_mode<synchronous>, transform_indices = @transform_18, window_bounds = array<i64: 1, 128>}, {pipeline_mode = #tpu.pipeline_mode<synchronous>, transform_indices = @transform_19, window_bounds = array<i64: 3, 16, 32>}, {pipeline_mode = #tpu.pipeline_mode<synchronous>, transform_indices = @transform_20, window_bounds = array<i64: 384, 128>}, {pipeline_mode = #tpu.pipeline_mode<synchronous>, transform_indices = @transform_21, window_bounds = array<i64: 1, 128>}, {pipeline_mode = #tpu.pipeline_mode<synchronous>, transform_indices = @transform_22, window_bounds = array<i64: 2, 16, 16>}, {pipeline_mode = #tpu.pipeline_mode<synchronous>, transform_indices = @transform_23, window_bounds = array<i64: 512, 128>}, {pipeline_mode = #tpu.pipeline_mode<synchronous>, transform_indices = @transform_24, window_bounds = array<i64: 1, 128>}, {pipeline_mode = #tpu.pipeline_mode<synchronous>, transform_indices = @transform_25, window_bounds = array<i64: 2, 8, 16>}, {pipeline_mode = #tpu.pipeline_mode<synchronous>, transform_indices = @transform_26, window_bounds = array<i64: 256, 128>}, {pipeline_mode = #tpu.pipeline_mode<synchronous>, transform_indices = @transform_27, window_bounds = array<i64: 1, 128>}, {pipeline_mode = #tpu.pipeline_mode<synchronous>, transform_indices = @transform_28, window_bounds = array<i64: 256, 128>}, {pipeline_mode = #tpu.pipeline_mode<synchronous>, transform_indices = @transform_29, window_bounds = array<i64: 1, 128>}, {pipeline_mode = #tpu.pipeline_mode<synchronous>, transform_indices = @transform_30, window_bounds = array<i64: 128, 128>}, {pipeline_mode = #tpu.pipeline_mode<synchronous>, transform_indices = @transform_31, window_bounds = array<i64: 1, 128>}, {transform_indices = @transform_32, window_bounds = array<i64: 8, 128>}]} {
    %c0 = arith.constant 0 : index
    %c0_0 = arith.constant 0 : index
    %0 = vector.load %arg1[%c0, %c0_0] : memref<256x128xf32, #tpu.memory_space<vmem>>, vector<256x128xf32>
    %1 = arith.truncf %0 : vector<256x128xf32> to vector<256x128xbf16>
    %c0_1 = arith.constant 0 : index
    %c0_2 = arith.constant 0 : index
    %c0_3 = arith.constant 0 : index
    %2 = vector.load %arg2[%c0_1, %c0_2, %c0_3] : memref<5x128x256xbf16, #tpu.memory_space<vmem>>, vector<1x128x256xbf16>
    %3 = vector.shape_cast %2 : vector<1x128x256xbf16> to vector<128x256xbf16>
    %cst = arith.constant dense<0.000000e+00> : vector<128x128xf32>
    %4 = tpu.matmul %3, %1, %cst {dimension_numbers = #tpu.dot_dimension_numbers<[1], [0], [0], [1], [0, 0, 1, 1], [], []>} : vector<128x256xbf16>, vector<256x128xbf16>, vector<128x128xf32> -> vector<128x128xf32>
    %5 = arith.truncf %4 : vector<128x128xf32> to vector<128x128xbf16>
    %c1 = arith.constant 1 : index
    %c0_4 = arith.constant 0 : index
    %c0_5 = arith.constant 0 : index
    %6 = vector.load %arg2[%c1, %c0_4, %c0_5] : memref<5x128x256xbf16, #tpu.memory_space<vmem>>, vector<1x128x256xbf16>
    %7 = vector.shape_cast %6 : vector<1x128x256xbf16> to vector<128x256xbf16>
    %cst_6 = arith.constant dense<0.000000e+00> : vector<128x128xf32>
    %8 = tpu.matmul %7, %1, %cst_6 {dimension_numbers = #tpu.dot_dimension_numbers<[1], [0], [0], [1], [0, 0, 1, 1], [], []>} : vector<128x256xbf16>, vector<256x128xbf16>, vector<128x128xf32> -> vector<128x128xf32>
    %9 = arith.truncf %8 : vector<128x128xf32> to vector<128x128xbf16>
    %c2 = arith.constant 2 : index
    %c0_7 = arith.constant 0 : index
    %c0_8 = arith.constant 0 : index
    %10 = vector.load %arg2[%c2, %c0_7, %c0_8] : memref<5x128x256xbf16, #tpu.memory_space<vmem>>, vector<1x128x256xbf16>
    %11 = vector.shape_cast %10 : vector<1x128x256xbf16> to vector<128x256xbf16>
    %cst_9 = arith.constant dense<0.000000e+00> : vector<128x128xf32>
    %12 = tpu.matmul %11, %1, %cst_9 {dimension_numbers = #tpu.dot_dimension_numbers<[1], [0], [0], [1], [0, 0, 1, 1], [], []>} : vector<128x256xbf16>, vector<256x128xbf16>, vector<128x128xf32> -> vector<128x128xf32>
    %13 = arith.truncf %12 : vector<128x128xf32> to vector<128x128xbf16>
    %c3 = arith.constant 3 : index
    %c0_10 = arith.constant 0 : index
    %c0_11 = arith.constant 0 : index
    %14 = vector.load %arg2[%c3, %c0_10, %c0_11] : memref<5x128x256xbf16, #tpu.memory_space<vmem>>, vector<1x128x256xbf16>
    %15 = vector.shape_cast %14 : vector<1x128x256xbf16> to vector<128x256xbf16>
    %cst_12 = arith.constant dense<0.000000e+00> : vector<128x128xf32>
    %16 = tpu.matmul %15, %1, %cst_12 {dimension_numbers = #tpu.dot_dimension_numbers<[1], [0], [0], [1], [0, 0, 1, 1], [], []>} : vector<128x256xbf16>, vector<256x128xbf16>, vector<128x128xf32> -> vector<128x128xf32>
    %17 = arith.truncf %16 : vector<128x128xf32> to vector<128x128xbf16>
    %c4 = arith.constant 4 : index
    %c0_13 = arith.constant 0 : index
    %c0_14 = arith.constant 0 : index
    %18 = vector.load %arg2[%c4, %c0_13, %c0_14] : memref<5x128x256xbf16, #tpu.memory_space<vmem>>, vector<1x128x256xbf16>
    %19 = vector.shape_cast %18 : vector<1x128x256xbf16> to vector<128x256xbf16>
    %cst_15 = arith.constant dense<0.000000e+00> : vector<128x128xf32>
    %20 = tpu.matmul %19, %1, %cst_15 {dimension_numbers = #tpu.dot_dimension_numbers<[1], [0], [0], [1], [0, 0, 1, 1], [], []>} : vector<128x256xbf16>, vector<256x128xbf16>, vector<128x128xf32> -> vector<128x128xf32>
    %21 = arith.truncf %20 : vector<128x128xf32> to vector<128x128xbf16>
    %22 = tpu.concatenate %5, %9, %13, %17, %21 in 1 : vector<128x128xbf16>, vector<128x128xbf16>, vector<128x128xbf16>, vector<128x128xbf16>, vector<128x128xbf16> -> vector<128x640xbf16>
    %c0_16 = arith.constant 0 : index
    %c0_17 = arith.constant 0 : index
    %23 = vector.load %arg3[%c0_16, %c0_17] : memref<640x128xbf16, #tpu.memory_space<vmem>>, vector<640x128xbf16>
    %cst_18 = arith.constant dense<0.000000e+00> : vector<128x128xf32>
    %24 = tpu.matmul %22, %23, %cst_18 {dimension_numbers = #tpu.dot_dimension_numbers<[1], [0], [0], [1], [0, 0, 1, 1], [], []>} : vector<128x640xbf16>, vector<640x128xbf16>, vector<128x128xf32> -> vector<128x128xf32>
    %c0_19 = arith.constant 0 : index
    %c0_20 = arith.constant 0 : index
    %25 = vector.load %arg4[%c0_19, %c0_20] : memref<1x128xf32, #tpu.memory_space<vmem>>, vector<1x128xf32>
    %26 = vector.broadcast %25 : vector<1x128xf32> to vector<128x128xf32>
    %27 = arith.addf %24, %26 : vector<128x128xf32>
    %cst_21 = arith.constant 0.000000e+00 : f32
    %28 = vector.broadcast %cst_21 : f32 to vector<128x128xf32>
    %29 = arith.cmpf oge, %27, %28 : vector<128x128xf32>
    %cst_22 = arith.constant 9.99999974E-5 : f32
    %30 = vector.broadcast %cst_22 : f32 to vector<128x128xf32>
    %31 = arith.mulf %30, %27 : vector<128x128xf32>
    %32 = arith.select %29, %27, %31 : vector<128x128xi1>, vector<128x128xf32>
    %33 = arith.truncf %32 : vector<128x128xf32> to vector<128x128xbf16>
    %c0_23 = arith.constant 0 : index
    %c0_24 = arith.constant 0 : index
    %c0_25 = arith.constant 0 : index
    %34 = vector.load %arg5[%c0_23, %c0_24, %c0_25] : memref<2x128x128xbf16, #tpu.memory_space<vmem>>, vector<1x128x128xbf16>
    %35 = vector.shape_cast %34 : vector<1x128x128xbf16> to vector<128x128xbf16>
    %cst_26 = arith.constant dense<0.000000e+00> : vector<128x128xf32>
    %36 = tpu.matmul %35, %33, %cst_26 {dimension_numbers = #tpu.dot_dimension_numbers<[1], [0], [0], [1], [0, 0, 1, 1], [], []>} : vector<128x128xbf16>, vector<128x128xbf16>, vector<128x128xf32> -> vector<128x128xf32>
    %37 = arith.truncf %36 : vector<128x128xf32> to vector<128x128xbf16>
    %c1_27 = arith.constant 1 : index
    %c0_28 = arith.constant 0 : index
    %c0_29 = arith.constant 0 : index
    %38 = vector.load %arg5[%c1_27, %c0_28, %c0_29] : memref<2x128x128xbf16, #tpu.memory_space<vmem>>, vector<1x128x128xbf16>
    %39 = vector.shape_cast %38 : vector<1x128x128xbf16> to vector<128x128xbf16>
    %cst_30 = arith.constant dense<0.000000e+00> : vector<128x128xf32>
    %40 = tpu.matmul %39, %33, %cst_30 {dimension_numbers = #tpu.dot_dimension_numbers<[1], [0], [0], [1], [0, 0, 1, 1], [], []>} : vector<128x128xbf16>, vector<128x128xbf16>, vector<128x128xf32> -> vector<128x128xf32>
    %41 = arith.truncf %40 : vector<128x128xf32> to vector<128x128xbf16>
    %42 = tpu.concatenate %37, %33, %41, %13 in 1 : vector<128x128xbf16>, vector<128x128xbf16>, vector<128x128xbf16>, vector<128x128xbf16> -> vector<128x512xbf16>
    %c0_31 = arith.constant 0 : index
    %c0_32 = arith.constant 0 : index
    %43 = vector.load %arg6[%c0_31, %c0_32] : memref<512x128xbf16, #tpu.memory_space<vmem>>, vector<512x128xbf16>
    %cst_33 = arith.constant dense<0.000000e+00> : vector<128x128xf32>
    %44 = tpu.matmul %42, %43, %cst_33 {dimension_numbers = #tpu.dot_dimension_numbers<[1], [0], [0], [1], [0, 0, 1, 1], [], []>} : vector<128x512xbf16>, vector<512x128xbf16>, vector<128x128xf32> -> vector<128x128xf32>
    %c0_34 = arith.constant 0 : index
    %c0_35 = arith.constant 0 : index
    %45 = vector.load %arg7[%c0_34, %c0_35] : memref<1x128xf32, #tpu.memory_space<vmem>>, vector<1x128xf32>
    %46 = vector.broadcast %45 : vector<1x128xf32> to vector<128x128xf32>
    %47 = arith.addf %44, %46 : vector<128x128xf32>
    %cst_36 = arith.constant 0.000000e+00 : f32
    %48 = vector.broadcast %cst_36 : f32 to vector<128x128xf32>
    %49 = arith.cmpf oge, %47, %48 : vector<128x128xf32>
    %cst_37 = arith.constant 9.99999974E-5 : f32
    %50 = vector.broadcast %cst_37 : f32 to vector<128x128xf32>
    %51 = arith.mulf %50, %47 : vector<128x128xf32>
    %52 = arith.select %49, %47, %51 : vector<128x128xi1>, vector<128x128xf32>
    %53 = arith.truncf %52 : vector<128x128xf32> to vector<128x128xbf16>
    %c0_38 = arith.constant 0 : index
    %c0_39 = arith.constant 0 : index
    %c0_40 = arith.constant 0 : index
    %54 = vector.load %arg8[%c0_38, %c0_39, %c0_40] : memref<5x64x128xbf16, #tpu.memory_space<vmem>>, vector<1x64x128xbf16>
    %55 = vector.shape_cast %54 : vector<1x64x128xbf16> to vector<64x128xbf16>
    %cst_41 = arith.constant dense<0.000000e+00> : vector<64x128xf32>
    %56 = tpu.matmul %55, %53, %cst_41 {dimension_numbers = #tpu.dot_dimension_numbers<[1], [0], [0], [1], [0, 0, 1, 1], [], []>} : vector<64x128xbf16>, vector<128x128xbf16>, vector<64x128xf32> -> vector<64x128xf32>
    %57 = arith.truncf %56 : vector<64x128xf32> to vector<64x128xbf16>
    %c1_42 = arith.constant 1 : index
    %c0_43 = arith.constant 0 : index
    %c0_44 = arith.constant 0 : index
    %58 = vector.load %arg8[%c1_42, %c0_43, %c0_44] : memref<5x64x128xbf16, #tpu.memory_space<vmem>>, vector<1x64x128xbf16>
    %59 = vector.shape_cast %58 : vector<1x64x128xbf16> to vector<64x128xbf16>
    %cst_45 = arith.constant dense<0.000000e+00> : vector<64x128xf32>
    %60 = tpu.matmul %59, %53, %cst_45 {dimension_numbers = #tpu.dot_dimension_numbers<[1], [0], [0], [1], [0, 0, 1, 1], [], []>} : vector<64x128xbf16>, vector<128x128xbf16>, vector<64x128xf32> -> vector<64x128xf32>
    %61 = arith.truncf %60 : vector<64x128xf32> to vector<64x128xbf16>
    %c2_46 = arith.constant 2 : index
    %c0_47 = arith.constant 0 : index
    %c0_48 = arith.constant 0 : index
    %62 = vector.load %arg8[%c2_46, %c0_47, %c0_48] : memref<5x64x128xbf16, #tpu.memory_space<vmem>>, vector<1x64x128xbf16>
    %63 = vector.shape_cast %62 : vector<1x64x128xbf16> to vector<64x128xbf16>
    %cst_49 = arith.constant dense<0.000000e+00> : vector<64x128xf32>
    %64 = tpu.matmul %63, %53, %cst_49 {dimension_numbers = #tpu.dot_dimension_numbers<[1], [0], [0], [1], [0, 0, 1, 1], [], []>} : vector<64x128xbf16>, vector<128x128xbf16>, vector<64x128xf32> -> vector<64x128xf32>
    %65 = arith.truncf %64 : vector<64x128xf32> to vector<64x128xbf16>
    %c3_50 = arith.constant 3 : index
    %c0_51 = arith.constant 0 : index
    %c0_52 = arith.constant 0 : index
    %66 = vector.load %arg8[%c3_50, %c0_51, %c0_52] : memref<5x64x128xbf16, #tpu.memory_space<vmem>>, vector<1x64x128xbf16>
    %67 = vector.shape_cast %66 : vector<1x64x128xbf16> to vector<64x128xbf16>
    %cst_53 = arith.constant dense<0.000000e+00> : vector<64x128xf32>
    %68 = tpu.matmul %67, %53, %cst_53 {dimension_numbers = #tpu.dot_dimension_numbers<[1], [0], [0], [1], [0, 0, 1, 1], [], []>} : vector<64x128xbf16>, vector<128x128xbf16>, vector<64x128xf32> -> vector<64x128xf32>
    %69 = arith.truncf %68 : vector<64x128xf32> to vector<64x128xbf16>
    %c4_54 = arith.constant 4 : index
    %c0_55 = arith.constant 0 : index
    %c0_56 = arith.constant 0 : index
    %70 = vector.load %arg8[%c4_54, %c0_55, %c0_56] : memref<5x64x128xbf16, #tpu.memory_space<vmem>>, vector<1x64x128xbf16>
    %71 = vector.shape_cast %70 : vector<1x64x128xbf16> to vector<64x128xbf16>
    %cst_57 = arith.constant dense<0.000000e+00> : vector<64x128xf32>
    %72 = tpu.matmul %71, %53, %cst_57 {dimension_numbers = #tpu.dot_dimension_numbers<[1], [0], [0], [1], [0, 0, 1, 1], [], []>} : vector<64x128xbf16>, vector<128x128xbf16>, vector<64x128xf32> -> vector<64x128xf32>
    %73 = arith.truncf %72 : vector<64x128xf32> to vector<64x128xbf16>
    %74 = tpu.concatenate %57, %61, %65, %69, %73 in 1 : vector<64x128xbf16>, vector<64x128xbf16>, vector<64x128xbf16>, vector<64x128xbf16>, vector<64x128xbf16> -> vector<64x640xbf16>
    %c0_58 = arith.constant 0 : index
    %c0_59 = arith.constant 0 : index
    %75 = vector.load %arg9[%c0_58, %c0_59] : memref<640x128xbf16, #tpu.memory_space<vmem>>, vector<640x128xbf16>
    %cst_60 = arith.constant dense<0.000000e+00> : vector<64x128xf32>
    %76 = tpu.matmul %74, %75, %cst_60 {dimension_numbers = #tpu.dot_dimension_numbers<[1], [0], [0], [1], [0, 0, 1, 1], [], []>} : vector<64x640xbf16>, vector<640x128xbf16>, vector<64x128xf32> -> vector<64x128xf32>
    %c0_61 = arith.constant 0 : index
    %c0_62 = arith.constant 0 : index
    %77 = vector.load %arg10[%c0_61, %c0_62] : memref<1x128xf32, #tpu.memory_space<vmem>>, vector<1x128xf32>
    %78 = vector.broadcast %77 : vector<1x128xf32> to vector<64x128xf32>
    %79 = arith.addf %76, %78 : vector<64x128xf32>
    %cst_63 = arith.constant 0.000000e+00 : f32
    %80 = vector.broadcast %cst_63 : f32 to vector<64x128xf32>
    %81 = arith.cmpf oge, %79, %80 : vector<64x128xf32>
    %cst_64 = arith.constant 9.99999974E-5 : f32
    %82 = vector.broadcast %cst_64 : f32 to vector<64x128xf32>
    %83 = arith.mulf %82, %79 : vector<64x128xf32>
    %84 = arith.select %81, %79, %83 : vector<64x128xi1>, vector<64x128xf32>
    %85 = arith.truncf %84 : vector<64x128xf32> to vector<64x128xbf16>
    %c0_65 = arith.constant 0 : index
    %c0_66 = arith.constant 0 : index
    %c0_67 = arith.constant 0 : index
    %86 = vector.load %arg11[%c0_65, %c0_66, %c0_67] : memref<2x64x64xbf16, #tpu.memory_space<vmem>>, vector<1x64x64xbf16>
    %87 = vector.shape_cast %86 : vector<1x64x64xbf16> to vector<64x64xbf16>
    %cst_68 = arith.constant dense<0.000000e+00> : vector<64x128xf32>
    %88 = tpu.matmul %87, %85, %cst_68 {dimension_numbers = #tpu.dot_dimension_numbers<[1], [0], [0], [1], [0, 0, 1, 1], [], []>} : vector<64x64xbf16>, vector<64x128xbf16>, vector<64x128xf32> -> vector<64x128xf32>
    %89 = arith.truncf %88 : vector<64x128xf32> to vector<64x128xbf16>
    %c1_69 = arith.constant 1 : index
    %c0_70 = arith.constant 0 : index
    %c0_71 = arith.constant 0 : index
    %90 = vector.load %arg11[%c1_69, %c0_70, %c0_71] : memref<2x64x64xbf16, #tpu.memory_space<vmem>>, vector<1x64x64xbf16>
    %91 = vector.shape_cast %90 : vector<1x64x64xbf16> to vector<64x64xbf16>
    %cst_72 = arith.constant dense<0.000000e+00> : vector<64x128xf32>
    %92 = tpu.matmul %91, %85, %cst_72 {dimension_numbers = #tpu.dot_dimension_numbers<[1], [0], [0], [1], [0, 0, 1, 1], [], []>} : vector<64x64xbf16>, vector<64x128xbf16>, vector<64x128xf32> -> vector<64x128xf32>
    %93 = arith.truncf %92 : vector<64x128xf32> to vector<64x128xbf16>
    %94 = tpu.concatenate %89, %85, %93, %65 in 1 : vector<64x128xbf16>, vector<64x128xbf16>, vector<64x128xbf16>, vector<64x128xbf16> -> vector<64x512xbf16>
    %c0_73 = arith.constant 0 : index
    %c0_74 = arith.constant 0 : index
    %95 = vector.load %arg12[%c0_73, %c0_74] : memref<512x128xbf16, #tpu.memory_space<vmem>>, vector<512x128xbf16>
    %cst_75 = arith.constant dense<0.000000e+00> : vector<64x128xf32>
    %96 = tpu.matmul %94, %95, %cst_75 {dimension_numbers = #tpu.dot_dimension_numbers<[1], [0], [0], [1], [0, 0, 1, 1], [], []>} : vector<64x512xbf16>, vector<512x128xbf16>, vector<64x128xf32> -> vector<64x128xf32>
    %c0_76 = arith.constant 0 : index
    %c0_77 = arith.constant 0 : index
    %97 = vector.load %arg13[%c0_76, %c0_77] : memref<1x128xf32, #tpu.memory_space<vmem>>, vector<1x128xf32>
    %98 = vector.broadcast %97 : vector<1x128xf32> to vector<64x128xf32>
    %99 = arith.addf %96, %98 : vector<64x128xf32>
    %cst_78 = arith.constant 0.000000e+00 : f32
    %100 = vector.broadcast %cst_78 : f32 to vector<64x128xf32>
    %101 = arith.cmpf oge, %99, %100 : vector<64x128xf32>
    %cst_79 = arith.constant 9.99999974E-5 : f32
    %102 = vector.broadcast %cst_79 : f32 to vector<64x128xf32>
    %103 = arith.mulf %102, %99 : vector<64x128xf32>
    %104 = arith.select %101, %99, %103 : vector<64x128xi1>, vector<64x128xf32>
    %105 = arith.truncf %104 : vector<64x128xf32> to vector<64x128xbf16>
    %c0_80 = arith.constant 0 : index
    %c0_81 = arith.constant 0 : index
    %c0_82 = arith.constant 0 : index
    %106 = vector.load %arg14[%c0_80, %c0_81, %c0_82] : memref<3x32x64xbf16, #tpu.memory_space<vmem>>, vector<1x32x64xbf16>
    %107 = vector.shape_cast %106 : vector<1x32x64xbf16> to vector<32x64xbf16>
    %cst_83 = arith.constant dense<0.000000e+00> : vector<32x128xf32>
    %108 = tpu.matmul %107, %105, %cst_83 {dimension_numbers = #tpu.dot_dimension_numbers<[1], [0], [0], [1], [0, 0, 1, 1], [], []>} : vector<32x64xbf16>, vector<64x128xbf16>, vector<32x128xf32> -> vector<32x128xf32>
    %109 = arith.truncf %108 : vector<32x128xf32> to vector<32x128xbf16>
    %c1_84 = arith.constant 1 : index
    %c0_85 = arith.constant 0 : index
    %c0_86 = arith.constant 0 : index
    %110 = vector.load %arg14[%c1_84, %c0_85, %c0_86] : memref<3x32x64xbf16, #tpu.memory_space<vmem>>, vector<1x32x64xbf16>
    %111 = vector.shape_cast %110 : vector<1x32x64xbf16> to vector<32x64xbf16>
    %cst_87 = arith.constant dense<0.000000e+00> : vector<32x128xf32>
    %112 = tpu.matmul %111, %105, %cst_87 {dimension_numbers = #tpu.dot_dimension_numbers<[1], [0], [0], [1], [0, 0, 1, 1], [], []>} : vector<32x64xbf16>, vector<64x128xbf16>, vector<32x128xf32> -> vector<32x128xf32>
    %113 = arith.truncf %112 : vector<32x128xf32> to vector<32x128xbf16>
    %c2_88 = arith.constant 2 : index
    %c0_89 = arith.constant 0 : index
    %c0_90 = arith.constant 0 : index
    %114 = vector.load %arg14[%c2_88, %c0_89, %c0_90] : memref<3x32x64xbf16, #tpu.memory_space<vmem>>, vector<1x32x64xbf16>
    %115 = vector.shape_cast %114 : vector<1x32x64xbf16> to vector<32x64xbf16>
    %cst_91 = arith.constant dense<0.000000e+00> : vector<32x128xf32>
    %116 = tpu.matmul %115, %105, %cst_91 {dimension_numbers = #tpu.dot_dimension_numbers<[1], [0], [0], [1], [0, 0, 1, 1], [], []>} : vector<32x64xbf16>, vector<64x128xbf16>, vector<32x128xf32> -> vector<32x128xf32>
    %117 = arith.truncf %116 : vector<32x128xf32> to vector<32x128xbf16>
    %118 = tpu.concatenate %109, %113, %117 in 1 : vector<32x128xbf16>, vector<32x128xbf16>, vector<32x128xbf16> -> vector<32x384xbf16>
    %c0_92 = arith.constant 0 : index
    %c0_93 = arith.constant 0 : index
    %119 = vector.load %arg15[%c0_92, %c0_93] : memref<384x128xbf16, #tpu.memory_space<vmem>>, vector<384x128xbf16>
    %cst_94 = arith.constant dense<0.000000e+00> : vector<32x128xf32>
    %120 = tpu.matmul %118, %119, %cst_94 {dimension_numbers = #tpu.dot_dimension_numbers<[1], [0], [0], [1], [0, 0, 1, 1], [], []>} : vector<32x384xbf16>, vector<384x128xbf16>, vector<32x128xf32> -> vector<32x128xf32>
    %c0_95 = arith.constant 0 : index
    %c0_96 = arith.constant 0 : index
    %121 = vector.load %arg16[%c0_95, %c0_96] : memref<1x128xf32, #tpu.memory_space<vmem>>, vector<1x128xf32>
    %122 = vector.broadcast %121 : vector<1x128xf32> to vector<32x128xf32>
    %123 = arith.addf %120, %122 : vector<32x128xf32>
    %cst_97 = arith.constant 0.000000e+00 : f32
    %124 = vector.broadcast %cst_97 : f32 to vector<32x128xf32>
    %125 = arith.cmpf oge, %123, %124 : vector<32x128xf32>
    %cst_98 = arith.constant 9.99999974E-5 : f32
    %126 = vector.broadcast %cst_98 : f32 to vector<32x128xf32>
    %127 = arith.mulf %126, %123 : vector<32x128xf32>
    %128 = arith.select %125, %123, %127 : vector<32x128xi1>, vector<32x128xf32>
    %129 = arith.truncf %128 : vector<32x128xf32> to vector<32x128xbf16>
    %c0_99 = arith.constant 0 : index
    %c0_100 = arith.constant 0 : index
    %c0_101 = arith.constant 0 : index
    %130 = vector.load %arg17[%c0_99, %c0_100, %c0_101] : memref<2x32x32xbf16, #tpu.memory_space<vmem>>, vector<1x32x32xbf16>
    %131 = vector.shape_cast %130 : vector<1x32x32xbf16> to vector<32x32xbf16>
    %cst_102 = arith.constant dense<0.000000e+00> : vector<32x128xf32>
    %132 = tpu.matmul %131, %129, %cst_102 {dimension_numbers = #tpu.dot_dimension_numbers<[1], [0], [0], [1], [0, 0, 1, 1], [], []>} : vector<32x32xbf16>, vector<32x128xbf16>, vector<32x128xf32> -> vector<32x128xf32>
    %133 = arith.truncf %132 : vector<32x128xf32> to vector<32x128xbf16>
    %c1_103 = arith.constant 1 : index
    %c0_104 = arith.constant 0 : index
    %c0_105 = arith.constant 0 : index
    %134 = vector.load %arg17[%c1_103, %c0_104, %c0_105] : memref<2x32x32xbf16, #tpu.memory_space<vmem>>, vector<1x32x32xbf16>
    %135 = vector.shape_cast %134 : vector<1x32x32xbf16> to vector<32x32xbf16>
    %cst_106 = arith.constant dense<0.000000e+00> : vector<32x128xf32>
    %136 = tpu.matmul %135, %129, %cst_106 {dimension_numbers = #tpu.dot_dimension_numbers<[1], [0], [0], [1], [0, 0, 1, 1], [], []>} : vector<32x32xbf16>, vector<32x128xbf16>, vector<32x128xf32> -> vector<32x128xf32>
    %137 = arith.truncf %136 : vector<32x128xf32> to vector<32x128xbf16>
    %138 = tpu.concatenate %133, %129, %137, %113 in 1 : vector<32x128xbf16>, vector<32x128xbf16>, vector<32x128xbf16>, vector<32x128xbf16> -> vector<32x512xbf16>
    %c0_107 = arith.constant 0 : index
    %c0_108 = arith.constant 0 : index
    %139 = vector.load %arg18[%c0_107, %c0_108] : memref<512x128xbf16, #tpu.memory_space<vmem>>, vector<512x128xbf16>
    %cst_109 = arith.constant dense<0.000000e+00> : vector<32x128xf32>
    %140 = tpu.matmul %138, %139, %cst_109 {dimension_numbers = #tpu.dot_dimension_numbers<[1], [0], [0], [1], [0, 0, 1, 1], [], []>} : vector<32x512xbf16>, vector<512x128xbf16>, vector<32x128xf32> -> vector<32x128xf32>
    %c0_110 = arith.constant 0 : index
    %c0_111 = arith.constant 0 : index
    %141 = vector.load %arg19[%c0_110, %c0_111] : memref<1x128xf32, #tpu.memory_space<vmem>>, vector<1x128xf32>
    %142 = vector.broadcast %141 : vector<1x128xf32> to vector<32x128xf32>
    %143 = arith.addf %140, %142 : vector<32x128xf32>
    %cst_112 = arith.constant 0.000000e+00 : f32
    %144 = vector.broadcast %cst_112 : f32 to vector<32x128xf32>
    %145 = arith.cmpf oge, %143, %144 : vector<32x128xf32>
    %cst_113 = arith.constant 9.99999974E-5 : f32
    %146 = vector.broadcast %cst_113 : f32 to vector<32x128xf32>
    %147 = arith.mulf %146, %143 : vector<32x128xf32>
    %148 = arith.select %145, %143, %147 : vector<32x128xi1>, vector<32x128xf32>
    %149 = arith.truncf %148 : vector<32x128xf32> to vector<32x128xbf16>
    %c0_114 = arith.constant 0 : index
    %c0_115 = arith.constant 0 : index
    %c0_116 = arith.constant 0 : index
    %150 = vector.load %arg20[%c0_114, %c0_115, %c0_116] : memref<3x16x32xbf16, #tpu.memory_space<vmem>>, vector<1x16x32xbf16>
    %151 = vector.shape_cast %150 : vector<1x16x32xbf16> to vector<16x32xbf16>
    %cst_117 = arith.constant dense<0.000000e+00> : vector<16x128xf32>
    %152 = tpu.matmul %151, %149, %cst_117 {dimension_numbers = #tpu.dot_dimension_numbers<[1], [0], [0], [1], [0, 0, 1, 1], [], []>} : vector<16x32xbf16>, vector<32x128xbf16>, vector<16x128xf32> -> vector<16x128xf32>
    %153 = arith.truncf %152 : vector<16x128xf32> to vector<16x128xbf16>
    %c1_118 = arith.constant 1 : index
    %c0_119 = arith.constant 0 : index
    %c0_120 = arith.constant 0 : index
    %154 = vector.load %arg20[%c1_118, %c0_119, %c0_120] : memref<3x16x32xbf16, #tpu.memory_space<vmem>>, vector<1x16x32xbf16>
    %155 = vector.shape_cast %154 : vector<1x16x32xbf16> to vector<16x32xbf16>
    %cst_121 = arith.constant dense<0.000000e+00> : vector<16x128xf32>
    %156 = tpu.matmul %155, %149, %cst_121 {dimension_numbers = #tpu.dot_dimension_numbers<[1], [0], [0], [1], [0, 0, 1, 1], [], []>} : vector<16x32xbf16>, vector<32x128xbf16>, vector<16x128xf32> -> vector<16x128xf32>
    %157 = arith.truncf %156 : vector<16x128xf32> to vector<16x128xbf16>
    %c2_122 = arith.constant 2 : index
    %c0_123 = arith.constant 0 : index
    %c0_124 = arith.constant 0 : index
    %158 = vector.load %arg20[%c2_122, %c0_123, %c0_124] : memref<3x16x32xbf16, #tpu.memory_space<vmem>>, vector<1x16x32xbf16>
    %159 = vector.shape_cast %158 : vector<1x16x32xbf16> to vector<16x32xbf16>
    %cst_125 = arith.constant dense<0.000000e+00> : vector<16x128xf32>
    %160 = tpu.matmul %159, %149, %cst_125 {dimension_numbers = #tpu.dot_dimension_numbers<[1], [0], [0], [1], [0, 0, 1, 1], [], []>} : vector<16x32xbf16>, vector<32x128xbf16>, vector<16x128xf32> -> vector<16x128xf32>
    %161 = arith.truncf %160 : vector<16x128xf32> to vector<16x128xbf16>
    %162 = tpu.concatenate %153, %157, %161 in 1 : vector<16x128xbf16>, vector<16x128xbf16>, vector<16x128xbf16> -> vector<16x384xbf16>
    %c0_126 = arith.constant 0 : index
    %c0_127 = arith.constant 0 : index
    %163 = vector.load %arg21[%c0_126, %c0_127] : memref<384x128xbf16, #tpu.memory_space<vmem>>, vector<384x128xbf16>
    %cst_128 = arith.constant dense<0.000000e+00> : vector<16x128xf32>
    %164 = tpu.matmul %162, %163, %cst_128 {dimension_numbers = #tpu.dot_dimension_numbers<[1], [0], [0], [1], [0, 0, 1, 1], [], []>} : vector<16x384xbf16>, vector<384x128xbf16>, vector<16x128xf32> -> vector<16x128xf32>
    %c0_129 = arith.constant 0 : index
    %c0_130 = arith.constant 0 : index
    %165 = vector.load %arg22[%c0_129, %c0_130] : memref<1x128xf32, #tpu.memory_space<vmem>>, vector<1x128xf32>
    %166 = vector.broadcast %165 : vector<1x128xf32> to vector<16x128xf32>
    %167 = arith.addf %164, %166 : vector<16x128xf32>
    %cst_131 = arith.constant 0.000000e+00 : f32
    %168 = vector.broadcast %cst_131 : f32 to vector<16x128xf32>
    %169 = arith.cmpf oge, %167, %168 : vector<16x128xf32>
    %cst_132 = arith.constant 9.99999974E-5 : f32
    %170 = vector.broadcast %cst_132 : f32 to vector<16x128xf32>
    %171 = arith.mulf %170, %167 : vector<16x128xf32>
    %172 = arith.select %169, %167, %171 : vector<16x128xi1>, vector<16x128xf32>
    %173 = arith.truncf %172 : vector<16x128xf32> to vector<16x128xbf16>
    %c0_133 = arith.constant 0 : index
    %c0_134 = arith.constant 0 : index
    %c0_135 = arith.constant 0 : index
    %174 = vector.load %arg23[%c0_133, %c0_134, %c0_135] : memref<2x16x16xbf16, #tpu.memory_space<vmem>>, vector<1x16x16xbf16>
    %175 = vector.shape_cast %174 : vector<1x16x16xbf16> to vector<16x16xbf16>
    %cst_136 = arith.constant dense<0.000000e+00> : vector<16x128xf32>
    %176 = tpu.matmul %175, %173, %cst_136 {dimension_numbers = #tpu.dot_dimension_numbers<[1], [0], [0], [1], [0, 0, 1, 1], [], []>} : vector<16x16xbf16>, vector<16x128xbf16>, vector<16x128xf32> -> vector<16x128xf32>
    %177 = arith.truncf %176 : vector<16x128xf32> to vector<16x128xbf16>
    %c1_137 = arith.constant 1 : index
    %c0_138 = arith.constant 0 : index
    %c0_139 = arith.constant 0 : index
    %178 = vector.load %arg23[%c1_137, %c0_138, %c0_139] : memref<2x16x16xbf16, #tpu.memory_space<vmem>>, vector<1x16x16xbf16>
    %179 = vector.shape_cast %178 : vector<1x16x16xbf16> to vector<16x16xbf16>
    %cst_140 = arith.constant dense<0.000000e+00> : vector<16x128xf32>
    %180 = tpu.matmul %179, %173, %cst_140 {dimension_numbers = #tpu.dot_dimension_numbers<[1], [0], [0], [1], [0, 0, 1, 1], [], []>} : vector<16x16xbf16>, vector<16x128xbf16>, vector<16x128xf32> -> vector<16x128xf32>
    %181 = arith.truncf %180 : vector<16x128xf32> to vector<16x128xbf16>
    %182 = tpu.concatenate %177, %173, %181, %157 in 1 : vector<16x128xbf16>, vector<16x128xbf16>, vector<16x128xbf16>, vector<16x128xbf16> -> vector<16x512xbf16>
    %c0_141 = arith.constant 0 : index
    %c0_142 = arith.constant 0 : index
    %183 = vector.load %arg24[%c0_141, %c0_142] : memref<512x128xbf16, #tpu.memory_space<vmem>>, vector<512x128xbf16>
    %cst_143 = arith.constant dense<0.000000e+00> : vector<16x128xf32>
    %184 = tpu.matmul %182, %183, %cst_143 {dimension_numbers = #tpu.dot_dimension_numbers<[1], [0], [0], [1], [0, 0, 1, 1], [], []>} : vector<16x512xbf16>, vector<512x128xbf16>, vector<16x128xf32> -> vector<16x128xf32>
    %c0_144 = arith.constant 0 : index
    %c0_145 = arith.constant 0 : index
    %185 = vector.load %arg25[%c0_144, %c0_145] : memref<1x128xf32, #tpu.memory_space<vmem>>, vector<1x128xf32>
    %186 = vector.broadcast %185 : vector<1x128xf32> to vector<16x128xf32>
    %187 = arith.addf %184, %186 : vector<16x128xf32>
    %cst_146 = arith.constant 0.000000e+00 : f32
    %188 = vector.broadcast %cst_146 : f32 to vector<16x128xf32>
    %189 = arith.cmpf oge, %187, %188 : vector<16x128xf32>
    %cst_147 = arith.constant 9.99999974E-5 : f32
    %190 = vector.broadcast %cst_147 : f32 to vector<16x128xf32>
    %191 = arith.mulf %190, %187 : vector<16x128xf32>
    %192 = arith.select %189, %187, %191 : vector<16x128xi1>, vector<16x128xf32>
    %193 = arith.truncf %192 : vector<16x128xf32> to vector<16x128xbf16>
    %c0_148 = arith.constant 0 : index
    %c0_149 = arith.constant 0 : index
    %c0_150 = arith.constant 0 : index
    %194 = vector.load %arg26[%c0_148, %c0_149, %c0_150] : memref<2x8x16xbf16, #tpu.memory_space<vmem>>, vector<1x8x16xbf16>
    %195 = vector.shape_cast %194 : vector<1x8x16xbf16> to vector<8x16xbf16>
    %cst_151 = arith.constant dense<0.000000e+00> : vector<8x128xf32>
    %196 = tpu.matmul %195, %193, %cst_151 {dimension_numbers = #tpu.dot_dimension_numbers<[1], [0], [0], [1], [0, 0, 1, 1], [], []>} : vector<8x16xbf16>, vector<16x128xbf16>, vector<8x128xf32> -> vector<8x128xf32>
    %197 = arith.truncf %196 : vector<8x128xf32> to vector<8x128xbf16>
    %c1_152 = arith.constant 1 : index
    %c0_153 = arith.constant 0 : index
    %c0_154 = arith.constant 0 : index
    %198 = vector.load %arg26[%c1_152, %c0_153, %c0_154] : memref<2x8x16xbf16, #tpu.memory_space<vmem>>, vector<1x8x16xbf16>
    %199 = vector.shape_cast %198 : vector<1x8x16xbf16> to vector<8x16xbf16>
    %cst_155 = arith.constant dense<0.000000e+00> : vector<8x128xf32>
    %200 = tpu.matmul %199, %193, %cst_155 {dimension_numbers = #tpu.dot_dimension_numbers<[1], [0], [0], [1], [0, 0, 1, 1], [], []>} : vector<8x16xbf16>, vector<16x128xbf16>, vector<8x128xf32> -> vector<8x128xf32>
    %201 = arith.truncf %200 : vector<8x128xf32> to vector<8x128xbf16>
    %202 = tpu.concatenate %197, %201 in 1 : vector<8x128xbf16>, vector<8x128xbf16> -> vector<8x256xbf16>
    %c0_156 = arith.constant 0 : index
    %c0_157 = arith.constant 0 : index
    %203 = vector.load %arg27[%c0_156, %c0_157] : memref<256x128xbf16, #tpu.memory_space<vmem>>, vector<256x128xbf16>
    %cst_158 = arith.constant dense<0.000000e+00> : vector<8x128xf32>
    %204 = tpu.matmul %202, %203, %cst_158 {dimension_numbers = #tpu.dot_dimension_numbers<[1], [0], [0], [1], [0, 0, 1, 1], [], []>} : vector<8x256xbf16>, vector<256x128xbf16>, vector<8x128xf32> -> vector<8x128xf32>
    %c0_159 = arith.constant 0 : index
    %c0_160 = arith.constant 0 : index
    %205 = vector.load %arg28[%c0_159, %c0_160] : memref<1x128xf32, #tpu.memory_space<vmem>>, vector<1x128xf32>
    %206 = vector.broadcast %205 : vector<1x128xf32> to vector<8x128xf32>
    %207 = arith.addf %204, %206 : vector<8x128xf32>
    %cst_161 = arith.constant 0.000000e+00 : f32
    %208 = vector.broadcast %cst_161 : f32 to vector<8x128xf32>
    %209 = arith.cmpf oge, %207, %208 : vector<8x128xf32>
    %cst_162 = arith.constant 9.99999974E-5 : f32
    %210 = vector.broadcast %cst_162 : f32 to vector<8x128xf32>
    %211 = arith.mulf %210, %207 : vector<8x128xf32>
    %212 = arith.select %209, %207, %211 : vector<8x128xi1>, vector<8x128xf32>
    %213 = arith.truncf %212 : vector<8x128xf32> to vector<8x128xbf16>
    %214 = tpu.concatenate %213, %197 in 1 : vector<8x128xbf16>, vector<8x128xbf16> -> vector<8x256xbf16>
    %c0_163 = arith.constant 0 : index
    %c0_164 = arith.constant 0 : index
    %215 = vector.load %arg29[%c0_163, %c0_164] : memref<256x128xbf16, #tpu.memory_space<vmem>>, vector<256x128xbf16>
    %cst_165 = arith.constant dense<0.000000e+00> : vector<8x128xf32>
    %216 = tpu.matmul %214, %215, %cst_165 {dimension_numbers = #tpu.dot_dimension_numbers<[1], [0], [0], [1], [0, 0, 1, 1], [], []>} : vector<8x256xbf16>, vector<256x128xbf16>, vector<8x128xf32> -> vector<8x128xf32>
    %c0_166 = arith.constant 0 : index
    %c0_167 = arith.constant 0 : index
    %217 = vector.load %arg30[%c0_166, %c0_167] : memref<1x128xf32, #tpu.memory_space<vmem>>, vector<1x128xf32>
    %218 = vector.broadcast %217 : vector<1x128xf32> to vector<8x128xf32>
    %219 = arith.addf %216, %218 : vector<8x128xf32>
    %cst_168 = arith.constant 0.000000e+00 : f32
    %220 = vector.broadcast %cst_168 : f32 to vector<8x128xf32>
    %221 = arith.cmpf oge, %219, %220 : vector<8x128xf32>
    %cst_169 = arith.constant 9.99999974E-5 : f32
    %222 = vector.broadcast %cst_169 : f32 to vector<8x128xf32>
    %223 = arith.mulf %222, %219 : vector<8x128xf32>
    %224 = arith.select %221, %219, %223 : vector<8x128xi1>, vector<8x128xf32>
    %225 = arith.truncf %224 : vector<8x128xf32> to vector<8x128xbf16>
    %c0_170 = arith.constant 0 : index
    %c0_171 = arith.constant 0 : index
    %226 = vector.load %arg31[%c0_170, %c0_171] : memref<128x128xbf16, #tpu.memory_space<vmem>>, vector<128x128xbf16>
    %cst_172 = arith.constant dense<0.000000e+00> : vector<8x128xf32>
    %227 = tpu.matmul %225, %226, %cst_172 {dimension_numbers = #tpu.dot_dimension_numbers<[1], [0], [0], [1], [0, 0, 1, 1], [], []>} : vector<8x128xbf16>, vector<128x128xbf16>, vector<8x128xf32> -> vector<8x128xf32>
    %c0_173 = arith.constant 0 : index
    %c0_174 = arith.constant 0 : index
    %228 = vector.load %arg32[%c0_173, %c0_174] : memref<1x128xf32, #tpu.memory_space<vmem>>, vector<1x128xf32>
    %229 = vector.broadcast %228 : vector<1x128xf32> to vector<8x128xf32>
    %230 = arith.addf %227, %229 : vector<8x128xf32>
    %c0_175 = arith.constant 0 : index
    %c0_176 = arith.constant 0 : index
    %231 = vector.load %arg33[%c0_175, %c0_176] : memref<8x128xf32, #tpu.memory_space<vmem>>, vector<8x128xf32>
    tpu.vector_store %arg33[%c0_175, %c0_176], %230 {strides = array<i32>} : memref<8x128xf32, #tpu.memory_space<vmem>>, vector<8x128xf32>,
    return
  }
  func.func @transform_0(%arg0: i32) -> (i32, i32) {
    %c0_i32 = arith.constant 0 : i32
    %c0_i32_0 = arith.constant 0 : i32
    return %arg0, %c0_i32 : i32, i32
  }
  func.func @transform_1(%arg0: i32) -> (i32, i32, i32) {
    %c0_i32 = arith.constant 0 : i32
    %c0_i32_0 = arith.constant 0 : i32
    %c0_i32_1 = arith.constant 0 : i32
    %c0_i32_2 = arith.constant 0 : i32
    return %c0_i32, %c0_i32_0, %c0_i32_1 : i32, i32, i32
  }
  func.func @transform_2(%arg0: i32) -> (i32, i32) {
    %c0_i32 = arith.constant 0 : i32
    %c0_i32_0 = arith.constant 0 : i32
    %c0_i32_1 = arith.constant 0 : i32
    return %c0_i32, %c0_i32_0 : i32, i32
  }
  func.func @transform_3(%arg0: i32) -> (i32, i32) {
    %c0_i32 = arith.constant 0 : i32
    %c0_i32_0 = arith.constant 0 : i32
    %c0_i32_1 = arith.constant 0 : i32
    return %c0_i32, %c0_i32_0 : i32, i32
  }
  func.func @transform_4(%arg0: i32) -> (i32, i32, i32) {
    %c0_i32 = arith.constant 0 : i32
    %c0_i32_0 = arith.constant 0 : i32
    %c0_i32_1 = arith.constant 0 : i32
    %c0_i32_2 = arith.constant 0 : i32
    return %c0_i32, %c0_i32_0, %c0_i32_1 : i32, i32, i32
  }
  func.func @transform_5(%arg0: i32) -> (i32, i32) {
    %c0_i32 = arith.constant 0 : i32
    %c0_i32_0 = arith.constant 0 : i32
    %c0_i32_1 = arith.constant 0 : i32
    return %c0_i32, %c0_i32_0 : i32, i32
  }
  func.func @transform_6(%arg0: i32) -> (i32, i32) {
    %c0_i32 = arith.constant 0 : i32
    %c0_i32_0 = arith.constant 0 : i32
    %c0_i32_1 = arith.constant 0 : i32
    return %c0_i32, %c0_i32_0 : i32, i32
  }
  func.func @transform_7(%arg0: i32) -> (i32, i32, i32) {
    %c0_i32 = arith.constant 0 : i32
    %c0_i32_0 = arith.constant 0 : i32
    %c0_i32_1 = arith.constant 0 : i32
    %c0_i32_2 = arith.constant 0 : i32
    return %c0_i32, %c0_i32_0, %c0_i32_1 : i32, i32, i32
  }
  func.func @transform_8(%arg0: i32) -> (i32, i32) {
    %c0_i32 = arith.constant 0 : i32
    %c0_i32_0 = arith.constant 0 : i32
    %c0_i32_1 = arith.constant 0 : i32
    return %c0_i32, %c0_i32_0 : i32, i32
  }
  func.func @transform_9(%arg0: i32) -> (i32, i32) {
    %c0_i32 = arith.constant 0 : i32
    %c0_i32_0 = arith.constant 0 : i32
    %c0_i32_1 = arith.constant 0 : i32
    return %c0_i32, %c0_i32_0 : i32, i32
  }
  func.func @transform_10(%arg0: i32) -> (i32, i32, i32) {
    %c0_i32 = arith.constant 0 : i32
    %c0_i32_0 = arith.constant 0 : i32
    %c0_i32_1 = arith.constant 0 : i32
    %c0_i32_2 = arith.constant 0 : i32
    return %c0_i32, %c0_i32_0, %c0_i32_1 : i32, i32, i32
  }
  func.func @transform_11(%arg0: i32) -> (i32, i32) {
    %c0_i32 = arith.constant 0 : i32
    %c0_i32_0 = arith.constant 0 : i32
    %c0_i32_1 = arith.constant 0 : i32
    return %c0_i32, %c0_i32_0 : i32, i32
  }
  func.func @transform_12(%arg0: i32) -> (i32, i32) {
    %c0_i32 = arith.constant 0 : i32
    %c0_i32_0 = arith.constant 0 : i32
    %c0_i32_1 = arith.constant 0 : i32
    return %c0_i32, %c0_i32_0 : i32, i32
  }
  func.func @transform_13(%arg0: i32) -> (i32, i32, i32) {
    %c0_i32 = arith.constant 0 : i32
    %c0_i32_0 = arith.constant 0 : i32
    %c0_i32_1 = arith.constant 0 : i32
    %c0_i32_2 = arith.constant 0 : i32
    return %c0_i32, %c0_i32_0, %c0_i32_1 : i32, i32, i32
  }
  func.func @transform_14(%arg0: i32) -> (i32, i32) {
    %c0_i32 = arith.constant 0 : i32
    %c0_i32_0 = arith.constant 0 : i32
    %c0_i32_1 = arith.constant 0 : i32
    return %c0_i32, %c0_i32_0 : i32, i32
  }
  func.func @transform_15(%arg0: i32) -> (i32, i32) {
    %c0_i32 = arith.constant 0 : i32
    %c0_i32_0 = arith.constant 0 : i32
    %c0_i32_1 = arith.constant 0 : i32
    return %c0_i32, %c0_i32_0 : i32, i32
  }
  func.func @transform_16(%arg0: i32) -> (i32, i32, i32) {
    %c0_i32 = arith.constant 0 : i32
    %c0_i32_0 = arith.constant 0 : i32
    %c0_i32_1 = arith.constant 0 : i32
    %c0_i32_2 = arith.constant 0 : i32
    return %c0_i32, %c0_i32_0, %c0_i32_1 : i32, i32, i32
  }
  func.func @transform_17(%arg0: i32) -> (i32, i32) {
    %c0_i32 = arith.constant 0 : i32
    %c0_i32_0 = arith.constant 0 : i32
    %c0_i32_1 = arith.constant 0 : i32
    return %c0_i32, %c0_i32_0 : i32, i32
  }
  func.func @transform_18(%arg0: i32) -> (i32, i32) {
    %c0_i32 = arith.constant 0 : i32
    %c0_i32_0 = arith.constant 0 : i32
    %c0_i32_1 = arith.constant 0 : i32
    return %c0_i32, %c0_i32_0 : i32, i32
  }
  func.func @transform_19(%arg0: i32) -> (i32, i32, i32) {
    %c0_i32 = arith.constant 0 : i32
    %c0_i32_0 = arith.constant 0 : i32
    %c0_i32_1 = arith.constant 0 : i32
    %c0_i32_2 = arith.constant 0 : i32
    return %c0_i32, %c0_i32_0, %c0_i32_1 : i32, i32, i32
  }
  func.func @transform_20(%arg0: i32) -> (i32, i32) {
    %c0_i32 = arith.constant 0 : i32
    %c0_i32_0 = arith.constant 0 : i32
    %c0_i32_1 = arith.constant 0 : i32
    return %c0_i32, %c0_i32_0 : i32, i32
  }
  func.func @transform_21(%arg0: i32) -> (i32, i32) {
    %c0_i32 = arith.constant 0 : i32
    %c0_i32_0 = arith.constant 0 : i32
    %c0_i32_1 = arith.constant 0 : i32
    return %c0_i32, %c0_i32_0 : i32, i32
  }
  func.func @transform_22(%arg0: i32) -> (i32, i32, i32) {
    %c0_i32 = arith.constant 0 : i32
    %c0_i32_0 = arith.constant 0 : i32
    %c0_i32_1 = arith.constant 0 : i32
    %c0_i32_2 = arith.constant 0 : i32
    return %c0_i32, %c0_i32_0, %c0_i32_1 : i32, i32, i32
  }
  func.func @transform_23(%arg0: i32) -> (i32, i32) {
    %c0_i32 = arith.constant 0 : i32
    %c0_i32_0 = arith.constant 0 : i32
    %c0_i32_1 = arith.constant 0 : i32
    return %c0_i32, %c0_i32_0 : i32, i32
  }
  func.func @transform_24(%arg0: i32) -> (i32, i32) {
    %c0_i32 = arith.constant 0 : i32
    %c0_i32_0 = arith.constant 0 : i32
    %c0_i32_1 = arith.constant 0 : i32
    return %c0_i32, %c0_i32_0 : i32, i32
  }
  func.func @transform_25(%arg0: i32) -> (i32, i32, i32) {
    %c0_i32 = arith.constant 0 : i32
    %c0_i32_0 = arith.constant 0 : i32
    %c0_i32_1 = arith.constant 0 : i32
    %c0_i32_2 = arith.constant 0 : i32
    return %c0_i32, %c0_i32_0, %c0_i32_1 : i32, i32, i32
  }
  func.func @transform_26(%arg0: i32) -> (i32, i32) {
    %c0_i32 = arith.constant 0 : i32
    %c0_i32_0 = arith.constant 0 : i32
    %c0_i32_1 = arith.constant 0 : i32
    return %c0_i32, %c0_i32_0 : i32, i32
  }
  func.func @transform_27(%arg0: i32) -> (i32, i32) {
    %c0_i32 = arith.constant 0 : i32
    %c0_i32_0 = arith.constant 0 : i32
    %c0_i32_1 = arith.constant 0 : i32
    return %c0_i32, %c0_i32_0 : i32, i32
  }
  func.func @transform_28(%arg0: i32) -> (i32, i32) {
    %c0_i32 = arith.constant 0 : i32
    %c0_i32_0 = arith.constant 0 : i32
    %c0_i32_1 = arith.constant 0 : i32
    return %c0_i32, %c0_i32_0 : i32, i32
  }
  func.func @transform_29(%arg0: i32) -> (i32, i32) {
    %c0_i32 = arith.constant 0 : i32
    %c0_i32_0 = arith.constant 0 : i32
    %c0_i32_1 = arith.constant 0 : i32
    return %c0_i32, %c0_i32_0 : i32, i32
  }
  func.func @transform_30(%arg0: i32) -> (i32, i32) {
    %c0_i32 = arith.constant 0 : i32
    %c0_i32_0 = arith.constant 0 : i32
    %c0_i32_1 = arith.constant 0 : i32
    return %c0_i32, %c0_i32_0 : i32, i32
  }
  func.func @transform_31(%arg0: i32) -> (i32, i32) {
    %c0_i32 = arith.constant 0 : i32
    %c0_i32_0 = arith.constant 0 : i32
    %c0_i32_1 = arith.constant 0 : i32
    return %c0_i32, %c0_i32_0 : i32, i32
  }
  func.func @transform_32(%arg0: i32) -> (i32, i32) {
    %c0_i32 = arith.constant 0 : i32
    %c0_i32_0 = arith.constant 0 : i32
    return %arg0, %c0_i32 : i32, i32
  }
}

</mosaic_0001>

<bundles_post_ra>
// kernel: forward.1
= control target key start
LH: loop header
LB: loop body
LE: loop exit
PB: predicated region body
PF: predicated region fallthrough
CT: control target
= control target key end

     0   :  { %s10688_s6 = smov 1   ;;  %s10689_s10 = smov 2   ;;  %s12022_s0 = inlined_call_operand.smem [shape: u32[33], index: -1, kind: input, shape index: {}] }
   0x1   :  { %s10731_s5 = sld [smem:[%s12022_s0]]   ;;  %s10690_s14 = smov 3  }
   0x2   :  { %s10736_s9 = sld [smem:[%s12022_s0 + %s10688_s6]]   ;;  %s10691_s18 = smov 4  }
   0x3   :  { %s10741_s13 = sld [smem:[%s12022_s0 + %s10689_s10]]   ;;  %s10692_s22 = smov 5  }
   0x4   :  { %s10746_s17 = sld [smem:[%s12022_s0 + %s10690_s14]]   ;;  %s10693_s26 = smov 6  }
   0x5   :  { %s10751_s21 = sld [smem:[%s12022_s0 + %s10691_s18]]   ;;  %s10694_s30 = smov 7  }
   0x6   :  { %s10756_s25 = sld [smem:[%s12022_s0 + %s10692_s22]]   ;;  %s10695_s4 = smov 8  }
   0x7   :  { %12046 = sst [smem:[#allocation5_spill]] %s10731_s5  ;;  %s10696_s10 = smov 9  }
   0x8   :  { %12047 = sst [smem:[#allocation6_spill]] %s10736_s9  ;;  %s10697_s15 = smov 10  }
   0x9   :  { %12048 = sst [smem:[#allocation7_spill]] %s10741_s13  ;;  %s10698_s20 = smov 11  }
   0xa   :  { %s10761_s29 = sld [smem:[%s12022_s0 + %s10693_s26]]   ;;  %s10699_s26 = smov 12  }
   0xb   :  { %s10766_s3 = sld [smem:[%s12022_s0 + %s10694_s30]]   ;;  %s10700_s1 = smov 13  }
   0xc   :  { %s10771_s8 = sld [smem:[%s12022_s0 + %s10695_s4]]   ;;  %s10701_s7 = smov 14  }
   0xd   :  { %s10776_s14 = sld [smem:[%s12022_s0 + %s10696_s10]]   ;;  %s10703_s22 = smov 16  }
   0xe   :  { %s10781_s19 = sld [smem:[%s12022_s0 + %s10697_s15]]   ;;  %s10702_s15 = smov 15  }
   0xf   :  { %s10786_s24 = sld [smem:[%s12022_s0 + %s10698_s20]]   ;;  %s10704_s28 = smov 17  }
  0x10   :  { %s10791_s30 = sld [smem:[%s12022_s0 + %s10699_s26]]  }
  0x11   :  { %12049 = sst [smem:[#allocation8_spill]] %s10766_s3 }
  0x12   :  { %12050 = sst [smem:[#allocation9_spill]] %s10771_s8 }
  0x13   :  { %s10796_s6 = sld [smem:[%s12022_s0 + %s10700_s1]]  }
  0x14   :  { %s10801_s12 = sld [smem:[%s12022_s0 + %s10701_s7]]   ;;  %s10705_s7 = smov 18  }
  0x15   :  { %s10806_s20 = sld [smem:[%s12022_s0 + %s10702_s15]]   ;;  %s10706_s15 = smov 19  }
  0x16   :  { %s10811_s27 = sld [smem:[%s12022_s0 + %s10703_s22]]   ;;  %s10707_s22 = smov 20  }
  0x17   :  { %s10816_s4 = sld [smem:[%s12022_s0 + %s10704_s28]]   ;;  %s10708_s28 = smov 21  }
  0x19   :  { %12051 = sst [smem:[#allocation10_spill]] %s10796_s6 }
  0x1a   :  { %12052 = sst [smem:[#allocation11_spill]] %s10801_s12 }
  0x1b   :  { %12053 = sst [smem:[#allocation12_spill]] %s10806_s20 }
  0x1c   :  { %12054 = sst [smem:[#allocation13_spill]] %s10811_s27 }
  0x1d   :  { %12055 = sst [smem:[#allocation14_spill]] %s10816_s4 }
  0x1e   :  { %s10821_s12 = sld [smem:[%s12022_s0 + %s10705_s7]]   ;;  %s10709_s7 = smov 22  }
  0x1f   :  { %s10826_s20 = sld [smem:[%s12022_s0 + %s10706_s15]]   ;;  %s10710_s15 = smov 23  }
  0x20   :  { %s10831_s27 = sld [smem:[%s12022_s0 + %s10707_s22]]   ;;  %s10711_s22 = smov 24  }
  0x21   :  { %s10836_s4 = sld [smem:[%s12022_s0 + %s10708_s28]]   ;;  %s10712_s28 = smov 25  }
  0x24   :  { %12056 = sst [smem:[#allocation15_spill]] %s10821_s12 }
  0x25   :  { %12057 = sst [smem:[#allocation16_spill]] %s10826_s20 }
  0x26   :  { %12058 = sst [smem:[#allocation17_spill]] %s10831_s27 }
  0x27   :  { %12059 = sst [smem:[#allocation18_spill]] %s10836_s4 }
  0x28   :  { %s10841_s12 = sld [smem:[%s12022_s0 + %s10709_s7]]   ;;  %s10713_s7 = smov 26  }
  0x29   :  { %s10846_s20 = sld [smem:[%s12022_s0 + %s10710_s15]]   ;;  %s10714_s15 = smov 27  }
  0x2a   :  { %s10851_s27 = sld [smem:[%s12022_s0 + %s10711_s22]]   ;;  %s10715_s22 = smov 28  }
  0x2b   :  { %s10856_s4 = sld [smem:[%s12022_s0 + %s10712_s28]]   ;;  %s10716_s28 = smov 29  }
  0x2e   :  { %12060 = sst [smem:[#allocation19_spill]] %s10841_s12 }
  0x2f   :  { %12061 = sst [smem:[#allocation20_spill]] %s10846_s20 }
  0x30   :  { %12062 = sst [smem:[#allocation21_spill]] %s10851_s27 }
  0x31   :  { %12063 = sst [smem:[#allocation22_spill]] %s10856_s4 }
  0x32   :  { %s10861_s12 = sld [smem:[%s12022_s0 + %s10713_s7]]   ;;  %s10717_s7 = smov 30  }
  0x33   :  { %s10866_s20 = sld [smem:[%s12022_s0 + %s10714_s15]]   ;;  %s10718_s15 = smov 31  }
  0x34   :  { %s10871_s27 = sld [smem:[%s12022_s0 + %s10715_s22]]   ;;  %s10719_s22 = smov 32  }
  0x35   :  { %s10876_s4 = sld [smem:[%s12022_s0 + %s10716_s28]]  }
  0x38   :  { %12064 = sst [smem:[#allocation23_spill]] %s10861_s12 }
  0x39   :  { %12065 = sst [smem:[#allocation24_spill]] %s10866_s20 }
  0x3a   :  { %12066 = sst [smem:[#allocation25_spill]] %s10871_s27 }
  0x3b   :  { %12067 = sst [smem:[#allocation26_spill]] %s10876_s4 }
  0x3c   :  { %s10881_s12 = sld [smem:[%s12022_s0 + %s10717_s7]]  }
  0x3d   :  { %s10886_s20 = sld [smem:[%s12022_s0 + %s10718_s15]]  }
  0x3e   :  { %s10891_s27 = sld [smem:[%s12022_s0 + %s10719_s22]]  }
  0x42   :  { %12068 = sst [smem:[#allocation27_spill]] %s10881_s12 }
  0x43   :  { %70 = vsyncpa [#allocation3], 0 }
  0x44   :  { %72 = vsyncpa [#allocation3 + $0x1], 0  ;;  %s10893_s28 = smov 0   ;;  %s10895_s1 = smov 0  }
  0x45   :  { %s10897_s2 = smov 0   ;;  %s10899_s7 = smov 0  }
  0x46 LB: > { %s12069_s13 = sld [smem:[#allocation7_spill]]  ;;  %s12070_s12 = sld [smem:[#allocation27_spill]]  ;;  %s10678_s1 = sphi %s10895_s1, %s12095_s1   ;;  %s10674_s28 = sphi %s10893_s28, %s12094_s28   ;;  %s10686_s7 = sphi %s10899_s7, %s12097_s7   ;;  %s10682_s2 = sphi %s10897_s2, %s12096_s2  }
  0x47   : > { %s12071_s9 = sld [smem:[#allocation6_spill]]  ;;  %s12072_s8 = sld [smem:[#allocation9_spill]] }
  0x48   : > { %s12073_s6 = sld [smem:[#allocation10_spill]]  ;;  %s12074_s3 = sld [smem:[#allocation8_spill]] }
  0x49   : > { %s10914_s0 = sadd.s32 4294967295, %s10686_s7   ;;  %s7886_s10 = sadd.s32 4294967294, %s10686_s7  }
  0x4a   : > { %s10918_s11 = sadd.s32 1, %s10686_s7   ;;  %s762_s15 = sadd.s32 1, %s10682_s2 }
  0x4b   : > { %s759_s16 = ssub.s32 %s10686_s7, %s10918_s11  ;;  %p772_p0 = scmp.ne.s32.totalorder %s10682_s2, %s10678_s1 }
  0x4c   : > { %p760_p1 = scmp.eq.s32.totalorder %s759_s16, 0  ;;  %p773_p2 = scmp.eq.s32.totalorder %s10914_s0, 1 }
  0x4d   : > { %p778_p3 = scmp.ne.s32.totalorder %s10678_s1, %s10674_s28  ;;  %p779_p4 = scmp.eq.s32.totalorder %s7886_s10, 1 }
  0x4e   : > { %s10929_s18 = scalar_select %p760_p1, %s10682_s2, %s762_s15  }
  0x4f   : > { %p10931_p5 = por %p773_p2, %p772_p0  ;;  %p10935_p6 = por %p779_p4, %p778_p3 }
  0x50   : > { %p7889_p7 = scmp.ge.s32.totalorder %s10686_s7, 1  ;;  %p899_p8 = scmp.lt.s32.totalorder %s10686_s7, 3 }
  0x52   : > { %p900_p9 = pnand %p7889_p7, %p899_p8 }
  0x53   : > { %s12077_s5 = sld [smem:[#allocation5_spill]] (!%p900_p9)  ;;  %s7891_s26 = sshll.u32 (!%p900_p9), %s10914_s0, 5  ;;  %v10151_v0 = vld [vmem:[%s12071_s9 + $0x4] ss:$8 sps:$4 sm:$0xff] (!%p900_p9)   ;;  %v10149_v50 = vld [vmem:[%s12071_s9] ss:$8 sps:$4 sm:$0xff] (!%p900_p9)  }
  0x54   : > { %903 = sbr.rel (%p900_p9) target bundleno = 4954 (0x135a), region = 148  ;;  %p982_p10 = scmp.lt.s32.totalorder (!%p900_p9), %s7891_s26, 63  ;;  %v10154_v1 = vld [vmem:[%s12071_s9 + $0x84] ss:$8 sps:$4 sm:$0xff] (!%p900_p9)   ;;  %1164 = vmatprep.mubr.bf16.mxu0 (!%p900_p9), %v10151_v0  ;;  %v10152_v51 = vld [vmem:[%s12071_s9 + $0x80] ss:$8 sps:$4 sm:$0xff] (!%p900_p9)  }
  0x55   : > { %1366 = vmatprep.mubr.bf16.mxu1 (!%p900_p9), %v10154_v1  ;;  %v10155_v52 = vld [vmem:[%s12071_s9 + $0x14] ss:$8 sps:$4 sm:$0xff] (!%p900_p9)   ;;  %v10159_v54 = vld [vmem:[%s12071_s9 + $0x10] ss:$8 sps:$4 sm:$0xff] (!%p900_p9)   ;;  %v10161_v56 = vld [vmem:[%s12071_s9 + $0x24] ss:$8 sps:$4 sm:$0xff] (!%p900_p9)  }
  0x56   : > { %v10157_v53 = vld [vmem:[%s12071_s9 + $0x94] ss:$8 sps:$4 sm:$0xff] (!%p900_p9)   ;;  %v10160_v55 = vld [vmem:[%s12071_s9 + $0x90] ss:$8 sps:$4 sm:$0xff] (!%p900_p9)   ;;  %v10163_v57 = vld [vmem:[%s12071_s9 + $0xa4] ss:$8 sps:$4 sm:$0xff] (!%p900_p9)  }
  0x57   : > { %v10165_v58 = vld [vmem:[%s12071_s9 + $0x20] ss:$8 sps:$4 sm:$0xff] (!%p900_p9)   ;;  %v10167_v60 = vld [vmem:[%s12071_s9 + $0x34] ss:$8 sps:$4 sm:$0xff] (!%p900_p9)   ;;  %v10171_v62 = vld [vmem:[%s12071_s9 + $0x30] ss:$8 sps:$4 sm:$0xff] (!%p900_p9)  }
  0x58   : > { %v10166_v59 = vld [vmem:[%s12071_s9 + $0xa0] ss:$8 sps:$4 sm:$0xff] (!%p900_p9)   ;;  %v10169_v61 = vld [vmem:[%s12071_s9 + $0xb4] ss:$8 sps:$4 sm:$0xff] (!%p900_p9)   ;;  %v10172_v63 = vld [vmem:[%s12071_s9 + $0xb0] ss:$8 sps:$4 sm:$0xff] (!%p900_p9)  }
  0x59   : > { %v10173_v0 = vld [vmem:[%s12071_s9 + $0x44] ss:$8 sps:$4 sm:$0xff] (!%p900_p9)   ;;  %s12078_s16 = sld [smem:[#allocation11_spill]] (!%p900_p9)  ;;  %s12093_s4 = sld [smem:[#allocation26_spill]] (!%p900_p9) }
  0x5a   : > { %v10175_v1 = vld [vmem:[%s12071_s9 + $0xc4] ss:$8 sps:$4 sm:$0xff] (!%p900_p9)  }
  0x5b   : > { %s12099_s26 = smov (!%p982_p10, %s7891_s26), 63 }
  0x5c   : > { %s7892_s10 = sshll.u32 %s12099_s26, 3  ;;  %s12079_s26 = sld [smem:[#allocation13_spill]] }
  0x5d   : > { %s10945_s15 = scalar_lea.vmem %s12077_s5, %s7892_s10  ;;  %s12080_s10 = sld [smem:[#allocation12_spill]] }
  0x5e   : > { %v1004_v2 = vld [vmem:[%s10945_s15 + $0x80] sm:$0xff]  ;;  %v1005_v3 = vld [vmem:[%s10945_s15 + $0x88] sm:$0xff]  ;;  %v1006_v7 = vld [vmem:[%s10945_s15 + $0x90] sm:$0xff]  ;;  %s12086_s5 = sld [smem:[#allocation20_spill]] }
  0x5f   : > { %v988_v4 = vld [vmem:[%s10945_s15] sm:$0xff]  ;;  %v10950_v5 = vpack.c.bf16 %v1005_v3, %v1004_v2  ;;  %v989_v6 = vld [vmem:[%s10945_s15 + $0x8] sm:$0xff]  ;;  %v1007_v8 = vld [vmem:[%s10945_s15 + $0x98] sm:$0xff] }
  0x60   : > { %v10955_v9 = vpack.c.bf16 %v989_v6, %v988_v4  ;;  %v10957_v10 = vpack.c.bf16 %v1007_v8, %v1006_v7  ;;  %v990_v11 = vld [vmem:[%s10945_s15 + $0x10] sm:$0xff]  ;;  %v991_v12 = vld [vmem:[%s10945_s15 + $0x18] sm:$0xff]  ;;  %v1008_v13 = vld [vmem:[%s10945_s15 + $0xa0] sm:$0xff] }
  0x61   : > { %8507 = vmatprep.subr.bf16.mxu0 %v10950_v5  ;;  %8571 = vmatprep.subr.bf16.mxu1 %v10950_v5  ;;  %v1009_v14 = vld [vmem:[%s10945_s15 + $0xa8] sm:$0xff]  ;;  %v10967_v15 = vpack.c.bf16 %v991_v12, %v990_v11  ;;  %v992_v17 = vld [vmem:[%s10945_s15 + $0x20] sm:$0xff]  ;;  %v1010_v19 = vld [vmem:[%s10945_s15 + $0xb0] sm:$0xff] }
  0x62   : > { %8508 = vmatpush3.bf16.msra.mxu0 %v10955_v9  ;;  %8572 = vmatpush3.bf16.msra.mxu1 %v10955_v9  ;;  %v10971_v16 = vpack.c.bf16 %v1009_v14, %v1008_v13  ;;  %v993_v18 = vld [vmem:[%s10945_s15 + $0x28] sm:$0xff]  ;;  %v1011_v20 = vld [vmem:[%s10945_s15 + $0xb8] sm:$0xff]  ;;  %v994_v23 = vld [vmem:[%s10945_s15 + $0x30] sm:$0xff] }
  0x63   : > { %8509 = vmatprep.subr.bf16.mxu0 %v10957_v10  ;;  %8573 = vmatprep.subr.bf16.mxu1 %v10957_v10  ;;  %v10979_v21 = vpack.c.bf16 %v993_v18, %v992_v17  ;;  %v10983_v22 = vpack.c.bf16 %v1011_v20, %v1010_v19  ;;  %v995_v24 = vld [vmem:[%s10945_s15 + $0x38] sm:$0xff]  ;;  %v1012_v25 = vld [vmem:[%s10945_s15 + $0xc0] sm:$0xff]  ;;  %v1013_v26 = vld [vmem:[%s10945_s15 + $0xc8] sm:$0xff] }
  0x64   : > { %v10991_v27 = vpack.c.bf16 %v995_v24, %v994_v23  ;;  %v996_v28 = vld [vmem:[%s10945_s15 + $0x40] sm:$0xff]  ;;  %v10996_v29 = vpack.c.bf16 %v1013_v26, %v1012_v25  ;;  %v997_v30 = vld [vmem:[%s10945_s15 + $0x48] sm:$0xff]  ;;  %v1014_v31 = vld [vmem:[%s10945_s15 + $0xd0] sm:$0xff] }
  0x65   : > { %v1015_v32 = vld [vmem:[%s10945_s15 + $0xd8] sm:$0xff]  ;;  %v11003_v33 = vpack.c.bf16 %v997_v30, %v996_v28  ;;  %v998_v34 = vld [vmem:[%s10945_s15 + $0x50] sm:$0xff]  ;;  %v1016_v37 = vld [vmem:[%s10945_s15 + $0xe0] sm:$0xff] }
  0x66   : > { %8510 = vmatpush3.bf16.msra.mxu0 %v10967_v15  ;;  %8574 = vmatpush3.bf16.msra.mxu1 %v10967_v15  ;;  %v999_v35 = vld [vmem:[%s10945_s15 + $0x58] sm:$0xff]  ;;  %v11009_v36 = vpack.c.bf16 %v1015_v32, %v1014_v31  ;;  %v1017_v38 = vld [vmem:[%s10945_s15 + $0xe8] sm:$0xff]  ;;  %v1000_v40 = vld [vmem:[%s10945_s15 + $0x60] sm:$0xff] }
  0x67   : > { %8511 = vmatprep.subr.bf16.mxu0 %v10971_v16  ;;  %8575 = vmatprep.subr.bf16.mxu1 %v10971_v16  ;;  %v11015_v39 = vpack.c.bf16 %v999_v35, %v998_v34  ;;  %v11020_v41 = vpack.c.bf16 %v1017_v38, %v1016_v37  ;;  %v1001_v42 = vld [vmem:[%s10945_s15 + $0x68] sm:$0xff]  ;;  %v1018_v43 = vld [vmem:[%s10945_s15 + $0xf0] sm:$0xff]  ;;  %v1019_v44 = vld [vmem:[%s10945_s15 + $0xf8] sm:$0xff] }
  0x68   : > { %v11027_v45 = vpack.c.bf16 %v1001_v42, %v1000_v40  ;;  %v1002_v46 = vld [vmem:[%s10945_s15 + $0x70] sm:$0xff]  ;;  %v11032_v47 = vpack.c.bf16 %v1019_v44, %v1018_v43  ;;  %v1003_v48 = vld [vmem:[%s10945_s15 + $0x78] sm:$0xff]  ;;  %v10177_v2 = vld [vmem:[%s12071_s9 + $0x40] ss:$8 sps:$4 sm:$0xff]   ;;  %s12081_s15 = sld [smem:[#allocation14_spill]] }
  0x69   : > { %v11037_v49 = vpack.c.bf16 %v1003_v48, %v1002_v46  ;;  %v10178_v3 = vld [vmem:[%s12071_s9 + $0xc0] ss:$8 sps:$4 sm:$0xff]   ;;  %v10179_v4 = vld [vmem:[%s12071_s9 + $0x54] ss:$8 sps:$4 sm:$0xff]   ;;  %v10183_v7 = vld [vmem:[%s12071_s9 + $0x50] ss:$8 sps:$4 sm:$0xff]  }
  0x6a   : > { %8512 = vmatpush3.bf16.msra.mxu0 %v10979_v21  ;;  %8576 = vmatpush3.bf16.msra.mxu1 %v10979_v21  ;;  %v10181_v6 = vld [vmem:[%s12071_s9 + $0xd4] ss:$8 sps:$4 sm:$0xff]   ;;  %v10184_v8 = vld [vmem:[%s12071_s9 + $0xd0] ss:$8 sps:$4 sm:$0xff]   ;;  %v10185_v11 = vld [vmem:[%s12071_s9 + $0x64] ss:$8 sps:$4 sm:$0xff]  }
  0x6b   : > { %8513 = vmatprep.subr.bf16.mxu0 %v10983_v22  ;;  %8577 = vmatprep.subr.bf16.mxu1 %v10983_v22  ;;  %v10187_v12 = vld [vmem:[%s12071_s9 + $0xe4] ss:$8 sps:$4 sm:$0xff]   ;;  %v10189_v13 = vld [vmem:[%s12071_s9 + $0x60] ss:$8 sps:$4 sm:$0xff]   ;;  %v10191_v14 = vld [vmem:[%s12071_s9 + $0x74] ss:$8 sps:$4 sm:$0xff]  }
  0x6c   : > { %v10193_v17 = vld [vmem:[%s12071_s9 + $0xf4] ss:$8 sps:$4 sm:$0xff]   ;;  %v10195_v18 = vld [vmem:[%s12071_s9 + $0x70] ss:$8 sps:$4 sm:$0xff]   ;;  %v10199_v20 = vld [vmem:[%s12071_s9 + $0x104] ss:$8 sps:$4 sm:$0xff]  }
  0x6d   : > { %v10196_v19 = vld [vmem:[%s12071_s9 + $0xf0] ss:$8 sps:$4 sm:$0xff]   ;;  %v10202_v23 = vld [vmem:[%s12071_s9 + $0x184] ss:$8 sps:$4 sm:$0xff]   ;;  %v10197_v25 = vld [vmem:[%s12071_s9 + $0x100] ss:$8 sps:$4 sm:$0xff]  }
  0x6e   : > { %8514 = vmatpush3.bf16.msra.mxu0 %v10991_v27  ;;  %8578 = vmatpush3.bf16.msra.mxu1 %v10991_v27  ;;  %v10269_v24 = vld [vmem:[%s12069_s13 + $0x40] sm:$0xff]   ;;  %v10203_v28 = vld [vmem:[%s12071_s9 + $0x114] ss:$8 sps:$4 sm:$0xff]   ;;  %v10271_v32 = vld [vmem:[%s12069_s13 + $0x48] sm:$0xff]  }
  0x6f   : > { %8515 = vmatprep.subr.bf16.mxu0 %v10996_v29  ;;  %8579 = vmatprep.subr.bf16.mxu1 %v10996_v29  ;;  %v10200_v26 = vld [vmem:[%s12071_s9 + $0x180] ss:$8 sps:$4 sm:$0xff]   ;;  %v10205_v30 = vld [vmem:[%s12071_s9 + $0x194] ss:$8 sps:$4 sm:$0xff]   ;;  %v10207_v37 = vld [vmem:[%s12071_s9 + $0x110] ss:$8 sps:$4 sm:$0xff]  }
  0x70   : > { %v10270_v31 = vld [vmem:[%s12069_s13] sm:$0xff]   ;;  %v10272_v34 = vld [vmem:[%s12069_s13 + $0x8] sm:$0xff]   ;;  %v10273_v35 = vld [vmem:[%s12069_s13 + $0x50] sm:$0xff]  }
  0x71   : > { %v10208_v38 = vld [vmem:[%s12071_s9 + $0x190] ss:$8 sps:$4 sm:$0xff]   ;;  %v10209_v40 = vld [vmem:[%s12071_s9 + $0x124] ss:$8 sps:$4 sm:$0xff]   ;;  %v10214_v48 = vld [vmem:[%s12071_s9 + $0x1a0] ss:$8 sps:$4 sm:$0xff]  }
  0x72   : > { %8516 = vmatpush3.bf16.msra.mxu0 %v11003_v33  ;;  %8580 = vmatpush3.bf16.msra.mxu1 %v11003_v33  ;;  %v10211_v42 = vld [vmem:[%s12071_s9 + $0x1a4] ss:$8 sps:$4 sm:$0xff]   ;;  %v10274_v43 = vld [vmem:[%s12069_s13 + $0x10] sm:$0xff]   ;;  %v10275_v44 = vld [vmem:[%s12069_s13 + $0x58] sm:$0xff]  }
  0x73   : > { %8517 = vmatprep.subr.bf16.mxu0 %v11009_v36  ;;  %8581 = vmatprep.subr.bf16.mxu1 %v11009_v36  ;;  %v10277_v46 = vld [vmem:[%s12069_s13 + $0x60] sm:$0xff]  }
  0x76   : > { %8518 = vmatpush3.bf16.msra.mxu0 %v11015_v39  ;;  %8582 = vmatpush3.bf16.msra.mxu1 %v11015_v39 }
  0x77   : > { %8519 = vmatprep.subr.bf16.mxu0 %v11020_v41  ;;  %8583 = vmatprep.subr.bf16.mxu1 %v11020_v41 }
  0x7a   : > { %8520 = vmatpush3.bf16.msra.mxu0 %v11027_v45  ;;  %8584 = vmatpush3.bf16.msra.mxu1 %v11027_v45 }
  0x7b   : > { %8521 = vmatprep.subr.bf16.mxu0 %v11032_v47  ;;  %8585 = vmatprep.subr.bf16.mxu1 %v11032_v47 }
  0x7e   : > { %8522 = vmatpush3.bf16.msra.mxu0 %v11037_v49  ;;  %8586 = vmatpush3.bf16.msra.mxu1 %v11037_v49 }
  0x7f   : > { %8635 = vmatprep.subr.bf16.mxu0 %v10950_v5  ;;  %8699 = vmatprep.subr.bf16.mxu1 %v10950_v5 }
  0x81   : > { %1165 = vmatmul.mubr.bf16.vlgmr.msra.gmra.mrb[0].mxu0 %v10149_v50  ;;  %1367 = vmatmul.mubr.bf16.vlgmr.msra.gmra.mrb[0].mxu1 %v10152_v51  ;;  %v10217_v50 = vld [vmem:[%s12071_s9 + $0x1b4] ss:$8 sps:$4 sm:$0xff]   ;;  %v10279_v51 = vld [vmem:[%s12069_s13 + $0x68] sm:$0xff]  }
  0x82   : > { %1172 = vmatprep.mubr.bf16.mxu0 %v10155_v52  ;;  %1374 = vmatprep.mubr.bf16.mxu1 %v10157_v53  ;;  %v10280_v52 = vld [vmem:[%s12069_s13 + $0x28] sm:$0xff]  }
  0x83   : > { %8636 = vmatpush3.bf16.msra.mxu0 %v10955_v9  ;;  %8700 = vmatpush3.bf16.msra.mxu1 %v10955_v9  ;;  %v10221_v53 = vld [vmem:[%s12071_s9 + $0x144] ss:$8 sps:$4 sm:$0xff]  }
  0x84   : > { %8637 = vmatprep.subr.bf16.mxu0 %v10957_v10  ;;  %8701 = vmatprep.subr.bf16.mxu1 %v10957_v10 }
  0x87   : > { %8638 = vmatpush3.bf16.msra.mxu0 %v10967_v15  ;;  %8702 = vmatpush3.bf16.msra.mxu1 %v10967_v15 }
  0x88   : > { %8639 = vmatprep.subr.bf16.mxu0 %v10971_v16  ;;  %8703 = vmatprep.subr.bf16.mxu1 %v10971_v16 }
  0x89   : > { %1173 = vmatmul.mubr.bf16.gmra.mrb[4].mxu0 %v10159_v54  ;;  %1375 = vmatmul.mubr.bf16.gmra.mrb[4].mxu1 %v10160_v55  ;;  %v10282_v54 = vld [vmem:[%s12069_s13 + $0x30] sm:$0xff]   ;;  %v10284_v55 = vld [vmem:[%s12069_s13 + $0x38] sm:$0xff]  }
  0x8a   : > { %1180 = vmatprep.mubr.bf16.mxu0 %v10161_v56  ;;  %1382 = vmatprep.mubr.bf16.mxu1 %v10163_v57  ;;  %v10226_v56 = vld [vmem:[%s12071_s9 + $0x1c0] ss:$8 sps:$4 sm:$0xff]   ;;  %v10229_v57 = vld [vmem:[%s12071_s9 + $0x1d4] ss:$8 sps:$4 sm:$0xff]  }
  0x8b   : > { %8640 = vmatpush3.bf16.msra.mxu0 %v10979_v21  ;;  %8704 = vmatpush3.bf16.msra.mxu1 %v10979_v21 }
  0x8c   : > { %8641 = vmatprep.subr.bf16.mxu0 %v10983_v22  ;;  %8705 = vmatprep.subr.bf16.mxu1 %v10983_v22 }
  0x8f   : > { %8642 = vmatpush3.bf16.msra.mxu0 %v10991_v27  ;;  %8706 = vmatpush3.bf16.msra.mxu1 %v10991_v27 }
  0x90   : > { %8643 = vmatprep.subr.bf16.mxu0 %v10996_v29  ;;  %8707 = vmatprep.subr.bf16.mxu1 %v10996_v29 }
  0x91   : > { %1181 = vmatmul.mubr.bf16.gmra.mrb[8].mxu0 %v10165_v58  ;;  %1383 = vmatmul.mubr.bf16.gmra.mrb[8].mxu1 %v10166_v59  ;;  %v10233_v58 = vld [vmem:[%s12071_s9 + $0x164] ss:$8 sps:$4 sm:$0xff]  }
  0x92   : > { %1188 = vmatprep.mubr.bf16.mxu0 %v10167_v60  ;;  %1390 = vmatprep.mubr.bf16.mxu1 %v10169_v61  ;;  %v10235_v59 = vld [vmem:[%s12071_s9 + $0x1e4] ss:$8 sps:$4 sm:$0xff]   ;;  %v10239_v60 = vld [vmem:[%s12071_s9 + $0x174] ss:$8 sps:$4 sm:$0xff]  }
  0x93   : > { %8644 = vmatpush3.bf16.msra.mxu0 %v11003_v33  ;;  %8708 = vmatpush3.bf16.msra.mxu1 %v11003_v33  ;;  %v10241_v61 = vld [vmem:[%s12071_s9 + $0x1f4] ss:$8 sps:$4 sm:$0xff]  }
  0x94   : > { %8645 = vmatprep.subr.bf16.mxu0 %v11009_v36  ;;  %8709 = vmatprep.subr.bf16.mxu1 %v11009_v36 }
  0x97   : > { %8646 = vmatpush3.bf16.msra.mxu0 %v11015_v39  ;;  %8710 = vmatpush3.bf16.msra.mxu1 %v11015_v39 }
  0x98   : > { %8647 = vmatprep.subr.bf16.mxu0 %v11020_v41  ;;  %8711 = vmatprep.subr.bf16.mxu1 %v11020_v41 }
  0x99   : > { %1189 = vmatmul.mubr.bf16.gmra.mrb[12].mxu0 %v10171_v62  ;;  %1391 = vmatmul.mubr.bf16.gmra.mrb[12].mxu1 %v10172_v63  ;;  %v10243_v62 = vld [vmem:[%s12071_s9 + $0x170] ss:$8 sps:$4 sm:$0xff]  }
  0x9a   : > { %1196 = vmatprep.mubr.bf16.mxu0 %v10173_v0  ;;  %1398 = vmatprep.mubr.bf16.mxu1 %v10175_v1  ;;  %v10244_v63 = vld [vmem:[%s12071_s9 + $0x1f0] ss:$8 sps:$4 sm:$0xff]   ;;  %v10247_v0 = vld [vmem:[%s12071_s9 + $0x204] ss:$8 sps:$4 sm:$0xff]   ;;  %v10245_v1 = vld [vmem:[%s12071_s9 + $0x200] ss:$8 sps:$4 sm:$0xff]  }
  0x9b   : > { %8648 = vmatpush3.bf16.msra.mxu0 %v11027_v45  ;;  %8712 = vmatpush3.bf16.msra.mxu1 %v11027_v45 }
  0x9c   : > { %8649 = vmatprep.subr.bf16.mxu0 %v11032_v47  ;;  %8713 = vmatprep.subr.bf16.mxu1 %v11032_v47 }
  0x9f   : > { %8650 = vmatpush3.bf16.msra.mxu0 %v11037_v49  ;;  %8714 = vmatpush3.bf16.msra.mxu1 %v11037_v49 }
  0xa0   : > { %8763 = vmatprep.subr.bf16.mxu0 %v10950_v5  ;;  %v10190_v5 = vld [vmem:[%s12071_s9 + $0xe0] ss:$8 sps:$4 sm:$0xff]   ;;  %8827 = vmatprep.subr.bf16.mxu1 %v10269_v24 }
  0xa1   : > { %1197 = vmatmul.mubr.bf16.gmra.mrb[16].mxu0 %v10177_v2  ;;  %1399 = vmatmul.mubr.bf16.gmra.mrb[16].mxu1 %v10178_v3  ;;  %v10285_v2 = vld [vmem:[%s12069_s13 + $0xc0] sm:$0xff]   ;;  %v10248_v3 = vld [vmem:[%s12071_s9 + $0x214] ss:$8 sps:$4 sm:$0xff]   ;;  %v10296_v24 = vld [vmem:[%s12069_s13 + $0xa8] sm:$0xff]  }
  0xa2   : > { %1204 = vmatprep.mubr.bf16.mxu0 %v10179_v4  ;;  %1406 = vmatprep.mubr.bf16.mxu1 %v10181_v6  ;;  %v10286_v4 = vld [vmem:[%s12069_s13 + $0x80] sm:$0xff]   ;;  %v10287_v6 = vld [vmem:[%s12069_s13 + $0xc8] sm:$0xff]  }
  0xa9   : > { %1205 = vmatmul.mubr.bf16.gmra.mrb[20].mxu0 %v10183_v7  ;;  %1407 = vmatmul.mubr.bf16.gmra.mrb[20].mxu1 %v10184_v8  ;;  %v10288_v7 = vld [vmem:[%s12069_s13 + $0x88] sm:$0xff]   ;;  %v10250_v8 = vld [vmem:[%s12071_s9 + $0x210] ss:$8 sps:$4 sm:$0xff]  }
  0xaa   : > { %1212 = vmatprep.mubr.bf16.mxu0 %v10185_v11  ;;  %1414 = vmatprep.mubr.bf16.mxu1 %v10187_v12  ;;  %v10289_v11 = vld [vmem:[%s12069_s13 + $0xd0] sm:$0xff]   ;;  %v10251_v12 = vld [vmem:[%s12071_s9 + $0x224] ss:$8 sps:$4 sm:$0xff]  }
  0xb1   : > { %1213 = vmatmul.mubr.bf16.gmra.mrb[24].mxu0 %v10189_v13  ;;  %1415 = vmatmul.mubr.bf16.gmra.mrb[24].mxu1 %v10190_v5  ;;  %v10290_v13 = vld [vmem:[%s12069_s13 + $0x90] sm:$0xff]   ;;  %v10291_v5 = vld [vmem:[%s12069_s13 + $0xd8] sm:$0xff]  }
  0xb2   : > { %1220 = vmatprep.mubr.bf16.mxu0 %v10191_v14  ;;  %1422 = vmatprep.mubr.bf16.mxu1 %v10193_v17  ;;  %v10292_v14 = vld [vmem:[%s12069_s13 + $0x98] sm:$0xff]   ;;  %v10253_v17 = vld [vmem:[%s12071_s9 + $0x220] ss:$8 sps:$4 sm:$0xff]  }
  0xb9   : > { %1221 = vmatmul.mubr.bf16.gmra.mrb[28].mxu0 %v10195_v18  ;;  %1423 = vmatmul.mubr.bf16.gmra.mrb[28].mxu1 %v10196_v19  ;;  %v10293_v18 = vld [vmem:[%s12069_s13 + $0xe0] sm:$0xff]   ;;  %v10254_v19 = vld [vmem:[%s12071_s9 + $0x234] ss:$8 sps:$4 sm:$0xff]  }
  0xba   : > { %1568 = vmatprep.mubr.bf16.mxu0 %v10199_v20  ;;  %1770 = vmatprep.mubr.bf16.mxu1 %v10202_v23  ;;  %v10294_v20 = vld [vmem:[%s12069_s13 + $0xa0] sm:$0xff]   ;;  %v10295_v23 = vld [vmem:[%s12069_s13 + $0xe8] sm:$0xff]  }
  0xc1   : > { %1569 = vmatmul.mubr.bf16.vlgmr.msra.gmra.mrb[32].mxu0 %v10197_v25  ;;  %1771 = vmatmul.mubr.bf16.vlgmr.msra.gmra.mrb[32].mxu1 %v10200_v26  ;;  %v10256_v25 = vld [vmem:[%s12071_s9 + $0x230] ss:$8 sps:$4 sm:$0xff]  }
  0xc2   : > { %1576 = vmatprep.mubr.bf16.mxu0 %v10203_v28  ;;  %1778 = vmatprep.mubr.bf16.mxu1 %v10205_v30  ;;  %v10297_v26 = vld [vmem:[%s12069_s13 + $0xf0] sm:$0xff]   ;;  %v10257_v28 = vld [vmem:[%s12071_s9 + $0x244] ss:$8 sps:$4 sm:$0xff]  }
  0xc3   : > { %8764 = vmatpush3.bf16.msra.mxu0 %v10955_v9  ;;  %8828 = vmatpush3.bf16.msra.mxu1 %v10270_v31  ;;  %v10276_v9 = vld [vmem:[%s12069_s13 + $0x18] sm:$0xff]   ;;  %v10298_v30 = vld [vmem:[%s12069_s13 + $0xb0] sm:$0xff]  }
  0xc4   : > { %8765 = vmatprep.subr.bf16.mxu0 %v10957_v10  ;;  %8829 = vmatprep.subr.bf16.mxu1 %v10271_v32  ;;  %v10213_v10 = vld [vmem:[%s12071_s9 + $0x120] ss:$8 sps:$4 sm:$0xff]   ;;  %v10299_v31 = vld [vmem:[%s12069_s13 + $0xf8] sm:$0xff]  }
  0xc5   : > { %v10300_v32 = vld [vmem:[%s12069_s13 + $0xb8] sm:$0xff]  }
  0xc7   : > { %8766 = vmatpush3.bf16.msra.mxu0 %v10967_v15  ;;  %8830 = vmatpush3.bf16.msra.mxu1 %v10272_v34  ;;  %v10215_v15 = vld [vmem:[%s12071_s9 + $0x134] ss:$8 sps:$4 sm:$0xff]   ;;  %v10259_v34 = vld [vmem:[%s12071_s9 + $0x240] ss:$8 sps:$4 sm:$0xff]  }
  0xc8   : > { %8767 = vmatprep.subr.bf16.mxu0 %v10971_v16  ;;  %8831 = vmatprep.subr.bf16.mxu1 %v10273_v35  ;;  %v10278_v16 = vld [vmem:[%s12069_s13 + $0x20] sm:$0xff]   ;;  %v10260_v35 = vld [vmem:[%s12071_s9 + $0x254] ss:$8 sps:$4 sm:$0xff]  }
  0xc9   : > { %1577 = vmatmul.mubr.bf16.gmra.mrb[36].mxu0 %v10207_v37  ;;  %1779 = vmatmul.mubr.bf16.gmra.mrb[36].mxu1 %v10208_v38  ;;  %v10262_v37 = vld [vmem:[%s12071_s9 + $0x250] ss:$8 sps:$4 sm:$0xff]   ;;  %v10263_v38 = vld [vmem:[%s12071_s9 + $0x264] ss:$8 sps:$4 sm:$0xff]  }
  0xca   : > { %1584 = vmatprep.mubr.bf16.mxu0 %v10209_v40  ;;  %1786 = vmatprep.mubr.bf16.mxu1 %v10211_v42  ;;  %v10265_v40 = vld [vmem:[%s12071_s9 + $0x260] ss:$8 sps:$4 sm:$0xff]   ;;  %v10266_v42 = vld [vmem:[%s12071_s9 + $0x274] ss:$8 sps:$4 sm:$0xff]  }
  0xcb   : > { %8768 = vmatpush3.bf16.msra.mxu0 %v10979_v21  ;;  %8832 = vmatpush3.bf16.msra.mxu1 %v10274_v43  ;;  %v10219_v21 = vld [vmem:[%s12071_s9 + $0x130] ss:$8 sps:$4 sm:$0xff]  }
  0xcc   : > { %8769 = vmatprep.subr.bf16.mxu0 %v10983_v22  ;;  %8833 = vmatprep.subr.bf16.mxu1 %v10275_v44  ;;  %v10220_v22 = vld [vmem:[%s12071_s9 + $0x1b0] ss:$8 sps:$4 sm:$0xff]   ;;  %v10301_v44 = vld [vmem:[%s12069_s13 + $0x100] sm:$0xff]  }
  0xcd   : > { %v10268_v43 = vld [vmem:[%s12071_s9 + $0x270] ss:$8 sps:$4 sm:$0xff]  }
  0xcf   : > { %8770 = vmatpush3.bf16.msra.mxu0 %v10991_v27  ;;  %8834 = vmatpush3.bf16.msra.mxu1 %v10276_v9  ;;  %v10223_v27 = vld [vmem:[%s12071_s9 + $0x1c4] ss:$8 sps:$4 sm:$0xff]  }
  0xd0   : > { %8771 = vmatprep.subr.bf16.mxu0 %v10996_v29  ;;  %8835 = vmatprep.subr.bf16.mxu1 %v10277_v46  ;;  %v10281_v29 = vld [vmem:[%s12069_s13 + $0x70] sm:$0xff]  }
  0xd1   : > { %1585 = vmatmul.mubr.bf16.gmra.mrb[40].mxu0 %v10213_v10  ;;  %1787 = vmatmul.mubr.bf16.gmra.mrb[40].mxu1 %v10214_v48 }
  0xd2   : > { %1592 = vmatprep.mubr.bf16.mxu0 %v10215_v15  ;;  %1794 = vmatprep.mubr.bf16.mxu1 %v10217_v50 }
  0xd3   : > { %8772 = vmatpush3.bf16.msra.mxu0 %v11003_v33  ;;  %8836 = vmatpush3.bf16.msra.mxu1 %v10278_v16  ;;  %v10283_v33 = vld [vmem:[%s12069_s13 + $0x78] sm:$0xff]  }
  0xd4   : > { %8773 = vmatprep.subr.bf16.mxu0 %v11009_v36  ;;  %8837 = vmatprep.subr.bf16.mxu1 %v10279_v51  ;;  %v10225_v36 = vld [vmem:[%s12071_s9 + $0x140] ss:$8 sps:$4 sm:$0xff]  }
  0xd7   : > { %8774 = vmatpush3.bf16.msra.mxu0 %v11015_v39  ;;  %8838 = vmatpush3.bf16.msra.mxu1 %v10280_v52  ;;  %v10227_v39 = vld [vmem:[%s12071_s9 + $0x154] ss:$8 sps:$4 sm:$0xff]  }
  0xd8   : > { %8775 = vmatprep.subr.bf16.mxu0 %v11020_v41  ;;  %8839 = vmatprep.subr.bf16.mxu1 %v10281_v29  ;;  %v10231_v41 = vld [vmem:[%s12071_s9 + $0x150] ss:$8 sps:$4 sm:$0xff]  }
  0xd9   : > { %1593 = vmatmul.mubr.bf16.gmra.mrb[44].mxu0 %v10219_v21  ;;  %1795 = vmatmul.mubr.bf16.gmra.mrb[44].mxu1 %v10220_v22 }
  0xda   : > { %1600 = vmatprep.mubr.bf16.mxu0 %v10221_v53  ;;  %1802 = vmatprep.mubr.bf16.mxu1 %v10223_v27 }
  0xdb   : > { %8776 = vmatpush3.bf16.msra.mxu0 %v11027_v45  ;;  %8840 = vmatpush3.bf16.msra.mxu1 %v10282_v54  ;;  %v10232_v45 = vld [vmem:[%s12071_s9 + $0x1d0] ss:$8 sps:$4 sm:$0xff]   ;;  %v10302_v54 = vld [vmem:[%s12069_s13 + $0x108] sm:$0xff]  }
  0xdc   : > { %8777 = vmatprep.subr.bf16.mxu0 %v11032_v47  ;;  %8841 = vmatprep.subr.bf16.mxu1 %v10283_v33  ;;  %v10237_v47 = vld [vmem:[%s12071_s9 + $0x160] ss:$8 sps:$4 sm:$0xff]  }
  0xdf   : > { %8778 = vmatpush3.bf16.msra.mxu0 %v11037_v49  ;;  %8842 = vmatpush3.bf16.msra.mxu1 %v10284_v55  ;;  %v10238_v49 = vld [vmem:[%s12071_s9 + $0x1e0] ss:$8 sps:$4 sm:$0xff]  }
  0xe0   : > { %8891 = vmatprep.subr.bf16.mxu0 %v10285_v2  ;;  %9644 = vmatprep.subr.bf16.mxu1 %v10301_v44 }
  0xe1   : > { %1601 = vmatmul.mubr.bf16.gmra.mrb[48].mxu0 %v10225_v36  ;;  %1803 = vmatmul.mubr.bf16.gmra.mrb[48].mxu1 %v10226_v56 }
  0xe2   : > { %1608 = vmatprep.mubr.bf16.mxu0 %v10227_v39  ;;  %1810 = vmatprep.mubr.bf16.mxu1 %v10229_v57 }
  0xe9   : > { %1609 = vmatmul.mubr.bf16.gmra.mrb[52].mxu0 %v10231_v41  ;;  %1811 = vmatmul.mubr.bf16.gmra.mrb[52].mxu1 %v10232_v45 }
  0xea   : > { %1616 = vmatprep.mubr.bf16.mxu0 %v10233_v58  ;;  %1818 = vmatprep.mubr.bf16.mxu1 %v10235_v59  ;;  %v10303_v58 = vld [vmem:[%s12069_s13 + $0x110] sm:$0xff]  }
  0xf1   : > { %1617 = vmatmul.mubr.bf16.gmra.mrb[56].mxu0 %v10237_v47  ;;  %1819 = vmatmul.mubr.bf16.gmra.mrb[56].mxu1 %v10238_v49 }
  0xf2   : > { %1624 = vmatprep.mubr.bf16.mxu0 %v10239_v60  ;;  %1826 = vmatprep.mubr.bf16.mxu1 %v10241_v61  ;;  %v10304_v61 = vld [vmem:[%s12069_s13 + $0x118] sm:$0xff]  }
  0xf9   : > { %1625 = vmatmul.mubr.bf16.gmra.mrb[60].mxu0 %v10243_v62  ;;  %1827 = vmatmul.mubr.bf16.gmra.mrb[60].mxu1 %v10244_v63 }
  0xfa   : > { %1972 = vmatprep.mubr.bf16.mxu0 %v10247_v0 }
 0x101   : > { %1973 = vmatmul.mubr.bf16.vlgmr.msra.gmra.mrb[64].mxu0 %v10245_v1 }
 0x102   : > { %1980 = vmatprep.mubr.bf16.mxu0 %v10248_v3  ;;  %8892 = vmatpush3.bf16.msra.mxu0 %v10286_v4  ;;  %v10305_v4 = vld [vmem:[%s12069_s13 + $0x120] sm:$0xff]  }
 0x103   : > { %8893 = vmatprep.subr.bf16.mxu0 %v10287_v6 }
 0x106   : > { %8894 = vmatpush3.bf16.msra.mxu0 %v10288_v7 }
 0x107   : > { %8895 = vmatprep.subr.bf16.mxu0 %v10289_v11 }
 0x109   : > { %1981 = vmatmul.mubr.bf16.gmra.mrb[68].mxu0 %v10250_v8 }
 0x10a   : > { %1988 = vmatprep.mubr.bf16.mxu0 %v10251_v12  ;;  %8896 = vmatpush3.bf16.msra.mxu0 %v10290_v13 }
 0x10b   : > { %8897 = vmatprep.subr.bf16.mxu0 %v10291_v5 }
 0x10e   : > { %8898 = vmatpush3.bf16.msra.mxu0 %v10292_v14 }
 0x10f   : > { %8899 = vmatprep.subr.bf16.mxu0 %v10293_v18 }
 0x111   : > { %1989 = vmatmul.mubr.bf16.gmra.mrb[72].mxu0 %v10253_v17  ;;  %v10306_v17 = vld [vmem:[%s12069_s13 + $0x128] sm:$0xff]  }
 0x112   : > { %1996 = vmatprep.mubr.bf16.mxu0 %v10254_v19  ;;  %8900 = vmatpush3.bf16.msra.mxu0 %v10294_v20 }
 0x113   : > { %8901 = vmatprep.subr.bf16.mxu0 %v10295_v23 }
 0x116   : > { %8902 = vmatpush3.bf16.msra.mxu0 %v10296_v24 }
 0x117   : > { %8903 = vmatprep.subr.bf16.mxu0 %v10297_v26  ;;  %v10307_v26 = vld [vmem:[%s12069_s13 + $0x130] sm:$0xff]  }
 0x119   : > { %1997 = vmatmul.mubr.bf16.gmra.mrb[76].mxu0 %v10256_v25 }
 0x11a   : > { %2004 = vmatprep.mubr.bf16.mxu0 %v10257_v28  ;;  %8904 = vmatpush3.bf16.msra.mxu0 %v10298_v30 }
 0x11b   : > { %8905 = vmatprep.subr.bf16.mxu0 %v10299_v31 }
 0x11e   : > { %8906 = vmatpush3.bf16.msra.mxu0 %v10300_v32 }
 0x121   : > { %2005 = vmatmul.mubr.bf16.gmra.mrb[80].mxu0 %v10259_v34 }
 0x122   : > { %2012 = vmatprep.mubr.bf16.mxu0 %v10260_v35 }
 0x129   : > { %2013 = vmatmul.mubr.bf16.gmra.mrb[84].mxu0 %v10262_v37 }
 0x12a   : > { %2020 = vmatprep.mubr.bf16.mxu0 %v10263_v38 }
 0x131   : > { %2021 = vmatmul.mubr.bf16.gmra.mrb[88].mxu0 %v10265_v40  ;;  %v10308_v40 = vld [vmem:[%s12069_s13 + $0x138] sm:$0xff]  }
 0x132   : > { %2028 = vmatprep.mubr.bf16.mxu0 %v10266_v42 }
 0x139   : > { %2029 = vmatmul.mubr.bf16.gmra.mrb[92].mxu0 %v10268_v43 }
 0x154   : > { %v8523_v9 = vpop.f32.mrb[0].mxu0  ;;  %v8587_v46 = vpop.f32.mrb[0].mxu1 }
 0x155   : > { %v8524_v10 = vpop.f32.mrb[1].mxu0  ;;  %v8588_v48 = vpop.f32.mrb[1].mxu1 }
 0x156   : > { %v8525_v15 = vadd.f32 %v8524_v10, %v8523_v9  ;;  %v8589_v50 = vadd.f32 %v8588_v48, %v8587_v46  ;;  %v8526_v16 = vpop.f32.mrb[2].mxu0  ;;  %v8590_v51 = vpop.f32.mrb[2].mxu1 }
 0x157   : > { %v8527_v21 = vpop.f32.mrb[3].mxu0  ;;  %v8591_v22 = vpop.f32.mrb[3].mxu1 }
 0x158   : > { %v8528_v52 = vadd.f32 %v8527_v21, %v8526_v16  ;;  %v8592_v53 = vadd.f32 %v8591_v22, %v8590_v51 }
 0x15a   : > { %v1229_v27 = vpack.c.bf16 %v8528_v52, %v8525_v15  ;;  %v1431_v29 = vpack.c.bf16 %v8592_v53, %v8589_v50 }
 0x15c   : > { %v8529_v33 = vpop.f32.mrb[4].mxu0  ;;  %v8593_v55 = vpop.f32.mrb[4].mxu1  ;;  %2404 = vmatprep.mubr.bf16.mxu1 %v1431_v29 }
 0x15d   : > { %v8530_v36 = vpop.f32.mrb[5].mxu0  ;;  %v8594_v56 = vpop.f32.mrb[5].mxu1  ;;  %2405 = vmatmul.mubr.bf16.vlgmr.msra.gmra.mrb[64].mxu1 %v1229_v27 }
 0x15e   : > { %v8531_v39 = vadd.f32 %v8530_v36, %v8529_v33  ;;  %v8595_v57 = vadd.f32 %v8594_v56, %v8593_v55  ;;  %v8532_v41 = vpop.f32.mrb[6].mxu0  ;;  %v8596_v45 = vpop.f32.mrb[6].mxu1  ;;  %9645 = vmatpush3.bf16.msra.mxu1 %v10301_v44 }
 0x15f   : > { %v8533_v59 = vpop.f32.mrb[7].mxu0  ;;  %v8597_v47 = vpop.f32.mrb[7].mxu1  ;;  %9646 = vmatprep.subr.bf16.mxu1 %v10302_v54 }
 0x160   : > { %v8534_v49 = vadd.f32 %v8533_v59, %v8532_v41  ;;  %v8598_v60 = vadd.f32 %v8597_v47, %v8596_v45 }
 0x162   : > { %v1432_v62 = vpack.c.bf16 %v8598_v60, %v8595_v57  ;;  %v1230_v63 = vpack.c.bf16 %v8534_v49, %v8531_v39  ;;  %9647 = vmatpush3.bf16.msra.mxu1 %v10302_v54 }
 0x163   : > { %9648 = vmatprep.subr.bf16.mxu1 %v10303_v58 }
 0x164   : > { %v8535_v0 = vpop.f32.mrb[8].mxu0  ;;  %v8599_v1 = vpop.f32.mrb[8].mxu1  ;;  %2412 = vmatprep.mubr.bf16.mxu1 %v1432_v62 }
 0x165   : > { %v8536_v2 = vpop.f32.mrb[9].mxu0  ;;  %v8600_v3 = vpop.f32.mrb[9].mxu1  ;;  %2413 = vmatmul.mubr.bf16.gmra.mrb[68].mxu1 %v1230_v63 }
 0x166   : > { %v8537_v6 = vadd.f32 %v8536_v2, %v8535_v0  ;;  %v8601_v7 = vadd.f32 %v8600_v3, %v8599_v1  ;;  %v8538_v8 = vpop.f32.mrb[10].mxu0  ;;  %v8602_v11 = vpop.f32.mrb[10].mxu1  ;;  %9649 = vmatpush3.bf16.msra.mxu1 %v10303_v58 }
 0x167   : > { %v8539_v12 = vpop.f32.mrb[11].mxu0  ;;  %v8603_v13 = vpop.f32.mrb[11].mxu1  ;;  %9650 = vmatprep.subr.bf16.mxu1 %v10304_v61 }
 0x168   : > { %v8540_v5 = vadd.f32 %v8539_v12, %v8538_v8  ;;  %v8604_v14 = vadd.f32 %v8603_v13, %v8602_v11 }
 0x16a   : > { %v1433_v18 = vpack.c.bf16 %v8604_v14, %v8601_v7  ;;  %v1231_v19 = vpack.c.bf16 %v8540_v5, %v8537_v6  ;;  %9651 = vmatpush3.bf16.msra.mxu1 %v10304_v61 }
 0x16b   : > { %9652 = vmatprep.subr.bf16.mxu1 %v10305_v4 }
 0x16c   : > { %v8541_v20 = vpop.f32.mrb[12].mxu0  ;;  %v8605_v23 = vpop.f32.mrb[12].mxu1  ;;  %2420 = vmatprep.mubr.bf16.mxu1 %v1433_v18 }
 0x16d   : > { %v8542_v24 = vpop.f32.mrb[13].mxu0  ;;  %v8606_v25 = vpop.f32.mrb[13].mxu1  ;;  %2421 = vmatmul.mubr.bf16.gmra.mrb[72].mxu1 %v1231_v19 }
 0x16e   : > { %v8543_v28 = vadd.f32 %v8542_v24, %v8541_v20  ;;  %v8607_v30 = vadd.f32 %v8606_v25, %v8605_v23  ;;  %v8544_v31 = vpop.f32.mrb[14].mxu0  ;;  %v8608_v32 = vpop.f32.mrb[14].mxu1  ;;  %9653 = vmatpush3.bf16.msra.mxu1 %v10305_v4 }
 0x16f   : > { %v8545_v34 = vpop.f32.mrb[15].mxu0  ;;  %v8609_v35 = vpop.f32.mrb[15].mxu1  ;;  %9654 = vmatprep.subr.bf16.mxu1 %v10306_v17 }
 0x170   : > { %v8546_v37 = vadd.f32 %v8545_v34, %v8544_v31  ;;  %v8610_v38 = vadd.f32 %v8609_v35, %v8608_v32 }
 0x172   : > { %v1434_v42 = vpack.c.bf16 %v8610_v38, %v8607_v30  ;;  %v1232_v43 = vpack.c.bf16 %v8546_v37, %v8543_v28  ;;  %9655 = vmatpush3.bf16.msra.mxu1 %v10306_v17 }
 0x173   : > { %9656 = vmatprep.subr.bf16.mxu1 %v10307_v26 }
 0x174   : > { %v8547_v44 = vpop.f32.mrb[16].mxu0  ;;  %v8611_v9 = vpop.f32.mrb[16].mxu1  ;;  %2428 = vmatprep.mubr.bf16.mxu1 %v1434_v42 }
 0x175   : > { %v8548_v46 = vpop.f32.mrb[17].mxu0  ;;  %v8612_v10 = vpop.f32.mrb[17].mxu1  ;;  %2429 = vmatmul.mubr.bf16.gmra.mrb[76].mxu1 %v1232_v43 }
 0x176   : > { %v8549_v48 = vadd.f32 %v8548_v46, %v8547_v44  ;;  %v8613_v15 = vadd.f32 %v8612_v10, %v8611_v9  ;;  %v8550_v50 = vpop.f32.mrb[18].mxu0  ;;  %v8614_v16 = vpop.f32.mrb[18].mxu1  ;;  %9657 = vmatpush3.bf16.msra.mxu1 %v10307_v26 }
 0x177   : > { %v8551_v51 = vpop.f32.mrb[19].mxu0  ;;  %v8615_v21 = vpop.f32.mrb[19].mxu1  ;;  %9658 = vmatprep.subr.bf16.mxu1 %v10308_v40 }
 0x178   : > { %v8552_v22 = vadd.f32 %v8551_v51, %v8550_v50  ;;  %v8616_v52 = vadd.f32 %v8615_v21, %v8614_v16 }
 0x17a   : > { %v1435_v53 = vpack.c.bf16 %v8616_v52, %v8613_v15  ;;  %v1233_v27 = vpack.c.bf16 %v8552_v22, %v8549_v48  ;;  %9659 = vmatpush3.bf16.msra.mxu1 %v10308_v40 }
 0x17c   : > { %v8553_v29 = vpop.f32.mrb[20].mxu0  ;;  %v8617_v54 = vpop.f32.mrb[20].mxu1  ;;  %2436 = vmatprep.mubr.bf16.mxu1 %v1435_v53 }
 0x17d   : > { %v8554_v33 = vpop.f32.mrb[21].mxu0  ;;  %v8618_v55 = vpop.f32.mrb[21].mxu1  ;;  %2437 = vmatmul.mubr.bf16.gmra.mrb[80].mxu1 %v1233_v27 }
 0x17e   : > { %v8555_v36 = vadd.f32 %v8554_v33, %v8553_v29  ;;  %v8619_v56 = vadd.f32 %v8618_v55, %v8617_v54  ;;  %v8556_v39 = vpop.f32.mrb[22].mxu0  ;;  %v8620_v57 = vpop.f32.mrb[22].mxu1 }
 0x17f   : > { %v8557_v41 = vpop.f32.mrb[23].mxu0  ;;  %v8621_v45 = vpop.f32.mrb[23].mxu1 }
 0x180   : > { %v8558_v58 = vadd.f32 %v8557_v41, %v8556_v39  ;;  %v8622_v59 = vadd.f32 %v8621_v45, %v8620_v57 }
 0x182   : > { %v1436_v47 = vpack.c.bf16 %v8622_v59, %v8619_v56  ;;  %v1234_v49 = vpack.c.bf16 %v8558_v58, %v8555_v36 }
 0x184   : > { %v8559_v60 = vpop.f32.mrb[24].mxu0  ;;  %v8623_v61 = vpop.f32.mrb[24].mxu1  ;;  %2444 = vmatprep.mubr.bf16.mxu1 %v1436_v47 }
 0x185   : > { %v8560_v62 = vpop.f32.mrb[25].mxu0  ;;  %v8624_v63 = vpop.f32.mrb[25].mxu1  ;;  %2445 = vmatmul.mubr.bf16.gmra.mrb[84].mxu1 %v1234_v49 }
 0x186   : > { %v8561_v0 = vadd.f32 %v8560_v62, %v8559_v60  ;;  %v8625_v1 = vadd.f32 %v8624_v63, %v8623_v61  ;;  %v8562_v2 = vpop.f32.mrb[26].mxu0  ;;  %v8626_v3 = vpop.f32.mrb[26].mxu1 }
 0x187   : > { %v8563_v4 = vpop.f32.mrb[27].mxu0  ;;  %v8627_v6 = vpop.f32.mrb[27].mxu1 }
 0x188   : > { %v8564_v7 = vadd.f32 %v8563_v4, %v8562_v2  ;;  %v8628_v8 = vadd.f32 %v8627_v6, %v8626_v3 }
 0x18a   : > { %v1437_v11 = vpack.c.bf16 %v8628_v8, %v8625_v1  ;;  %v1235_v12 = vpack.c.bf16 %v8564_v7, %v8561_v0 }
 0x18c   : > { %v8565_v13 = vpop.f32.mrb[28].mxu0  ;;  %v8629_v5 = vpop.f32.mrb[28].mxu1  ;;  %2452 = vmatprep.mubr.bf16.mxu1 %v1437_v11 }
 0x18d   : > { %v8566_v14 = vpop.f32.mrb[29].mxu0  ;;  %v8630_v17 = vpop.f32.mrb[29].mxu1  ;;  %2453 = vmatmul.mubr.bf16.gmra.mrb[88].mxu1 %v1235_v12 }
 0x18e   : > { %v8567_v18 = vadd.f32 %v8566_v14, %v8565_v13  ;;  %v8631_v19 = vadd.f32 %v8630_v17, %v8629_v5  ;;  %v8568_v20 = vpop.f32.mrb[30].mxu0  ;;  %v8632_v23 = vpop.f32.mrb[30].mxu1 }
 0x18f   : > { %v8569_v24 = vpop.f32.mrb[31].mxu0  ;;  %v8633_v25 = vpop.f32.mrb[31].mxu1 }
 0x190   : > { %v8570_v26 = vadd.f32 %v8569_v24, %v8568_v20  ;;  %v8634_v28 = vadd.f32 %v8633_v25, %v8632_v23 }
 0x192   : > { %v1236_v30 = vpack.c.bf16 %v8570_v26, %v8567_v18  ;;  %v1438_v31 = vpack.c.bf16 %v8634_v28, %v8631_v19 }
 0x194   : > { %v8651_v32 = vpop.f32.mrb[32].mxu0  ;;  %v8715_v34 = vpop.f32.mrb[32].mxu1  ;;  %2460 = vmatprep.mubr.bf16.mxu1 %v1438_v31 }
 0x195   : > { %v8652_v35 = vpop.f32.mrb[33].mxu0  ;;  %v8716_v37 = vpop.f32.mrb[33].mxu1  ;;  %2461 = vmatmul.mubr.bf16.gmra.mrb[92].mxu1 %v1236_v30 }
 0x196   : > { %v8653_v38 = vadd.f32 %v8652_v35, %v8651_v32  ;;  %v8717_v40 = vadd.f32 %v8716_v37, %v8715_v34  ;;  %v8654_v42 = vpop.f32.mrb[34].mxu0  ;;  %v8718_v43 = vpop.f32.mrb[34].mxu1 }
 0x197   : > { %v8655_v44 = vpop.f32.mrb[35].mxu0  ;;  %v8719_v9 = vpop.f32.mrb[35].mxu1 }
 0x198   : > { %v8656_v46 = vadd.f32 %v8655_v44, %v8654_v42  ;;  %v8720_v10 = vadd.f32 %v8719_v9, %v8718_v43 }
 0x19a   : > { %v11209_v48 = vpack.c.bf16 %v8656_v46, %v8653_v38  ;;  %v1835_v15 = vpack.c.bf16 %v8720_v10, %v8717_v40 }
 0x19c   : > { %v8657_v50 = vpop.f32.mrb[36].mxu0  ;;  %v8721_v16 = vpop.f32.mrb[36].mxu1  ;;  %2501 = vmatprep.mubr.bf16.mxu0 %v1835_v15 }
 0x19d   : > { %v8658_v51 = vpop.f32.mrb[37].mxu0  ;;  %v8722_v21 = vpop.f32.mrb[37].mxu1  ;;  %2502 = vmatmul.mubr.bf16.vlgmr.msra.gmra.mrb[96].mxu0 %v11209_v48 }
 0x19e   : > { %v8659_v22 = vadd.f32 %v8658_v51, %v8657_v50  ;;  %v8723_v52 = vadd.f32 %v8722_v21, %v8721_v16  ;;  %v8660_v53 = vpop.f32.mrb[38].mxu0  ;;  %v8724_v27 = vpop.f32.mrb[38].mxu1 }
 0x19f   : > { %v8661_v29 = vpop.f32.mrb[39].mxu0  ;;  %v8725_v54 = vpop.f32.mrb[39].mxu1 }
 0x1a0   : > { %v8662_v33 = vadd.f32 %v8661_v29, %v8660_v53  ;;  %v8726_v55 = vadd.f32 %v8725_v54, %v8724_v27 }
 0x1a2   : > { %v11212_v36 = vpack.c.bf16 %v8662_v33, %v8659_v22  ;;  %v1836_v56 = vpack.c.bf16 %v8726_v55, %v8723_v52 }
 0x1a4   : > { %v8663_v39 = vpop.f32.mrb[40].mxu0  ;;  %v8727_v57 = vpop.f32.mrb[40].mxu1  ;;  %2509 = vmatprep.mubr.bf16.mxu0 %v1836_v56 }
 0x1a5   : > { %v8664_v41 = vpop.f32.mrb[41].mxu0  ;;  %v8728_v45 = vpop.f32.mrb[41].mxu1  ;;  %2510 = vmatmul.mubr.bf16.gmra.mrb[100].mxu0 %v11212_v36 }
 0x1a6   : > { %v8665_v58 = vadd.f32 %v8664_v41, %v8663_v39  ;;  %v8729_v59 = vadd.f32 %v8728_v45, %v8727_v57  ;;  %v8666_v47 = vpop.f32.mrb[42].mxu0  ;;  %v8730_v49 = vpop.f32.mrb[42].mxu1 }
 0x1a7   : > { %v8667_v60 = vpop.f32.mrb[43].mxu0  ;;  %v8731_v61 = vpop.f32.mrb[43].mxu1 }
 0x1a8   : > { %v8668_v62 = vadd.f32 %v8667_v60, %v8666_v47  ;;  %v8732_v63 = vadd.f32 %v8731_v61, %v8730_v49 }
 0x1aa   : > { %v11215_v0 = vpack.c.bf16 %v8668_v62, %v8665_v58  ;;  %v1837_v1 = vpack.c.bf16 %v8732_v63, %v8729_v59 }
 0x1ac   : > { %v8669_v2 = vpop.f32.mrb[44].mxu0  ;;  %v8733_v3 = vpop.f32.mrb[44].mxu1  ;;  %2517 = vmatprep.mubr.bf16.mxu0 %v1837_v1 }
 0x1ad   : > { %v8670_v4 = vpop.f32.mrb[45].mxu0  ;;  %v8734_v6 = vpop.f32.mrb[45].mxu1  ;;  %2518 = vmatmul.mubr.bf16.gmra.mrb[104].mxu0 %v11215_v0 }
 0x1ae   : > { %v8671_v7 = vadd.f32 %v8670_v4, %v8669_v2  ;;  %v8735_v8 = vadd.f32 %v8734_v6, %v8733_v3  ;;  %v8672_v11 = vpop.f32.mrb[46].mxu0  ;;  %v8736_v12 = vpop.f32.mrb[46].mxu1 }
 0x1af   : > { %v8673_v13 = vpop.f32.mrb[47].mxu0  ;;  %v8737_v5 = vpop.f32.mrb[47].mxu1 }
 0x1b0   : > { %v8674_v14 = vadd.f32 %v8673_v13, %v8672_v11  ;;  %v8738_v17 = vadd.f32 %v8737_v5, %v8736_v12 }
 0x1b2   : > { %v11218_v18 = vpack.c.bf16 %v8674_v14, %v8671_v7  ;;  %v1838_v19 = vpack.c.bf16 %v8738_v17, %v8735_v8 }
 0x1b4   : > { %v8675_v20 = vpop.f32.mrb[48].mxu0  ;;  %v8739_v23 = vpop.f32.mrb[48].mxu1  ;;  %2525 = vmatprep.mubr.bf16.mxu0 %v1838_v19 }
 0x1b5   : > { %v8676_v24 = vpop.f32.mrb[49].mxu0  ;;  %v8740_v25 = vpop.f32.mrb[49].mxu1  ;;  %2526 = vmatmul.mubr.bf16.gmra.mrb[108].mxu0 %v11218_v18 }
 0x1b6   : > { %v8677_v26 = vadd.f32 %v8676_v24, %v8675_v20  ;;  %v8741_v28 = vadd.f32 %v8740_v25, %v8739_v23  ;;  %v8678_v30 = vpop.f32.mrb[50].mxu0  ;;  %v8742_v31 = vpop.f32.mrb[50].mxu1 }
 0x1b7   : > { %v8679_v32 = vpop.f32.mrb[51].mxu0  ;;  %v8743_v34 = vpop.f32.mrb[51].mxu1 }
 0x1b8   : > { %v8680_v35 = vadd.f32 %v8679_v32, %v8678_v30  ;;  %v8744_v37 = vadd.f32 %v8743_v34, %v8742_v31 }
 0x1ba   : > { %v11221_v38 = vpack.c.bf16 %v8680_v35, %v8677_v26  ;;  %v1839_v40 = vpack.c.bf16 %v8744_v37, %v8741_v28 }
 0x1bc   : > { %v8681_v42 = vpop.f32.mrb[52].mxu0  ;;  %v8745_v43 = vpop.f32.mrb[52].mxu1  ;;  %2533 = vmatprep.mubr.bf16.mxu0 %v1839_v40 }
 0x1bd   : > { %v8682_v44 = vpop.f32.mrb[53].mxu0  ;;  %v8746_v9 = vpop.f32.mrb[53].mxu1  ;;  %2534 = vmatmul.mubr.bf16.gmra.mrb[112].mxu0 %v11221_v38 }
 0x1be   : > { %v8683_v46 = vadd.f32 %v8682_v44, %v8681_v42  ;;  %v8747_v10 = vadd.f32 %v8746_v9, %v8745_v43  ;;  %v8684_v15 = vpop.f32.mrb[54].mxu0  ;;  %v8748_v50 = vpop.f32.mrb[54].mxu1 }
 0x1bf   : > { %v8685_v16 = vpop.f32.mrb[55].mxu0  ;;  %v8749_v51 = vpop.f32.mrb[55].mxu1 }
 0x1c0   : > { %v8686_v21 = vadd.f32 %v8685_v16, %v8684_v15  ;;  %v8750_v22 = vadd.f32 %v8749_v51, %v8748_v50 }
 0x1c2   : > { %v11224_v52 = vpack.c.bf16 %v8686_v21, %v8683_v46  ;;  %v1840_v53 = vpack.c.bf16 %v8750_v22, %v8747_v10 }
 0x1c4   : > { %v8687_v27 = vpop.f32.mrb[56].mxu0  ;;  %v8751_v29 = vpop.f32.mrb[56].mxu1  ;;  %2541 = vmatprep.mubr.bf16.mxu0 %v1840_v53 }
 0x1c5   : > { %v8688_v54 = vpop.f32.mrb[57].mxu0  ;;  %v8752_v33 = vpop.f32.mrb[57].mxu1  ;;  %2542 = vmatmul.mubr.bf16.gmra.mrb[116].mxu0 %v11224_v52 }
 0x1c6   : > { %v8689_v55 = vadd.f32 %v8688_v54, %v8687_v27  ;;  %v8753_v56 = vadd.f32 %v8752_v33, %v8751_v29  ;;  %v8690_v39 = vpop.f32.mrb[58].mxu0  ;;  %v8754_v57 = vpop.f32.mrb[58].mxu1 }
 0x1c7   : > { %v8691_v41 = vpop.f32.mrb[59].mxu0  ;;  %v8755_v45 = vpop.f32.mrb[59].mxu1 }
 0x1c8   : > { %v8692_v58 = vadd.f32 %v8691_v41, %v8690_v39  ;;  %v8756_v59 = vadd.f32 %v8755_v45, %v8754_v57 }
 0x1ca   : > { %v11227_v47 = vpack.c.bf16 %v8692_v58, %v8689_v55  ;;  %v1841_v49 = vpack.c.bf16 %v8756_v59, %v8753_v56 }
 0x1cc   : > { %v8693_v60 = vpop.f32.mrb[60].mxu0  ;;  %v8757_v61 = vpop.f32.mrb[60].mxu1  ;;  %2549 = vmatprep.mubr.bf16.mxu0 %v1841_v49 }
 0x1cd   : > { %v8694_v62 = vpop.f32.mrb[61].mxu0  ;;  %v8758_v63 = vpop.f32.mrb[61].mxu1  ;;  %2550 = vmatmul.mubr.bf16.gmra.mrb[120].mxu0 %v11227_v47 }
 0x1ce   : > { %v8695_v1 = vadd.f32 %v8694_v62, %v8693_v60  ;;  %v8759_v2 = vadd.f32 %v8758_v63, %v8757_v61  ;;  %v8696_v3 = vpop.f32.mrb[62].mxu0  ;;  %v8760_v4 = vpop.f32.mrb[62].mxu1 }
 0x1cf   : > { %v8697_v6 = vpop.f32.mrb[63].mxu0  ;;  %v8761_v7 = vpop.f32.mrb[63].mxu1 }
 0x1d0   : > { %v8698_v8 = vadd.f32 %v8697_v6, %v8696_v3  ;;  %v8762_v11 = vadd.f32 %v8761_v7, %v8760_v4 }
 0x1d2   : > { %v11230_v12 = vpack.c.bf16 %v8698_v8, %v8695_v1  ;;  %v1842_v13 = vpack.c.bf16 %v8762_v11, %v8759_v2 }
 0x1d4   : > { %v8779_v5 = vpop.f32.mrb[64].mxu0  ;;  %2557 = vmatprep.mubr.bf16.mxu0 %v1842_v13 }
 0x1d5   : > { %v8780_v14 = vpop.f32.mrb[65].mxu0  ;;  %2558 = vmatmul.mubr.bf16.gmra.mrb[124].mxu0 %v11230_v12 }
 0x1d6   : > { %v8781_v17 = vadd.f32 %v8780_v14, %v8779_v5  ;;  %v8782_v19 = vpop.f32.mrb[66].mxu0 }
 0x1d7   : > { %v8783_v20 = vpop.f32.mrb[67].mxu0 }
 0x1d8   : > { %v8784_v23 = vadd.f32 %v8783_v20, %v8782_v19 }
 0x1da   : > { %v2037_v24 = vpack.c.bf16 %v8784_v23, %v8781_v17 }
 0x1dc   : > { %v8785_v25 = vpop.f32.mrb[68].mxu0  ;;  %9660 = vmatprep.mubr.bf16.mxu1 %v2037_v24 }
 0x1dd   : > { %v8786_v26 = vpop.f32.mrb[69].mxu0 }
 0x1de   : > { %v8787_v28 = vadd.f32 %v8786_v26, %v8785_v25  ;;  %v8788_v30 = vpop.f32.mrb[70].mxu0 }
 0x1df   : > { %v8789_v31 = vpop.f32.mrb[71].mxu0 }
 0x1e0   : > { %v8790_v32 = vadd.f32 %v8789_v31, %v8788_v30 }
 0x1e2   : > { %v2038_v34 = vpack.c.bf16 %v8790_v32, %v8787_v28 }
 0x1e4   : > { %v8791_v35 = vpop.f32.mrb[72].mxu0  ;;  %9661 = vmatmul.mubr.bf16.vlgmr.msra.gmra.mrb[96].mxu1 %v2038_v34 }
 0x1e5   : > { %v8792_v37 = vpop.f32.mrb[73].mxu0 }
 0x1e6   : > { %v8793_v40 = vadd.f32 %v8792_v37, %v8791_v35  ;;  %v8794_v42 = vpop.f32.mrb[74].mxu0 }
 0x1e7   : > { %v8795_v43 = vpop.f32.mrb[75].mxu0 }
 0x1e8   : > { %v8796_v44 = vadd.f32 %v8795_v43, %v8794_v42 }
 0x1ea   : > { %v2039_v9 = vpack.c.bf16 %v8796_v44, %v8793_v40 }
 0x1ec   : > { %v8797_v46 = vpop.f32.mrb[76].mxu0  ;;  %9664 = vmatprep.mubr.bf16.mxu1 %v2039_v9 }
 0x1ed   : > { %v8798_v10 = vpop.f32.mrb[77].mxu0 }
 0x1ee   : > { %v8799_v15 = vadd.f32 %v8798_v10, %v8797_v46  ;;  %v8800_v50 = vpop.f32.mrb[78].mxu0 }
 0x1ef   : > { %v8801_v16 = vpop.f32.mrb[79].mxu0 }
 0x1f0   : > { %v8802_v51 = vadd.f32 %v8801_v16, %v8800_v50 }
 0x1f2   : > { %v2040_v21 = vpack.c.bf16 %v8802_v51, %v8799_v15 }
 0x1f4   : > { %v8803_v22 = vpop.f32.mrb[80].mxu0  ;;  %9665 = vmatmul.mubr.bf16.gmra.mrb[100].mxu1 %v2040_v21 }
 0x1f5   : > { %v8804_v53 = vpop.f32.mrb[81].mxu0 }
 0x1f6   : > { %v8805_v27 = vadd.f32 %v8804_v53, %v8803_v22  ;;  %v8806_v29 = vpop.f32.mrb[82].mxu0 }
 0x1f7   : > { %v8807_v54 = vpop.f32.mrb[83].mxu0 }
 0x1f8   : > { %v8808_v33 = vadd.f32 %v8807_v54, %v8806_v29 }
 0x1fa   : > { %v2041_v55 = vpack.c.bf16 %v8808_v33, %v8805_v27 }
 0x1fc   : > { %v8809_v56 = vpop.f32.mrb[84].mxu0  ;;  %9668 = vmatprep.mubr.bf16.mxu1 %v2041_v55 }
 0x1fd   : > { %v8810_v39 = vpop.f32.mrb[85].mxu0 }
 0x1fe   : > { %v8811_v57 = vadd.f32 %v8810_v39, %v8809_v56  ;;  %v8812_v41 = vpop.f32.mrb[86].mxu0 }
 0x1ff   : > { %v8813_v45 = vpop.f32.mrb[87].mxu0 }
 0x200   : > { %v8814_v58 = vadd.f32 %v8813_v45, %v8812_v41 }
 0x202   : > { %v2042_v59 = vpack.c.bf16 %v8814_v58, %v8811_v57 }
 0x204   : > { %v8815_v49 = vpop.f32.mrb[88].mxu0  ;;  %9669 = vmatmul.mubr.bf16.gmra.mrb[104].mxu1 %v2042_v59 }
 0x205   : > { %v8816_v60 = vpop.f32.mrb[89].mxu0 }
 0x206   : > { %v8817_v61 = vadd.f32 %v8816_v60, %v8815_v49  ;;  %v8818_v62 = vpop.f32.mrb[90].mxu0 }
 0x207   : > { %v8819_v63 = vpop.f32.mrb[91].mxu0 }
 0x208   : > { %v8820_v1 = vadd.f32 %v8819_v63, %v8818_v62 }
 0x20a   : > { %v2043_v2 = vpack.c.bf16 %v8820_v1, %v8817_v61 }
 0x20c   : > { %v8821_v3 = vpop.f32.mrb[92].mxu0  ;;  %9672 = vmatprep.mubr.bf16.mxu1 %v2043_v2  ;;  %v11254_v2 = vld [vmem:[%s10746_s17] ss:$0 sm:$0xff] }
 0x20d   : > { %v8822_v4 = vpop.f32.mrb[93].mxu0 }
 0x20e   : > { %v8823_v6 = vadd.f32 %v8822_v4, %v8821_v3  ;;  %v8824_v7 = vpop.f32.mrb[94].mxu0 }
 0x20f   : > { %v8825_v8 = vpop.f32.mrb[95].mxu0 }
 0x210   : > { %v8826_v11 = vadd.f32 %v8825_v8, %v8824_v7 }
 0x212   : > { %v2044_v13 = vpack.c.bf16 %v8826_v11, %v8823_v6 }
 0x214   : > { %9673 = vmatmul.mubr.bf16.gmra.mrb[108].mxu1 %v2044_v13 }
 0x230   : > { %v8843_v5 = vpop.f32.mrb[64].mxu1 }
 0x231   : > { %v8844_v14 = vpop.f32.mrb[65].mxu1 }
 0x232   : > { %v8845_v17 = vadd.f32 %v8844_v14, %v8843_v5  ;;  %v8846_v19 = vpop.f32.mrb[66].mxu1 }
 0x233   : > { %v8847_v20 = vpop.f32.mrb[67].mxu1 }
 0x234   : > { %v8848_v23 = vadd.f32 %v8847_v20, %v8846_v19  ;;  %v2407_v6 = vadd.f32 %v8845_v17, %v11254_v2  ;;  %v10309_v20 = vld [vmem:[%s10751_s21] sm:$0xff]  }
 0x235   : > { %9692 = vmatprep.mubr.bf16.mxu1 %v10309_v20 }
 0x236   : > { %v2410_v13 = vadd.f32 %v8848_v23, %v11254_v2 }
 0x238   : > { %v8849_v24 = vpop.f32.mrb[68].mxu1 }
 0x239   : > { %v8850_v25 = vpop.f32.mrb[69].mxu1 }
 0x23a   : > { %v8851_v26 = vadd.f32 %v8850_v25, %v8849_v24  ;;  %v8852_v28 = vpop.f32.mrb[70].mxu1  ;;  %v10310_v24 = vld [vmem:[%s10751_s21 + $0x40] sm:$0xff]  }
 0x23b   : > { %v8853_v30 = vpop.f32.mrb[71].mxu1  ;;  %9724 = vmatprep.mubr.bf16.mxu0 %v10310_v24 }
 0x23c   : > { %v8854_v31 = vadd.f32 %v8853_v30, %v8852_v28  ;;  %v2415_v30 = vadd.f32 %v8851_v26, %v11254_v2 }
 0x240   : > { %v8855_v32 = vpop.f32.mrb[72].mxu1 }
 0x241   : > { %v8856_v34 = vpop.f32.mrb[73].mxu1 }
 0x242   : > { %v8857_v35 = vadd.f32 %v8856_v34, %v8855_v32  ;;  %v8858_v37 = vpop.f32.mrb[74].mxu1 }
 0x243   : > { %v8859_v40 = vpop.f32.mrb[75].mxu1 }
 0x244   : > { %v8860_v42 = vadd.f32 %v8859_v40, %v8858_v37  ;;  %v2418_v37 = vadd.f32 %v8854_v31, %v11254_v2 }
 0x248   : > { %v8861_v43 = vpop.f32.mrb[76].mxu1 }
 0x249   : > { %v8862_v44 = vpop.f32.mrb[77].mxu1 }
 0x24a   : > { %v11233_v9 = vadd.f32 %v8862_v44, %v8861_v43  ;;  %v8864_v46 = vpop.f32.mrb[78].mxu1 }
 0x24b   : > { %v8865_v10 = vpop.f32.mrb[79].mxu1 }
 0x24c   : > { %v11235_v15 = vadd.f32 %v8865_v10, %v8864_v46  ;;  %v2423_v10 = vadd.f32 %v8857_v35, %v11254_v2 }
 0x24e   : > { %v2434_v35 = vadd.f32 %v11235_v15, %v11254_v2 }
 0x250   : > { %v8867_v50 = vpop.f32.mrb[80].mxu1 }
 0x251   : > { %v8868_v16 = vpop.f32.mrb[81].mxu1 }
 0x252   : > { %v11237_v51 = vadd.f32 %v8868_v16, %v8867_v50  ;;  %v8870_v21 = vpop.f32.mrb[82].mxu1 }
 0x253   : > { %v8871_v22 = vpop.f32.mrb[83].mxu1 }
 0x254   : > { %v11239_v53 = vadd.f32 %v8871_v22, %v8870_v21  ;;  %v2426_v22 = vadd.f32 %v8860_v42, %v11254_v2 }
 0x258   : > { %v8873_v27 = vpop.f32.mrb[84].mxu1 }
 0x259   : > { %v8874_v29 = vpop.f32.mrb[85].mxu1 }
 0x25a   : > { %v11241_v54 = vadd.f32 %v8874_v29, %v8873_v27  ;;  %v8876_v33 = vpop.f32.mrb[86].mxu1 }
 0x25b   : > { %v8877_v55 = vpop.f32.mrb[87].mxu1 }
 0x25c   : > { %v11243_v56 = vadd.f32 %v8877_v55, %v8876_v33  ;;  %v2431_v55 = vadd.f32 %v11233_v9, %v11254_v2  ;;  %v2442_v9 = vadd.f32 %v11239_v53, %v11254_v2 }
 0x260   : > { %v8879_v39 = vpop.f32.mrb[88].mxu1 }
 0x261   : > { %v8880_v57 = vpop.f32.mrb[89].mxu1 }
 0x262   : > { %v11245_v41 = vadd.f32 %v8880_v57, %v8879_v39  ;;  %v8882_v45 = vpop.f32.mrb[90].mxu1 }
 0x263   : > { %v8883_v58 = vpop.f32.mrb[91].mxu1 }
 0x264   : > { %v11247_v59 = vadd.f32 %v8883_v58, %v8882_v45 }
 0x268   : > { %v8885_v49 = vpop.f32.mrb[92].mxu1 }
 0x269   : > { %v8886_v60 = vpop.f32.mrb[93].mxu1 }
 0x26a   : > { %v11249_v61 = vadd.f32 %v8886_v60, %v8885_v49  ;;  %v8888_v62 = vpop.f32.mrb[94].mxu1 }
 0x26b   : > { %v8889_v63 = vpop.f32.mrb[95].mxu1 }
 0x26c   : > { %v11251_v1 = vadd.f32 %v8889_v63, %v8888_v62  ;;  %v2439_v63 = vadd.f32 %v11237_v51, %v11254_v2  ;;  %v2450_v51 = vadd.f32 %v11243_v56, %v11254_v2 }
 0x270   : > { %v8907_v3 = vpop.f32.mrb[96].mxu0 }
 0x271   : > { %v8908_v4 = vpop.f32.mrb[97].mxu0 }
 0x272   : > { %v8909_v7 = vadd.f32 %v8908_v4, %v8907_v3  ;;  %v8910_v8 = vpop.f32.mrb[98].mxu0 }
 0x273   : > { %v8911_v11 = vpop.f32.mrb[99].mxu0 }
 0x274   : > { %v8912_v5 = vadd.f32 %v8911_v11, %v8910_v8  ;;  %v11258_v14 = vadd.f32 %v8909_v7, %v2407_v6 }
 0x276   : > { %v11260_v19 = vadd.f32 %v8912_v5, %v2410_v13  ;;  %v2447_v5 = vadd.f32 %v11241_v54, %v11254_v2  ;;  %v2458_v54 = vadd.f32 %v11247_v59, %v11254_v2 }
 0x278   : > { %v8913_v25 = vpop.f32.mrb[100].mxu0 }
 0x279   : > { %v8914_v28 = vpop.f32.mrb[101].mxu0 }
 0x27a   : > { %v8915_v32 = vadd.f32 %v8914_v28, %v8913_v25  ;;  %v8916_v17 = vpop.f32.mrb[102].mxu0 }
 0x27b   : > { %v8917_v34 = vpop.f32.mrb[103].mxu0 }
 0x27c   : > { %v8918_v40 = vadd.f32 %v8917_v34, %v8916_v17  ;;  %v11266_v23 = vadd.f32 %v8915_v32, %v2415_v30  ;;  %v2455_v34 = vadd.f32 %v11245_v41, %v11254_v2  ;;  %v2466_v41 = vadd.f32 %v11251_v1, %v11254_v2 }
 0x27e   : > { %v11268_v43 = vadd.f32 %v8918_v40, %v2418_v37 }
 0x280   : > { %v8919_v44 = vpop.f32.mrb[104].mxu0 }
 0x281   : > { %v8920_v46 = vpop.f32.mrb[105].mxu0 }
 0x282   : > { %v8921_v50 = vadd.f32 %v8920_v46, %v8919_v44  ;;  %v8922_v16 = vpop.f32.mrb[106].mxu0 }
 0x283   : > { %v8923_v21 = vpop.f32.mrb[107].mxu0 }
 0x284   : > { %v8924_v26 = vadd.f32 %v8923_v21, %v8922_v16  ;;  %v11272_v27 = vadd.f32 %v8921_v50, %v2423_v10  ;;  %v2463_v21 = vadd.f32 %v11249_v61, %v11254_v2 }
 0x286   : > { %v11274_v29 = vadd.f32 %v8924_v26, %v2426_v22 }
 0x288   : > { %v8925_v31 = vpop.f32.mrb[108].mxu0 }
 0x289   : > { %v8926_v33 = vpop.f32.mrb[109].mxu0 }
 0x28a   : > { %v8927_v39 = vadd.f32 %v8926_v33, %v8925_v31  ;;  %v8928_v57 = vpop.f32.mrb[110].mxu0 }
 0x28b   : > { %v8929_v45 = vpop.f32.mrb[111].mxu0 }
 0x28c   : > { %v8930_v58 = vadd.f32 %v8929_v45, %v8928_v57  ;;  %v11280_v49 = vadd.f32 %v8927_v39, %v2431_v55 }
 0x28e   : > { %v11282_v42 = vadd.f32 %v8930_v58, %v2434_v35 }
 0x290   : > { %v8931_v60 = vpop.f32.mrb[112].mxu0 }
 0x291   : > { %v8932_v62 = vpop.f32.mrb[113].mxu0 }
 0x292   : > { %v8933_v3 = vadd.f32 %v8932_v62, %v8931_v60  ;;  %v8934_v4 = vpop.f32.mrb[114].mxu0 }
 0x293   : > { %v8935_v6 = vpop.f32.mrb[115].mxu0 }
 0x294   : > { %v8936_v7 = vadd.f32 %v8935_v6, %v8934_v4  ;;  %v11288_v8 = vadd.f32 %v8933_v3, %v2439_v63 }
 0x296   : > { %v11290_v15 = vadd.f32 %v8936_v7, %v2442_v9 }
 0x298   : > { %v8937_v11 = vpop.f32.mrb[116].mxu0 }
 0x299   : > { %v8938_v13 = vpop.f32.mrb[117].mxu0 }
 0x29a   : > { %v8939_v20 = vadd.f32 %v8938_v13, %v8937_v11  ;;  %v8940_v24 = vpop.f32.mrb[118].mxu0 }
 0x29b   : > { %v8941_v25 = vpop.f32.mrb[119].mxu0 }
 0x29c   : > { %v8942_v28 = vadd.f32 %v8941_v25, %v8940_v24  ;;  %v11296_v30 = vadd.f32 %v8939_v20, %v2447_v5 }
 0x29e   : > { %v11298_v53 = vadd.f32 %v8942_v28, %v2450_v51 }
 0x2a0   : > { %v8943_v32 = vpop.f32.mrb[120].mxu0 }
 0x2a1   : > { %v8944_v17 = vpop.f32.mrb[121].mxu0 }
 0x2a2   : > { %v8945_v37 = vadd.f32 %v8944_v17, %v8943_v32  ;;  %v8946_v40 = vpop.f32.mrb[122].mxu0 }
 0x2a3   : > { %v8947_v44 = vpop.f32.mrb[123].mxu0 }
 0x2a4   : > { %v8948_v46 = vadd.f32 %v8947_v44, %v8946_v40  ;;  %v11304_v10 = vadd.f32 %v8945_v37, %v2455_v34 }
 0x2a6   : > { %v11306_v56 = vadd.f32 %v8948_v46, %v2458_v54 }
 0x2a8   : > { %v8949_v50 = vpop.f32.mrb[124].mxu0 }
 0x2a9   : > { %v8950_v16 = vpop.f32.mrb[125].mxu0 }
 0x2aa   : > { %v8951_v22 = vadd.f32 %v8950_v16, %v8949_v50  ;;  %v8952_v26 = vpop.f32.mrb[126].mxu0 }
 0x2ab   : > { %v8953_v31 = vpop.f32.mrb[127].mxu0 }
 0x2ac   : > { %v8954_v33 = vadd.f32 %v8953_v31, %v8952_v26  ;;  %v11312_v55 = vadd.f32 %v8951_v22, %v2463_v21 }
 0x2ae   : > { %v11314_v59 = vadd.f32 %v8954_v33, %v2466_v41 }
 0x2b7   : > { %v9662_v39 = vpop.f32.mrb[96].mxu1 }
 0x2b8   : > { %v2609_v57 = vadd.f32 %v9662_v39, %v11266_v23  ;;  %v2600_v45 = vpop.f32.mrb[97].mxu1 }
 0x2b9   : > { %v2601_v35 = vadd.f32 %v2600_v45, %v11258_v14  ;;  %v9663_v58 = vpop.f32.mrb[98].mxu1 }
 0x2ba   : > { %v2681_v60 = vmul.f32 0.0001, %v2609_v57  ;;  %v2612_v61 = vadd.f32 %v9663_v58, %v11268_v43  ;;  %v2603_v62 = vpop.f32.mrb[99].mxu1  ;;  %vm2665_vm0 = vcmp.ge.f32.partialorder %v2609_v57, 0.0 }
 0x2bb   : > { %v2679_v63 = vmul.f32 0.0001, %v2601_v35  ;;  %v2604_v1 = vadd.f32 %v2603_v62, %v11260_v19  ;;  %vm2663_vm1 = vcmp.ge.f32.partialorder %v2601_v35, 0.0 }
 0x2bc   : > { %vm2666_vm2 = vcmp.ge.f32.partialorder %v2612_v61, 0.0  ;;  %v2682_v2 = vmul.f32 0.0001, %v2612_v61  ;;  %v2697_v4 = vsel %vm2665_vm0, %v2609_v57, %v2681_v60 }
 0x2bd   : > { %vm2664_vm3 = vcmp.ge.f32.partialorder %v2604_v1, 0.0  ;;  %v2680_v3 = vmul.f32 0.0001, %v2604_v1  ;;  %v2695_v23 = vsel %vm2663_vm1, %v2601_v35, %v2679_v63 }
 0x2be   : > { %v2698_v6 = vsel %vm2666_vm2, %v2612_v61, %v2682_v2 }
 0x2bf   : > { %v11320_v9 = vpack.c.bf16 %v2698_v6, %v2697_v4  ;;  %v2696_v14 = vsel %vm2664_vm3, %v2604_v1, %v2680_v3 }
 0x2c0   : > { %v11322_v7 = vpack.c.bf16 %v2696_v14, %v2695_v23 }
 0x2c2   : > { %9676 = vmatprep.subr.bf16.mxu1 %v11322_v7  ;;  %9708 = vmatprep.subr.bf16.mxu0 %v11322_v7 }
 0x2c3   : > { %9677 = vmatpush3.bf16.msra.mxu1 %v11322_v7  ;;  %9709 = vmatpush3.bf16.msra.mxu0 %v11322_v7 }
 0x2c4   : > { %9678 = vmatprep.subr.bf16.mxu1 %v11320_v9  ;;  %9710 = vmatprep.subr.bf16.mxu0 %v11320_v9 }
 0x2c7   : > { %v9666_v19 = vpop.f32.mrb[100].mxu1  ;;  %9679 = vmatpush3.bf16.msra.mxu1 %v11320_v9  ;;  %9711 = vmatpush3.bf16.msra.mxu0 %v11320_v9 }
 0x2c8   : > { %v2625_v43 = vadd.f32 %v9666_v19, %v11280_v49  ;;  %v2616_v11 = vpop.f32.mrb[101].mxu1 }
 0x2c9   : > { %v2617_v13 = vadd.f32 %v2616_v11, %v11272_v27  ;;  %v9667_v5 = vpop.f32.mrb[102].mxu1  ;;  %v10311_v11 = vld [vmem:[%s10751_s21 + $0x8] sm:$0xff]  }
 0x2ca   : > { %v2685_v20 = vmul.f32 0.0001, %v2625_v43  ;;  %v2628_v24 = vadd.f32 %v9667_v5, %v11282_v42  ;;  %v2619_v25 = vpop.f32.mrb[103].mxu1  ;;  %vm2669_vm4 = vcmp.ge.f32.partialorder %v2625_v43, 0.0  ;;  %v10313_v5 = vld [vmem:[%s10751_s21 + $0x10] sm:$0xff]  }
 0x2cb   : > { %v2683_v51 = vmul.f32 0.0001, %v2617_v13  ;;  %v2620_v28 = vadd.f32 %v2619_v25, %v11274_v29  ;;  %vm2667_vm5 = vcmp.ge.f32.partialorder %v2617_v13, 0.0  ;;  %v10328_v25 = vld [vmem:[%s10756_s25 + $0x80] sm:$0xff]  }
 0x2cc   : > { %vm2670_vm6 = vcmp.ge.f32.partialorder %v2628_v24, 0.0  ;;  %v2686_v32 = vmul.f32 0.0001, %v2628_v24  ;;  %v2701_v34 = vsel %vm2669_vm4, %v2625_v43, %v2685_v20  ;;  %v10326_v43 = vld [vmem:[%s10756_s25 + $0xc0] sm:$0xff]   ;;  %v10314_v20 = vld [vmem:[%s10751_s21 + $0x50] sm:$0xff]  }
 0x2cd   : > { %vm2668_vm7 = vcmp.ge.f32.partialorder %v2620_v28, 0.0  ;;  %v2684_v17 = vmul.f32 0.0001, %v2620_v28  ;;  %v2699_v49 = vsel %vm2667_vm5, %v2617_v13, %v2683_v51  ;;  %v10312_v13 = vld [vmem:[%s10751_s21 + $0x48] sm:$0xff]  }
 0x2ce   : > { %v2702_v37 = vsel %vm2670_vm6, %v2628_v24, %v2686_v32  ;;  %v10327_v24 = vld [vmem:[%s10756_s25] sm:$0xff]   ;;  %v10329_v51 = vld [vmem:[%s10756_s25 + $0x48] sm:$0xff]  }
 0x2cf   : > { %v11336_v40 = vpack.c.bf16 %v2702_v37, %v2701_v34  ;;  %v2700_v27 = vsel %vm2668_vm7, %v2620_v28, %v2684_v17  ;;  %v10330_v28 = vld [vmem:[%s10756_s25 + $0xc8] sm:$0xff]   ;;  %v10333_v34 = vld [vmem:[%s10756_s25 + $0x50] sm:$0xff]  }
 0x2d0   : > { %v11338_v44 = vpack.c.bf16 %v2700_v27, %v2699_v49  ;;  %v10331_v32 = vld [vmem:[%s10756_s25 + $0x8] sm:$0xff]   ;;  %v10334_v37 = vld [vmem:[%s10756_s25 + $0xd0] sm:$0xff]   ;;  %v10315_v49 = vld [vmem:[%s10751_s21 + $0x18] sm:$0xff]  }
 0x2d1   : > { %v10332_v17 = vld [vmem:[%s10756_s25 + $0x88] sm:$0xff]   ;;  %v10316_v27 = vld [vmem:[%s10751_s21 + $0x58] sm:$0xff]  }
 0x2d2   : > { %9680 = vmatprep.subr.bf16.mxu1 %v11338_v44  ;;  %9712 = vmatprep.subr.bf16.mxu0 %v11338_v44 }
 0x2d3   : > { %9681 = vmatpush3.bf16.msra.mxu1 %v11338_v44  ;;  %9713 = vmatpush3.bf16.msra.mxu0 %v11338_v44 }
 0x2d4   : > { %9682 = vmatprep.subr.bf16.mxu1 %v11336_v40  ;;  %9714 = vmatprep.subr.bf16.mxu0 %v11336_v40 }
 0x2d7   : > { %v9670_v29 = vpop.f32.mrb[104].mxu1  ;;  %9683 = vmatpush3.bf16.msra.mxu1 %v11336_v40  ;;  %9715 = vmatpush3.bf16.msra.mxu0 %v11336_v40 }
 0x2d8   : > { %v2641_v42 = vadd.f32 %v9670_v29, %v11296_v30  ;;  %v2632_v54 = vpop.f32.mrb[105].mxu1  ;;  %v10317_v29 = vld [vmem:[%s10751_s21 + $0x20] sm:$0xff]  }
 0x2d9   : > { %v2633_v46 = vadd.f32 %v2632_v54, %v11288_v8  ;;  %v9671_v50 = vpop.f32.mrb[106].mxu1  ;;  %v10335_v54 = vld [vmem:[%s10756_s25 + $0x10] sm:$0xff]  }
 0x2da   : > { %v2689_v16 = vmul.f32 0.0001, %v2641_v42  ;;  %v2644_v21 = vadd.f32 %v9671_v50, %v11298_v53  ;;  %v2635_v22 = vpop.f32.mrb[107].mxu1  ;;  %vm2673_vm8 = vcmp.ge.f32.partialorder %v2641_v42, 0.0  ;;  %v10337_v50 = vld [vmem:[%s10756_s25 + $0x58] sm:$0xff]  }
 0x2db   : > { %v2687_v26 = vmul.f32 0.0001, %v2633_v46  ;;  %v2636_v31 = vadd.f32 %v2635_v22, %v11290_v15  ;;  %vm2671_vm9 = vcmp.ge.f32.partialorder %v2633_v46, 0.0  ;;  %v10340_v22 = vld [vmem:[%s10756_s25 + $0x98] sm:$0xff]  }
 0x2dc   : > { %vm2674_vm10 = vcmp.ge.f32.partialorder %v2644_v21, 0.0  ;;  %v2690_v41 = vmul.f32 0.0001, %v2644_v21  ;;  %v2705_v39 = vsel %vm2673_vm8, %v2641_v42, %v2689_v16  ;;  %v10318_v42 = vld [vmem:[%s10751_s21 + $0x60] sm:$0xff]   ;;  %v10338_v16 = vld [vmem:[%s10756_s25 + $0xd8] sm:$0xff]  }
 0x2dd   : > { %vm2672_vm11 = vcmp.ge.f32.partialorder %v2636_v31, 0.0  ;;  %v2688_v33 = vmul.f32 0.0001, %v2636_v31  ;;  %v2703_v30 = vsel %vm2671_vm9, %v2633_v46, %v2687_v26  ;;  %v10336_v46 = vld [vmem:[%s10756_s25 + $0x90] sm:$0xff]   ;;  %v10341_v26 = vld [vmem:[%s10756_s25 + $0x60] sm:$0xff]  }
 0x2de   : > { %v2706_v57 = vsel %vm2674_vm10, %v2644_v21, %v2690_v41  ;;  %v10339_v21 = vld [vmem:[%s10756_s25 + $0x18] sm:$0xff]   ;;  %v10319_v41 = vld [vmem:[%s10751_s21 + $0x28] sm:$0xff]  }
 0x2df   : > { %v11352_v45 = vpack.c.bf16 %v2706_v57, %v2705_v39  ;;  %v2704_v8 = vsel %vm2672_vm11, %v2636_v31, %v2688_v33  ;;  %v10342_v31 = vld [vmem:[%s10756_s25 + $0xe0] sm:$0xff]   ;;  %v10320_v33 = vld [vmem:[%s10751_s21 + $0x68] sm:$0xff]   ;;  %v10321_v39 = vld [vmem:[%s10751_s21 + $0x30] sm:$0xff]  }
 0x2e0   : > { %v11354_v35 = vpack.c.bf16 %v2704_v8, %v2703_v30  ;;  %v10322_v57 = vld [vmem:[%s10751_s21 + $0x70] sm:$0xff]   ;;  %v10343_v30 = vld [vmem:[%s10756_s25 + $0x20] sm:$0xff]  }
 0x2e1   : > { %v10344_v8 = vld [vmem:[%s10756_s25 + $0xa0] sm:$0xff]  }
 0x2e2   : > { %9684 = vmatprep.subr.bf16.mxu1 %v11354_v35  ;;  %9716 = vmatprep.subr.bf16.mxu0 %v11354_v35 }
 0x2e3   : > { %9685 = vmatpush3.bf16.msra.mxu1 %v11354_v35  ;;  %9717 = vmatpush3.bf16.msra.mxu0 %v11354_v35 }
 0x2e4   : > { %9686 = vmatprep.subr.bf16.mxu1 %v11352_v45  ;;  %9718 = vmatprep.subr.bf16.mxu0 %v11352_v45 }
 0x2e7   : > { %v9674_v15 = vpop.f32.mrb[108].mxu1  ;;  %9687 = vmatpush3.bf16.msra.mxu1 %v11352_v45  ;;  %9719 = vmatpush3.bf16.msra.mxu0 %v11352_v45 }
 0x2e8   : > { %v2657_v53 = vadd.f32 %v9674_v15, %v11312_v55  ;;  %v2648_v58 = vpop.f32.mrb[109].mxu1  ;;  %v10345_v15 = vld [vmem:[%s10756_s25 + $0x68] sm:$0xff]  }
 0x2e9   : > { %v2649_v60 = vadd.f32 %v2648_v58, %v11304_v10  ;;  %v9675_v61 = vpop.f32.mrb[110].mxu1  ;;  %v10347_v58 = vld [vmem:[%s10756_s25 + $0x28] sm:$0xff]  }
 0x2ea   : > { %v2693_v62 = vmul.f32 0.0001, %v2657_v53  ;;  %v2660_v63 = vadd.f32 %v9675_v61, %v11314_v59  ;;  %v2651_v1 = vpop.f32.mrb[111].mxu1  ;;  %vm2677_vm12 = vcmp.ge.f32.partialorder %v2657_v53, 0.0  ;;  %v10349_v61 = vld [vmem:[%s10756_s25 + $0x70] sm:$0xff]  }
 0x2eb   : > { %v2691_v2 = vmul.f32 0.0001, %v2649_v60  ;;  %v2652_v3 = vadd.f32 %v2651_v1, %v11306_v56  ;;  %vm2675_vm13 = vcmp.ge.f32.partialorder %v2649_v60, 0.0  ;;  %v10325_v56 = vld [vmem:[%s10756_s25 + $0x40] sm:$0xff]   ;;  %v10324_v1 = vld [vmem:[%s10751_s21 + $0x78] sm:$0xff]  }
 0x2ec   : > { %vm2678_vm14 = vcmp.ge.f32.partialorder %v2660_v63, 0.0  ;;  %v2694_v4 = vmul.f32 0.0001, %v2660_v63  ;;  %v2709_v6 = vsel %vm2677_vm12, %v2657_v53, %v2693_v62  ;;  %v10346_v53 = vld [vmem:[%s10756_s25 + $0xe8] sm:$0xff]   ;;  %v10350_v62 = vld [vmem:[%s10756_s25 + $0xf0] sm:$0xff]  }
 0x2ed   : > { %vm2676_vm15 = vcmp.ge.f32.partialorder %v2652_v3, 0.0  ;;  %v2692_v55 = vmul.f32 0.0001, %v2652_v3  ;;  %v2707_v23 = vsel %vm2675_vm13, %v2649_v60, %v2691_v2  ;;  %v10348_v60 = vld [vmem:[%s10756_s25 + $0xa8] sm:$0xff]   ;;  %v10351_v2 = vld [vmem:[%s10756_s25 + $0x30] sm:$0xff]  }
 0x2ee   : > { %v2710_v10 = vsel %vm2678_vm14, %v2660_v63, %v2694_v4  ;;  %v10323_v63 = vld [vmem:[%s10751_s21 + $0x38] sm:$0xff]  }
 0x2ef   : > { %v11368_v14 = vpack.c.bf16 %v2710_v10, %v2709_v6  ;;  %v2708_v59 = vsel %vm2676_vm15, %v2652_v3, %v2692_v55  ;;  %v10352_v3 = vld [vmem:[%s10756_s25 + $0xb0] sm:$0xff]   ;;  %v10353_v4 = vld [vmem:[%s10756_s25 + $0x78] sm:$0xff]  }
 0x2f0   : > { %v11370_v19 = vpack.c.bf16 %v2708_v59, %v2707_v23  ;;  %v10354_v55 = vld [vmem:[%s10756_s25 + $0xf8] sm:$0xff]  }
 0x2f1   : > { %v10355_v6 = vld [vmem:[%s10756_s25 + $0x38] sm:$0xff]  }
 0x2f2   : > { %9688 = vmatprep.subr.bf16.mxu1 %v11370_v19  ;;  %9720 = vmatprep.subr.bf16.mxu0 %v11370_v19  ;;  %v10356_v10 = vld [vmem:[%s10756_s25 + $0xb8] sm:$0xff]  }
 0x2f3   : > { %9689 = vmatpush3.bf16.msra.mxu1 %v11370_v19  ;;  %9721 = vmatpush3.bf16.msra.mxu0 %v11370_v19 }
 0x2f4   : > { %9690 = vmatprep.subr.bf16.mxu1 %v11368_v14  ;;  %9722 = vmatprep.subr.bf16.mxu0 %v11368_v14 }
 0x2f7   : > { %9691 = vmatpush3.bf16.msra.mxu1 %v11368_v14  ;;  %9723 = vmatpush3.bf16.msra.mxu0 %v11368_v14 }
 0x2f8   : > { %9003 = vmatprep.subr.bf16.mxu1 %v10325_v56  ;;  %9067 = vmatprep.subr.bf16.mxu0 %v10326_v43 }
 0x2fa   : > { %9693 = vmatmul.mubr.bf16.vlgmr.msra.gmra.mrb[112].mxu1 %v10311_v11  ;;  %9725 = vmatmul.mubr.bf16.vlgmr.msra.gmra.mrb[128].mxu0 %v10312_v13 }
 0x2fb   : > { %9696 = vmatprep.mubr.bf16.mxu1 %v10313_v5  ;;  %9728 = vmatprep.mubr.bf16.mxu0 %v10314_v20 }
 0x2fc   : > { %9004 = vmatpush3.bf16.msra.mxu1 %v10327_v24  ;;  %9068 = vmatpush3.bf16.msra.mxu0 %v10328_v25 }
 0x2fd   : > { %9005 = vmatprep.subr.bf16.mxu1 %v10329_v51  ;;  %9069 = vmatprep.subr.bf16.mxu0 %v10330_v28 }
 0x300   : > { %9006 = vmatpush3.bf16.msra.mxu1 %v10331_v32  ;;  %9070 = vmatpush3.bf16.msra.mxu0 %v10332_v17 }
 0x301   : > { %9007 = vmatprep.subr.bf16.mxu1 %v10333_v34  ;;  %9071 = vmatprep.subr.bf16.mxu0 %v10334_v37 }
 0x302   : > { %9697 = vmatmul.mubr.bf16.gmra.mrb[116].mxu1 %v10315_v49  ;;  %9729 = vmatmul.mubr.bf16.gmra.mrb[132].mxu0 %v10316_v27 }
 0x303   : > { %9700 = vmatprep.mubr.bf16.mxu1 %v10317_v29  ;;  %9732 = vmatprep.mubr.bf16.mxu0 %v10318_v42 }
 0x304   : > { %9008 = vmatpush3.bf16.msra.mxu1 %v10335_v54  ;;  %9072 = vmatpush3.bf16.msra.mxu0 %v10336_v46 }
 0x305   : > { %9009 = vmatprep.subr.bf16.mxu1 %v10337_v50  ;;  %9073 = vmatprep.subr.bf16.mxu0 %v10338_v16 }
 0x308   : > { %9010 = vmatpush3.bf16.msra.mxu1 %v10339_v21  ;;  %9074 = vmatpush3.bf16.msra.mxu0 %v10340_v22 }
 0x309   : > { %9011 = vmatprep.subr.bf16.mxu1 %v10341_v26  ;;  %9075 = vmatprep.subr.bf16.mxu0 %v10342_v31 }
 0x30a   : > { %9701 = vmatmul.mubr.bf16.gmra.mrb[120].mxu1 %v10319_v41  ;;  %9733 = vmatmul.mubr.bf16.gmra.mrb[136].mxu0 %v10320_v33 }
 0x30b   : > { %9704 = vmatprep.mubr.bf16.mxu1 %v10321_v39  ;;  %9736 = vmatprep.mubr.bf16.mxu0 %v10322_v57 }
 0x30c   : > { %9012 = vmatpush3.bf16.msra.mxu1 %v10343_v30  ;;  %9076 = vmatpush3.bf16.msra.mxu0 %v10344_v8 }
 0x30d   : > { %9013 = vmatprep.subr.bf16.mxu1 %v10345_v15  ;;  %9077 = vmatprep.subr.bf16.mxu0 %v10346_v53 }
 0x310   : > { %9014 = vmatpush3.bf16.msra.mxu1 %v10347_v58  ;;  %9078 = vmatpush3.bf16.msra.mxu0 %v10348_v60 }
 0x311   : > { %9015 = vmatprep.subr.bf16.mxu1 %v10349_v61  ;;  %9079 = vmatprep.subr.bf16.mxu0 %v10350_v62 }
 0x312   : > { %9705 = vmatmul.mubr.bf16.gmra.mrb[124].mxu1 %v10323_v63  ;;  %9737 = vmatmul.mubr.bf16.gmra.mrb[140].mxu0 %v10324_v1 }
 0x313   : > { %3353 = vmatprep.mubr.bf16.mxu1 %v11322_v7  ;;  %3450 = vmatprep.mubr.bf16.mxu0 %v11209_v48 }
 0x314   : > { %9016 = vmatpush3.bf16.msra.mxu1 %v10351_v2  ;;  %9080 = vmatpush3.bf16.msra.mxu0 %v10352_v3 }
 0x315   : > { %9017 = vmatprep.subr.bf16.mxu1 %v10353_v4  ;;  %9081 = vmatprep.subr.bf16.mxu0 %v10354_v55 }
 0x318   : > { %9018 = vmatpush3.bf16.msra.mxu1 %v10355_v6  ;;  %9082 = vmatpush3.bf16.msra.mxu0 %v10356_v10 }
 0x3cd   : > { %v9694_v23 = vpop.f32.mrb[112].mxu1  ;;  %v9726_v59 = vpop.f32.mrb[128].mxu0 }
 0x3ce   : > { %v2817_v56 = vpop.f32.mrb[113].mxu1  ;;  %v2987_v43 = vpop.f32.mrb[129].mxu0 }
 0x3cf   : > { %v9695_v11 = vpop.f32.mrb[114].mxu1  ;;  %v9727_v13 = vpop.f32.mrb[130].mxu0 }
 0x3d0   : > { %v2881_v5 = vpack.c.bf16 %v9695_v11, %v9694_v23  ;;  %v3051_v7 = vpack.c.bf16 %v9727_v13, %v9726_v59  ;;  %v2820_v20 = vpop.f32.mrb[115].mxu1  ;;  %v2990_v48 = vpop.f32.mrb[131].mxu0 }
 0x3d1   : > { %v2880_v24 = vpack.c.bf16 %v2820_v20, %v2817_v56  ;;  %v3050_v25 = vpack.c.bf16 %v2990_v48, %v2987_v43 }
 0x3d3   : > { %3354 = vmatmul.mubr.bf16.vlgmr.msra.gmra.mrb[128].mxu1 %v2880_v24  ;;  %3451 = vmatmul.mubr.bf16.vlgmr.msra.gmra.mrb[144].mxu0 %v3050_v25 }
 0x3d4   : > { %3361 = vmatprep.mubr.bf16.mxu1 %v11320_v9  ;;  %3458 = vmatprep.mubr.bf16.mxu0 %v11212_v36 }
 0x3d5   : > { %v9698_v51 = vpop.f32.mrb[116].mxu1  ;;  %v9730_v28 = vpop.f32.mrb[132].mxu0 }
 0x3d6   : > { %v2833_v32 = vpop.f32.mrb[117].mxu1  ;;  %v3003_v17 = vpop.f32.mrb[133].mxu0 }
 0x3d7   : > { %v9699_v34 = vpop.f32.mrb[118].mxu1  ;;  %v9731_v37 = vpop.f32.mrb[134].mxu0 }
 0x3d8   : > { %v2883_v49 = vpack.c.bf16 %v9699_v34, %v9698_v51  ;;  %v2836_v27 = vpop.f32.mrb[119].mxu1  ;;  %v3053_v29 = vpack.c.bf16 %v9731_v37, %v9730_v28  ;;  %v3006_v42 = vpop.f32.mrb[135].mxu0 }
 0x3d9   : > { %v2882_v54 = vpack.c.bf16 %v2836_v27, %v2833_v32  ;;  %v3052_v46 = vpack.c.bf16 %v3006_v42, %v3003_v17 }
 0x3db   : > { %3362 = vmatmul.mubr.bf16.gmra.mrb[132].mxu1 %v2881_v5  ;;  %3459 = vmatmul.mubr.bf16.gmra.mrb[148].mxu0 %v3051_v7 }
 0x3dc   : > { %3369 = vmatprep.mubr.bf16.mxu1 %v11338_v44  ;;  %3466 = vmatprep.mubr.bf16.mxu0 %v11215_v0 }
 0x3dd   : > { %v9702_v9 = vpop.f32.mrb[120].mxu1  ;;  %v9734_v36 = vpop.f32.mrb[136].mxu0 }
 0x3de   : > { %v2849_v50 = vpop.f32.mrb[121].mxu1  ;;  %v3019_v16 = vpop.f32.mrb[137].mxu0 }
 0x3df   : > { %v9703_v21 = vpop.f32.mrb[122].mxu1  ;;  %v9735_v22 = vpop.f32.mrb[138].mxu0 }
 0x3e0   : > { %v2885_v26 = vpack.c.bf16 %v9703_v21, %v9702_v9  ;;  %v2852_v31 = vpop.f32.mrb[123].mxu1  ;;  %v3055_v41 = vpack.c.bf16 %v9735_v22, %v9734_v36  ;;  %v3022_v33 = vpop.f32.mrb[139].mxu0 }
 0x3e1   : > { %v2884_v39 = vpack.c.bf16 %v2852_v31, %v2849_v50  ;;  %v3054_v57 = vpack.c.bf16 %v3022_v33, %v3019_v16 }
 0x3e3   : > { %3370 = vmatmul.mubr.bf16.gmra.mrb[136].mxu1 %v2882_v54  ;;  %3467 = vmatmul.mubr.bf16.gmra.mrb[152].mxu0 %v3052_v46 }
 0x3e4   : > { %3377 = vmatprep.mubr.bf16.mxu1 %v11336_v40  ;;  %3474 = vmatprep.mubr.bf16.mxu0 %v11218_v18  ;;  %v10357_v18 = vld [vmem:[%s12074_s3] sm:$0xff]  }
 0x3e5   : > { %v9706_v44 = vpop.f32.mrb[124].mxu1  ;;  %v9738_v0 = vpop.f32.mrb[140].mxu0 }
 0x3e6   : > { %v2865_v30 = vpop.f32.mrb[125].mxu1  ;;  %v3035_v8 = vpop.f32.mrb[141].mxu0 }
 0x3e7   : > { %v9707_v15 = vpop.f32.mrb[126].mxu1  ;;  %v9739_v53 = vpop.f32.mrb[142].mxu0 }
 0x3e8   : > { %v2887_v58 = vpack.c.bf16 %v9707_v15, %v9706_v44  ;;  %v2868_v60 = vpop.f32.mrb[127].mxu1  ;;  %v3057_v61 = vpack.c.bf16 %v9739_v53, %v9738_v0  ;;  %v3038_v62 = vpop.f32.mrb[143].mxu0 }
 0x3e9   : > { %v2886_v63 = vpack.c.bf16 %v2868_v60, %v2865_v30  ;;  %v3056_v1 = vpack.c.bf16 %v3038_v62, %v3035_v8 }
 0x3eb   : > { %3378 = vmatmul.mubr.bf16.gmra.mrb[140].mxu1 %v2883_v49  ;;  %3475 = vmatmul.mubr.bf16.gmra.mrb[156].mxu0 %v3053_v29 }
 0x3ec   : > { %3385 = vmatprep.mubr.bf16.mxu1 %v11354_v35  ;;  %3482 = vmatprep.mubr.bf16.mxu0 %v11221_v38  ;;  %v10358_v38 = vld [vmem:[%s12074_s3 + $0x20] sm:$0xff]  }
 0x3f3   : > { %3386 = vmatmul.mubr.bf16.gmra.mrb[144].mxu1 %v2884_v39  ;;  %3483 = vmatmul.mubr.bf16.gmra.mrb[160].mxu0 %v3054_v57 }
 0x3f4   : > { %3393 = vmatprep.mubr.bf16.mxu1 %v11352_v45  ;;  %3490 = vmatprep.mubr.bf16.mxu0 %v11224_v52  ;;  %v11445_v45 = vld [vmem:[%s10761_s29] ss:$0 sm:$0xff] }
 0x3fb   : > { %3394 = vmatmul.mubr.bf16.gmra.mrb[148].mxu1 %v2885_v26  ;;  %3491 = vmatmul.mubr.bf16.gmra.mrb[164].mxu0 %v3055_v41 }
 0x3fc   : > { %3401 = vmatprep.mubr.bf16.mxu1 %v11370_v19  ;;  %3498 = vmatprep.mubr.bf16.mxu0 %v11227_v47 }
 0x403   : > { %3402 = vmatmul.mubr.bf16.gmra.mrb[152].mxu1 %v2886_v63  ;;  %3499 = vmatmul.mubr.bf16.gmra.mrb[168].mxu0 %v3056_v1 }
 0x404   : > { %3409 = vmatprep.mubr.bf16.mxu1 %v11368_v14  ;;  %3506 = vmatprep.mubr.bf16.mxu0 %v11230_v12 }
 0x40b   : > { %3410 = vmatmul.mubr.bf16.gmra.mrb[156].mxu1 %v2887_v58  ;;  %3507 = vmatmul.mubr.bf16.gmra.mrb[172].mxu0 %v3057_v61 }
 0x40c   : > { %9756 = vmatprep.mubr.bf16.mxu1 %v10357_v18  ;;  %9780 = vmatprep.mubr.bf16.mxu0 %v10358_v38 }
 0x4a6   : > { %v9019_v52 = vpop.f32.mrb[128].mxu1  ;;  %v9083_v40 = vpop.f32.mrb[144].mxu0 }
 0x4a7   : > { %v9020_v35 = vpop.f32.mrb[129].mxu1  ;;  %v9084_v19 = vpop.f32.mrb[145].mxu0 }
 0x4a8   : > { %v9021_v2 = vadd.f32 %v9020_v35, %v9019_v52  ;;  %v9085_v47 = vadd.f32 %v9084_v19, %v9083_v40  ;;  %v9022_v3 = vpop.f32.mrb[130].mxu1  ;;  %v9086_v4 = vpop.f32.mrb[146].mxu0 }
 0x4a9   : > { %v9023_v55 = vpop.f32.mrb[131].mxu1  ;;  %v9087_v14 = vpop.f32.mrb[147].mxu0 }
 0x4aa   : > { %v3356_v12 = vadd.f32 %v9021_v2, %v11445_v45  ;;  %v9024_v6 = vadd.f32 %v9023_v55, %v9022_v3  ;;  %v9088_v10 = vadd.f32 %v9087_v14, %v9086_v4 }
 0x4ac   : > { %v3453_v23 = vadd.f32 %v9085_v47, %v3356_v12  ;;  %v3359_v59 = vadd.f32 %v9024_v6, %v11445_v45 }
 0x4ae   : > { %vm3515_vm0 = vcmp.ge.f32.partialorder %v3453_v23, 0.0  ;;  %v3531_v56 = vmul.f32 0.0001, %v3453_v23  ;;  %v3456_v43 = vadd.f32 %v9088_v10, %v3359_v59  ;;  %v9025_v11 = vpop.f32.mrb[132].mxu1  ;;  %v9089_v13 = vpop.f32.mrb[148].mxu0 }
 0x4af   : > { %v9026_v5 = vpop.f32.mrb[133].mxu1  ;;  %v9090_v7 = vpop.f32.mrb[149].mxu0 }
 0x4b0   : > { %vm3516_vm1 = vcmp.ge.f32.partialorder %v3456_v43, 0.0  ;;  %v3532_v20 = vmul.f32 0.0001, %v3456_v43  ;;  %v9027_v48 = vadd.f32 %v9026_v5, %v9025_v11  ;;  %v9028_v24 = vpop.f32.mrb[134].mxu1  ;;  %v9092_v25 = vpop.f32.mrb[150].mxu0  ;;  %v3547_v51 = vsel %vm3515_vm0, %v3453_v23, %v3531_v56 }
 0x4b1   : > { %v9091_v28 = vadd.f32 %v9090_v7, %v9089_v13  ;;  %v9029_v32 = vpop.f32.mrb[135].mxu1  ;;  %v9093_v17 = vpop.f32.mrb[151].mxu0  ;;  %vm4658_vm0 = vcmask 523264  }
 0x4b2   : > { %v3548_v34 = vsel %vm3516_vm1, %v3456_v43, %v3532_v20  ;;  %v3364_v37 = vadd.f32 %v9027_v48, %v11445_v45  ;;  %v9030_v49 = vadd.f32 %v9029_v32, %v9028_v24  ;;  %v9094_v27 = vadd.f32 %v9093_v17, %v9092_v25 }
 0x4b3   : > { %v11450_v29 = vpack.c.bf16 %v3548_v34, %v3547_v51 }
 0x4b4   : > { %v3461_v42 = vadd.f32 %v9091_v28, %v3364_v37  ;;  %v3367_v54 = vadd.f32 %v9030_v49, %v11445_v45 }
 0x4b5   : > { %9740 = vmatprep.subr.bf16.mxu1 %v11450_v29  ;;  %9764 = vmatprep.subr.bf16.mxu0 %v11450_v29 }
 0x4b6   : > { %vm3517_vm2 = vcmp.ge.f32.partialorder %v3461_v42, 0.0  ;;  %v3533_v46 = vmul.f32 0.0001, %v3461_v42  ;;  %v3464_v9 = vadd.f32 %v9094_v27, %v3367_v54  ;;  %v9031_v36 = vpop.f32.mrb[136].mxu1  ;;  %v9095_v50 = vpop.f32.mrb[152].mxu0  ;;  %9741 = vmatpush3.bf16.msra.mxu1 %v11450_v29  ;;  %9765 = vmatpush3.bf16.msra.mxu0 %v11450_v29 }
 0x4b7   : > { %v9032_v16 = vpop.f32.mrb[137].mxu1  ;;  %v9096_v21 = vpop.f32.mrb[153].mxu0 }
 0x4b8   : > { %vm3518_vm3 = vcmp.ge.f32.partialorder %v3464_v9, 0.0  ;;  %v3534_v22 = vmul.f32 0.0001, %v3464_v9  ;;  %v9033_v26 = vadd.f32 %v9032_v16, %v9031_v36  ;;  %v9034_v31 = vpop.f32.mrb[138].mxu1  ;;  %v9098_v41 = vpop.f32.mrb[154].mxu0  ;;  %v3549_v33 = vsel %vm3517_vm2, %v3461_v42, %v3533_v46 }
 0x4b9   : > { %v9097_v39 = vadd.f32 %v9096_v21, %v9095_v50  ;;  %v9035_v57 = vpop.f32.mrb[139].mxu1  ;;  %v9099_v44 = vpop.f32.mrb[155].mxu0 }
 0x4ba   : > { %v3550_v0 = vsel %vm3518_vm3, %v3464_v9, %v3534_v22  ;;  %v3372_v30 = vadd.f32 %v9033_v26, %v11445_v45  ;;  %v9036_v8 = vadd.f32 %v9035_v57, %v9034_v31  ;;  %v9100_v15 = vadd.f32 %v9099_v44, %v9098_v41 }
 0x4bb   : > { %v11458_v53 = vpack.c.bf16 %v3550_v0, %v3549_v33 }
 0x4bc   : > { %v3469_v58 = vadd.f32 %v9097_v39, %v3372_v30  ;;  %v3375_v60 = vadd.f32 %v9036_v8, %v11445_v45 }
 0x4bd   : > { %9742 = vmatprep.subr.bf16.mxu1 %v11458_v53  ;;  %9766 = vmatprep.subr.bf16.mxu0 %v11458_v53 }
 0x4be   : > { %vm3519_vm4 = vcmp.ge.f32.partialorder %v3469_v58, 0.0  ;;  %v3535_v61 = vmul.f32 0.0001, %v3469_v58  ;;  %v3472_v62 = vadd.f32 %v9100_v15, %v3375_v60  ;;  %v9037_v63 = vpop.f32.mrb[140].mxu1  ;;  %v9101_v1 = vpop.f32.mrb[156].mxu0  ;;  %9743 = vmatpush3.bf16.msra.mxu1 %v11458_v53  ;;  %9767 = vmatpush3.bf16.msra.mxu0 %v11458_v53 }
 0x4bf   : > { %v9038_v18 = vpop.f32.mrb[141].mxu1  ;;  %v9102_v38 = vpop.f32.mrb[157].mxu0 }
 0x4c0   : > { %vm3520_vm5 = vcmp.ge.f32.partialorder %v3472_v62, 0.0  ;;  %v3536_v52 = vmul.f32 0.0001, %v3472_v62  ;;  %v9039_v40 = vadd.f32 %v9038_v18, %v9037_v63  ;;  %v9040_v35 = vpop.f32.mrb[142].mxu1  ;;  %v9104_v19 = vpop.f32.mrb[158].mxu0  ;;  %v3551_v2 = vsel %vm3519_vm4, %v3469_v58, %v3535_v61 }
 0x4c1   : > { %v9103_v47 = vadd.f32 %v9102_v38, %v9101_v1  ;;  %v9041_v3 = vpop.f32.mrb[143].mxu1  ;;  %v9105_v4 = vpop.f32.mrb[159].mxu0 }
 0x4c2   : > { %v3552_v55 = vsel %vm3520_vm5, %v3472_v62, %v3536_v52  ;;  %v3380_v14 = vadd.f32 %v9039_v40, %v11445_v45  ;;  %v9042_v12 = vadd.f32 %v9041_v3, %v9040_v35  ;;  %v9106_v6 = vadd.f32 %v9105_v4, %v9104_v19 }
 0x4c3   : > { %v11466_v10 = vpack.c.bf16 %v3552_v55, %v3551_v2 }
 0x4c4   : > { %v3477_v23 = vadd.f32 %v9103_v47, %v3380_v14  ;;  %v3383_v59 = vadd.f32 %v9042_v12, %v11445_v45 }
 0x4c5   : > { %9744 = vmatprep.subr.bf16.mxu1 %v11466_v10  ;;  %9768 = vmatprep.subr.bf16.mxu0 %v11466_v10 }
 0x4c6   : > { %vm3521_vm6 = vcmp.ge.f32.partialorder %v3477_v23, 0.0  ;;  %v3537_v56 = vmul.f32 0.0001, %v3477_v23  ;;  %v3480_v43 = vadd.f32 %v9106_v6, %v3383_v59  ;;  %v9043_v11 = vpop.f32.mrb[144].mxu1  ;;  %v9107_v13 = vpop.f32.mrb[160].mxu0  ;;  %9745 = vmatpush3.bf16.msra.mxu1 %v11466_v10  ;;  %9769 = vmatpush3.bf16.msra.mxu0 %v11466_v10 }
 0x4c7   : > { %v9044_v5 = vpop.f32.mrb[145].mxu1  ;;  %v9108_v7 = vpop.f32.mrb[161].mxu0 }
 0x4c8   : > { %vm3522_vm7 = vcmp.ge.f32.partialorder %v3480_v43, 0.0  ;;  %v3538_v20 = vmul.f32 0.0001, %v3480_v43  ;;  %v9045_v48 = vadd.f32 %v9044_v5, %v9043_v11  ;;  %v9046_v24 = vpop.f32.mrb[146].mxu1  ;;  %v9110_v25 = vpop.f32.mrb[162].mxu0  ;;  %v3553_v51 = vsel %vm3521_vm6, %v3477_v23, %v3537_v56 }
 0x4c9   : > { %v9109_v28 = vadd.f32 %v9108_v7, %v9107_v13  ;;  %v9047_v32 = vpop.f32.mrb[147].mxu1  ;;  %v9111_v17 = vpop.f32.mrb[163].mxu0 }
 0x4ca   : > { %v3554_v34 = vsel %vm3522_vm7, %v3480_v43, %v3538_v20  ;;  %v3388_v37 = vadd.f32 %v9045_v48, %v11445_v45  ;;  %v9048_v49 = vadd.f32 %v9047_v32, %v9046_v24  ;;  %v9112_v27 = vadd.f32 %v9111_v17, %v9110_v25 }
 0x4cb   : > { %v11474_v42 = vpack.c.bf16 %v3554_v34, %v3553_v51 }
 0x4cc   : > { %v3485_v54 = vadd.f32 %v9109_v28, %v3388_v37  ;;  %v3391_v46 = vadd.f32 %v9048_v49, %v11445_v45 }
 0x4cd   : > { %9746 = vmatprep.subr.bf16.mxu1 %v11474_v42  ;;  %9770 = vmatprep.subr.bf16.mxu0 %v11474_v42 }
 0x4ce   : > { %vm3523_vm8 = vcmp.ge.f32.partialorder %v3485_v54, 0.0  ;;  %v3539_v9 = vmul.f32 0.0001, %v3485_v54  ;;  %v3488_v36 = vadd.f32 %v9112_v27, %v3391_v46  ;;  %v9049_v50 = vpop.f32.mrb[148].mxu1  ;;  %v9113_v16 = vpop.f32.mrb[164].mxu0  ;;  %9747 = vmatpush3.bf16.msra.mxu1 %v11474_v42  ;;  %9771 = vmatpush3.bf16.msra.mxu0 %v11474_v42 }
 0x4cf   : > { %v9050_v21 = vpop.f32.mrb[149].mxu1  ;;  %v9114_v22 = vpop.f32.mrb[165].mxu0 }
 0x4d0   : > { %vm3524_vm9 = vcmp.ge.f32.partialorder %v3488_v36, 0.0  ;;  %v3540_v26 = vmul.f32 0.0001, %v3488_v36  ;;  %v9051_v31 = vadd.f32 %v9050_v21, %v9049_v50  ;;  %v9052_v41 = vpop.f32.mrb[150].mxu1  ;;  %v9116_v33 = vpop.f32.mrb[166].mxu0  ;;  %v3555_v39 = vsel %vm3523_vm8, %v3485_v54, %v3539_v9 }
 0x4d1   : > { %v9115_v57 = vadd.f32 %v9114_v22, %v9113_v16  ;;  %v9053_v44 = vpop.f32.mrb[151].mxu1  ;;  %v9117_v0 = vpop.f32.mrb[167].mxu0 }
 0x4d2   : > { %v3556_v30 = vsel %vm3524_vm9, %v3488_v36, %v3540_v26  ;;  %v3396_v8 = vadd.f32 %v9051_v31, %v11445_v45  ;;  %v9054_v15 = vadd.f32 %v9053_v44, %v9052_v41  ;;  %v9118_v58 = vadd.f32 %v9117_v0, %v9116_v33  ;;  %v10362_v44 = vld [vmem:[%s12074_s3 + $0x10] sm:$0xff]   ;;  %v10363_v0 = vld [vmem:[%s12074_s3 + $0x38] sm:$0xff]  }
 0x4d3   : > { %v11482_v60 = vpack.c.bf16 %v3556_v30, %v3555_v39  ;;  %v10360_v39 = vld [vmem:[%s12074_s3 + $0x28] sm:$0xff]   ;;  %v10364_v30 = vld [vmem:[%s12074_s3 + $0x18] sm:$0xff]  }
 0x4d4   : > { %v3493_v61 = vadd.f32 %v9115_v57, %v3396_v8  ;;  %v3399_v62 = vadd.f32 %v9054_v15, %v11445_v45  ;;  %v10361_v57 = vld [vmem:[%s12074_s3 + $0x30] sm:$0xff]   ;;  %v10365_v8 = vld [vmem:[%s12074_s3 + $0x40] sm:$0xff]  }
 0x4d5   : > { %9748 = vmatprep.subr.bf16.mxu1 %v11482_v60  ;;  %9772 = vmatprep.subr.bf16.mxu0 %v11482_v60  ;;  %v10366_v15 = vld [vmem:[%s12074_s3 + $0x60] sm:$0xff]  }
 0x4d6   : > { %vm3525_vm10 = vcmp.ge.f32.partialorder %v3493_v61, 0.0  ;;  %v3541_v63 = vmul.f32 0.0001, %v3493_v61  ;;  %v3496_v1 = vadd.f32 %v9118_v58, %v3399_v62  ;;  %v9055_v18 = vpop.f32.mrb[152].mxu1  ;;  %v9119_v38 = vpop.f32.mrb[168].mxu0  ;;  %9749 = vmatpush3.bf16.msra.mxu1 %v11482_v60  ;;  %9773 = vmatpush3.bf16.msra.mxu0 %v11482_v60  ;;  %v10377_v58 = vld [vmem:[%s12072_s8 + $0x40] sm:$0xff]  }
 0x4d7   : > { %v9056_v52 = vpop.f32.mrb[153].mxu1  ;;  %v9120_v40 = vpop.f32.mrb[169].mxu0  ;;  %v10368_v62 = vld [vmem:[%s12074_s3 + $0x68] sm:$0xff]  }
 0x4d8   : > { %vm3526_vm11 = vcmp.ge.f32.partialorder %v3496_v1, 0.0  ;;  %v3542_v35 = vmul.f32 0.0001, %v3496_v1  ;;  %v9057_v19 = vadd.f32 %v9056_v52, %v9055_v18  ;;  %v9058_v2 = vpop.f32.mrb[154].mxu1  ;;  %v9122_v47 = vpop.f32.mrb[170].mxu0  ;;  %v3557_v3 = vsel %vm3525_vm10, %v3493_v61, %v3541_v63  ;;  %v10367_v61 = vld [vmem:[%s12074_s3 + $0x48] sm:$0xff]  }
 0x4d9   : > { %v9121_v4 = vadd.f32 %v9120_v40, %v9119_v38  ;;  %v9059_v55 = vpop.f32.mrb[155].mxu1  ;;  %v9123_v14 = vpop.f32.mrb[171].mxu0  ;;  %v10369_v63 = vld [vmem:[%s12074_s3 + $0x70] sm:$0xff]   ;;  %v10378_v18 = vld [vmem:[%s12072_s8] sm:$0xff]   ;;  %v10379_v38 = vld [vmem:[%s12072_s8 + $0x48] sm:$0xff]  }
 0x4da   : > { %v3558_v12 = vsel %vm3526_vm11, %v3496_v1, %v3542_v35  ;;  %v3404_v6 = vadd.f32 %v9057_v19, %v11445_v45  ;;  %v9060_v23 = vadd.f32 %v9059_v55, %v9058_v2  ;;  %v9124_v59 = vadd.f32 %v9123_v14, %v9122_v47  ;;  %v10370_v1 = vld [vmem:[%s12074_s3 + $0x50] sm:$0xff]   ;;  %v10380_v52 = vld [vmem:[%s12072_s8 + $0x8] sm:$0xff]   ;;  %v10371_v40 = vld [vmem:[%s12074_s3 + $0x78] sm:$0xff]  }
 0x4db   : > { %v11490_v56 = vpack.c.bf16 %v3558_v12, %v3557_v3  ;;  %v10372_v35 = vld [vmem:[%s12074_s3 + $0x58] sm:$0xff]   ;;  %v10373_v19 = vld [vmem:[%s12074_s3 + $0x80] sm:$0xff]   ;;  %v10381_v2 = vld [vmem:[%s12072_s8 + $0x50] sm:$0xff]  }
 0x4dc   : > { %v3501_v43 = vadd.f32 %v9121_v4, %v3404_v6  ;;  %v3407_v11 = vadd.f32 %v9060_v23, %v11445_v45  ;;  %v10383_v47 = vld [vmem:[%s12072_s8 + $0x58] sm:$0xff]   ;;  %v10385_v3 = vld [vmem:[%s12072_s8 + $0x60] sm:$0xff]   ;;  %v10388_v55 = vld [vmem:[%s12072_s8 + $0x28] sm:$0xff]  }
 0x4dd   : > { %9750 = vmatprep.subr.bf16.mxu1 %v11490_v56  ;;  %9774 = vmatprep.subr.bf16.mxu0 %v11490_v56  ;;  %v10386_v4 = vld [vmem:[%s12072_s8 + $0x20] sm:$0xff]   ;;  %v10389_v14 = vld [vmem:[%s12072_s8 + $0x70] sm:$0xff]   ;;  %v10376_v12 = vld [vmem:[%s12074_s3 + $0x98] sm:$0xff]  }
 0x4de   : > { %vm3527_vm12 = vcmp.ge.f32.partialorder %v3501_v43, 0.0  ;;  %v3543_v13 = vmul.f32 0.0001, %v3501_v43  ;;  %v3504_v5 = vadd.f32 %v9124_v59, %v3407_v11  ;;  %v9061_v7 = vpop.f32.mrb[156].mxu1  ;;  %v9125_v20 = vpop.f32.mrb[172].mxu0  ;;  %9751 = vmatpush3.bf16.msra.mxu1 %v11490_v56  ;;  %9775 = vmatpush3.bf16.msra.mxu0 %v11490_v56  ;;  %v10390_v6 = vld [vmem:[%s12072_s8 + $0x30] sm:$0xff]  }
 0x4df   : > { %v9062_v48 = vpop.f32.mrb[157].mxu1  ;;  %v9126_v24 = vpop.f32.mrb[173].mxu0  ;;  %v10391_v23 = vld [vmem:[%s12072_s8 + $0x78] sm:$0xff]   ;;  %v10395_v11 = vld [vmem:[%s12072_s8 + $0xc8] sm:$0xff]  }
 0x4e0   : > { %vm3528_vm13 = vcmp.ge.f32.partialorder %v3504_v5, 0.0  ;;  %v3544_v25 = vmul.f32 0.0001, %v3504_v5  ;;  %v9063_v51 = vadd.f32 %v9062_v48, %v9061_v7  ;;  %v9064_v28 = vpop.f32.mrb[158].mxu1  ;;  %v9128_v32 = vpop.f32.mrb[174].mxu0  ;;  %v3559_v17 = vsel %vm3527_vm12, %v3501_v43, %v3543_v13  ;;  %v10392_v59 = vld [vmem:[%s12072_s8 + $0x38] sm:$0xff]  }
 0x4e1   : > { %v9127_v34 = vadd.f32 %v9126_v24, %v9125_v20  ;;  %v9065_v37 = vpop.f32.mrb[159].mxu1  ;;  %v9129_v49 = vpop.f32.mrb[175].mxu0  ;;  %v10394_v43 = vld [vmem:[%s12072_s8 + $0x80] sm:$0xff]   ;;  %v10396_v13 = vld [vmem:[%s12072_s8 + $0x88] sm:$0xff]   ;;  %v10398_v7 = vld [vmem:[%s12072_s8 + $0x90] sm:$0xff]  }
 0x4e2   : > { %v3560_v27 = vsel %vm3528_vm13, %v3504_v5, %v3544_v25  ;;  %v3412_v54 = vadd.f32 %v9063_v51, %v11445_v45  ;;  %v9066_v46 = vadd.f32 %v9065_v37, %v9064_v28  ;;  %v9130_v9 = vadd.f32 %v9129_v49, %v9128_v32  ;;  %v10397_v5 = vld [vmem:[%s12072_s8 + $0xd0] sm:$0xff]   ;;  %v10399_v20 = vld [vmem:[%s12072_s8 + $0xd8] sm:$0xff]   ;;  %v10401_v24 = vld [vmem:[%s12072_s8 + $0xe0] sm:$0xff]  }
 0x4e3   : > { %v11498_v36 = vpack.c.bf16 %v3560_v27, %v3559_v17  ;;  %v10400_v48 = vld [vmem:[%s12072_s8 + $0x98] sm:$0xff]   ;;  %v10402_v25 = vld [vmem:[%s12072_s8 + $0xa0] sm:$0xff]   ;;  %v10403_v51 = vld [vmem:[%s12072_s8 + $0xe8] sm:$0xff]  }
 0x4e4   : > { %v3509_v50 = vadd.f32 %v9127_v34, %v3412_v54  ;;  %v3415_v16 = vadd.f32 %v9066_v46, %v11445_v45  ;;  %v10359_v45 = vld [vmem:[%s12074_s3 + $0x8] sm:$0xff]   ;;  %v10405_v32 = vld [vmem:[%s12072_s8 + $0xf0] sm:$0xff]   ;;  %v10407_v34 = vld [vmem:[%s12072_s8 + $0xf8] sm:$0xff]  }
 0x4e5   : > { %9752 = vmatprep.subr.bf16.mxu1 %v11498_v36  ;;  %9776 = vmatprep.subr.bf16.mxu0 %v11498_v36  ;;  %v10404_v28 = vld [vmem:[%s12072_s8 + $0xa8] sm:$0xff]   ;;  %v10406_v17 = vld [vmem:[%s12072_s8 + $0xb0] sm:$0xff]   ;;  %v10408_v37 = vld [vmem:[%s12072_s8 + $0xb8] sm:$0xff]  }
 0x4e6   : > { %v3545_v21 = vmul.f32 0.0001, %v3509_v50  ;;  %v3512_v22 = vadd.f32 %v9130_v9, %v3415_v16  ;;  %9753 = vmatpush3.bf16.msra.mxu1 %v11498_v36  ;;  %9777 = vmatpush3.bf16.msra.mxu0 %v11498_v36  ;;  %vm3529_vm14 = vcmp.ge.f32.partialorder %v3509_v50, 0.0  ;;  %v10409_v49 = vld [vmem:[%s12072_s8 + $0x100] sm:$0xff]  }
 0x4e8   : > { %vm3530_vm15 = vcmp.ge.f32.partialorder %v3512_v22, 0.0  ;;  %v3546_v26 = vmul.f32 0.0001, %v3512_v22  ;;  %v3561_v31 = vsel %vm3529_vm14, %v3509_v50, %v3545_v21 }
 0x4ea   : > { %v3562_v41 = vsel %vm3530_vm15, %v3512_v22, %v3546_v26 }
 0x4eb   : > { %v11505_v33 = vpack.c.bf16 %v3562_v41, %v3561_v31 }
 0x4ed   : > { %9754 = vmatprep.subr.bf16.mxu1 %v11505_v33  ;;  %9778 = vmatprep.subr.bf16.mxu0 %v11505_v33 }
 0x4ee   : > { %9755 = vmatpush3.bf16.msra.mxu1 %v11505_v33  ;;  %9779 = vmatpush3.bf16.msra.mxu0 %v11505_v33 }
 0x4ef   : > { %9788 = vmatprep.subr.bf16.mxu1 %v11450_v29  ;;  %9812 = vmatprep.subr.bf16.mxu0 %v11450_v29 }
 0x4f1   : > { %9757 = vmatmul.mubr.bf16.vlgmr.msra.gmra.mrb[160].mxu1 %v10359_v45  ;;  %9781 = vmatmul.mubr.bf16.vlgmr.msra.gmra.mrb[176].mxu0 %v10360_v39 }
 0x4f2   : > { %9789 = vmatpush3.bf16.msra.mxu1 %v11450_v29  ;;  %9813 = vmatpush3.bf16.msra.mxu0 %v11450_v29 }
 0x4f3   : > { %9790 = vmatprep.subr.bf16.mxu1 %v11458_v53  ;;  %9814 = vmatprep.subr.bf16.mxu0 %v11458_v53 }
 0x4f4   : > { %9784 = vmatprep.mubr.bf16.mxu0 %v10361_v57  ;;  %9760 = vmatprep.mubr.bf16.mxu1 %v10362_v44 }
 0x4f6   : > { %9791 = vmatpush3.bf16.msra.mxu1 %v11458_v53  ;;  %9815 = vmatpush3.bf16.msra.mxu0 %v11458_v53 }
 0x4f7   : > { %9792 = vmatprep.subr.bf16.mxu1 %v11466_v10  ;;  %9816 = vmatprep.subr.bf16.mxu0 %v11466_v10 }
 0x4f9   : > { %9785 = vmatmul.mubr.bf16.gmra.mrb[180].mxu0 %v10363_v0  ;;  %9761 = vmatmul.mubr.bf16.gmra.mrb[164].mxu1 %v10364_v30 }
 0x4fa   : > { %9793 = vmatpush3.bf16.msra.mxu1 %v11466_v10  ;;  %9817 = vmatpush3.bf16.msra.mxu0 %v11466_v10 }
 0x4fb   : > { %9794 = vmatprep.subr.bf16.mxu1 %v11474_v42  ;;  %9818 = vmatprep.subr.bf16.mxu0 %v11474_v42 }
 0x4fc   : > { %9804 = vmatprep.mubr.bf16.mxu1 %v10365_v8  ;;  %9828 = vmatprep.mubr.bf16.mxu0 %v10366_v15 }
 0x4fe   : > { %9795 = vmatpush3.bf16.msra.mxu1 %v11474_v42  ;;  %9819 = vmatpush3.bf16.msra.mxu0 %v11474_v42 }
 0x4ff   : > { %9796 = vmatprep.subr.bf16.mxu1 %v11482_v60  ;;  %9820 = vmatprep.subr.bf16.mxu0 %v11482_v60 }
 0x502   : > { %9797 = vmatpush3.bf16.msra.mxu1 %v11482_v60  ;;  %9821 = vmatpush3.bf16.msra.mxu0 %v11482_v60 }
 0x503   : > { %9798 = vmatprep.subr.bf16.mxu1 %v11490_v56  ;;  %9822 = vmatprep.subr.bf16.mxu0 %v11490_v56 }
 0x506   : > { %9799 = vmatpush3.bf16.msra.mxu1 %v11490_v56  ;;  %9823 = vmatpush3.bf16.msra.mxu0 %v11490_v56 }
 0x507   : > { %9800 = vmatprep.subr.bf16.mxu1 %v11498_v36  ;;  %9824 = vmatprep.subr.bf16.mxu0 %v11498_v36 }
 0x50a   : > { %9801 = vmatpush3.bf16.msra.mxu1 %v11498_v36  ;;  %9825 = vmatpush3.bf16.msra.mxu0 %v11498_v36 }
 0x50b   : > { %9802 = vmatprep.subr.bf16.mxu1 %v11505_v33  ;;  %9826 = vmatprep.subr.bf16.mxu0 %v11505_v33 }
 0x50e   : > { %9803 = vmatpush3.bf16.msra.mxu1 %v11505_v33  ;;  %9827 = vmatpush3.bf16.msra.mxu0 %v11505_v33 }
 0x50f   : > { %9836 = vmatprep.subr.bf16.mxu1 %v11450_v29  ;;  %9191 = vmatprep.subr.bf16.mxu0 %v10377_v58 }
 0x511   : > { %9805 = vmatmul.mubr.bf16.vlgmr.msra.gmra.mrb[168].mxu1 %v10367_v61  ;;  %9829 = vmatmul.mubr.bf16.vlgmr.msra.gmra.mrb[184].mxu0 %v10368_v62 }
 0x512   : > { %9837 = vmatpush3.bf16.msra.mxu1 %v11450_v29  ;;  %9832 = vmatprep.mubr.bf16.mxu0 %v10369_v63  ;;  %v10382_v29 = vld [vmem:[%s12072_s8 + $0x10] sm:$0xff]  }
 0x513   : > { %9838 = vmatprep.subr.bf16.mxu1 %v11458_v53  ;;  %9808 = vmatprep.mubr.bf16.mxu1 %v10370_v1 }
 0x514   : > { %9192 = vmatpush3.bf16.msra.mxu0 %v10378_v18 }
 0x515   : > { %9193 = vmatprep.subr.bf16.mxu0 %v10379_v38 }
 0x516   : > { %9839 = vmatpush3.bf16.msra.mxu1 %v11458_v53  ;;  %v10384_v53 = vld [vmem:[%s12072_s8 + $0x18] sm:$0xff]  }
 0x517   : > { %9840 = vmatprep.subr.bf16.mxu1 %v11466_v10 }
 0x518   : > { %9194 = vmatpush3.bf16.msra.mxu0 %v10380_v52 }
 0x519   : > { %9833 = vmatmul.mubr.bf16.gmra.mrb[188].mxu0 %v10371_v40  ;;  %9809 = vmatmul.mubr.bf16.gmra.mrb[172].mxu1 %v10372_v35 }
 0x51a   : > { %9841 = vmatpush3.bf16.msra.mxu1 %v11466_v10  ;;  %9852 = vmatprep.mubr.bf16.mxu1 %v10373_v19  ;;  %v10387_v10 = vld [vmem:[%s12072_s8 + $0x68] sm:$0xff]  }
 0x51b   : > { %9842 = vmatprep.subr.bf16.mxu1 %v11474_v42  ;;  %9195 = vmatprep.subr.bf16.mxu0 %v10381_v2 }
 0x51c   : > { %9196 = vmatpush3.bf16.msra.mxu0 %v10382_v29 }
 0x51d   : > { %9197 = vmatprep.subr.bf16.mxu0 %v10383_v47 }
 0x51e   : > { %9843 = vmatpush3.bf16.msra.mxu1 %v11474_v42  ;;  %v10374_v42 = vld [vmem:[%s12074_s3 + $0x88] sm:$0xff]  }
 0x51f   : > { %9844 = vmatprep.subr.bf16.mxu1 %v11482_v60 }
 0x520   : > { %9198 = vmatpush3.bf16.msra.mxu0 %v10384_v53 }
 0x521   : > { %9199 = vmatprep.subr.bf16.mxu0 %v10385_v3  ;;  %v10410_v3 = vld [vmem:[%s12072_s8 + $0x108] sm:$0xff]  }
 0x522   : > { %9845 = vmatpush3.bf16.msra.mxu1 %v11482_v60  ;;  %v10375_v60 = vld [vmem:[%s12074_s3 + $0x90] sm:$0xff]   ;;  %s12084_s3 = sld [smem:[#allocation16_spill]] }
 0x523   : > { %9846 = vmatprep.subr.bf16.mxu1 %v11490_v56 }
 0x524   : > { %9200 = vmatpush3.bf16.msra.mxu0 %v10386_v4 }
 0x525   : > { %9201 = vmatprep.subr.bf16.mxu0 %v10387_v10 }
 0x526   : > { %9847 = vmatpush3.bf16.msra.mxu1 %v11490_v56  ;;  %v10393_v56 = vld [vmem:[%s12072_s8 + $0xc0] sm:$0xff]  }
 0x527   : > { %9848 = vmatprep.subr.bf16.mxu1 %v11498_v36 }
 0x528   : > { %9202 = vmatpush3.bf16.msra.mxu0 %v10388_v55 }
 0x529   : > { %9203 = vmatprep.subr.bf16.mxu0 %v10389_v14 }
 0x52a   : > { %9849 = vmatpush3.bf16.msra.mxu1 %v11498_v36 }
 0x52b   : > { %9850 = vmatprep.subr.bf16.mxu1 %v11505_v33 }
 0x52c   : > { %9204 = vmatpush3.bf16.msra.mxu0 %v10390_v6 }
 0x52d   : > { %9205 = vmatprep.subr.bf16.mxu0 %v10391_v23 }
 0x52e   : > { %9851 = vmatpush3.bf16.msra.mxu1 %v11505_v33 }
 0x52f   : > { %9231 = vmatprep.subr.bf16.mxu1 %v10393_v56 }
 0x530   : > { %9206 = vmatpush3.bf16.msra.mxu0 %v10392_v59 }
 0x531   : > { %9853 = vmatmul.mubr.bf16.vlgmr.msra.gmra.mrb[176].mxu1 %v10374_v42  ;;  %v10411_v42 = vld [vmem:[%s12072_s8 + $0x110] sm:$0xff]  }
 0x532   : > { %9856 = vmatprep.mubr.bf16.mxu1 %v10375_v60  ;;  %9232 = vmatpush3.bf16.msra.mxu1 %v10394_v43 }
 0x533   : > { %9233 = vmatprep.subr.bf16.mxu1 %v10395_v11 }
 0x536   : > { %9234 = vmatpush3.bf16.msra.mxu1 %v10396_v13  ;;  %v10412_v13 = vld [vmem:[%s12072_s8 + $0x118] sm:$0xff]  }
 0x537   : > { %9235 = vmatprep.subr.bf16.mxu1 %v10397_v5  ;;  %v10413_v5 = vld [vmem:[%s12072_s8 + $0x120] sm:$0xff]  }
 0x539   : > { %9857 = vmatmul.mubr.bf16.gmra.mrb[180].mxu1 %v10376_v12 }
 0x53a   : > { %9236 = vmatpush3.bf16.msra.mxu1 %v10398_v7  ;;  %v10414_v7 = vld [vmem:[%s12072_s8 + $0x128] sm:$0xff]  }
 0x53b   : > { %9237 = vmatprep.subr.bf16.mxu1 %v10399_v20  ;;  %v10415_v20 = vld [vmem:[%s12072_s8 + $0x130] sm:$0xff]  }
 0x53e   : > { %9238 = vmatpush3.bf16.msra.mxu1 %v10400_v48  ;;  %v10416_v48 = vld [vmem:[%s12072_s8 + $0x138] sm:$0xff]  }
 0x53f   : > { %9239 = vmatprep.subr.bf16.mxu1 %v10401_v24 }
 0x542   : > { %9240 = vmatpush3.bf16.msra.mxu1 %v10402_v25 }
 0x543   : > { %9241 = vmatprep.subr.bf16.mxu1 %v10403_v51 }
 0x546   : > { %9242 = vmatpush3.bf16.msra.mxu1 %v10404_v28 }
 0x547   : > { %9243 = vmatprep.subr.bf16.mxu1 %v10405_v32 }
 0x54a   : > { %9244 = vmatpush3.bf16.msra.mxu1 %v10406_v17 }
 0x54b   : > { %9245 = vmatprep.subr.bf16.mxu1 %v10407_v34 }
 0x54e   : > { %9246 = vmatpush3.bf16.msra.mxu1 %v10408_v37 }
 0x54f   : > { %9860 = vmatprep.subr.bf16.mxu1 %v10409_v49 }
 0x5c4   : > { %v9758_v27 = vpop.f32.mrb[160].mxu1  ;;  %v9782_v54 = vpop.f32.mrb[176].mxu0 }
 0x5c5   : > { %v3637_v46 = vpop.f32.mrb[161].mxu1  ;;  %v3739_v9 = vpop.f32.mrb[177].mxu0 }
 0x5c6   : > { %v9759_v36 = vpop.f32.mrb[162].mxu1  ;;  %v9783_v50 = vpop.f32.mrb[178].mxu0 }
 0x5c7   : > { %v3669_v16 = vpack.c.bf16 %v9759_v36, %v9758_v27  ;;  %v3771_v21 = vpack.c.bf16 %v9783_v50, %v9782_v54  ;;  %v3640_v22 = vpop.f32.mrb[163].mxu1  ;;  %v3742_v26 = vpop.f32.mrb[179].mxu0  ;;  %v10418_v36 = vld [vmem:[%s10781_s19 + $0x20] sm:$0xff]  }
 0x5c8   : > { %v3668_v31 = vpack.c.bf16 %v3640_v22, %v3637_v46  ;;  %v3770_v41 = vpack.c.bf16 %v3742_v26, %v3739_v9  ;;  %v10417_v9 = vld [vmem:[%s10781_s19] sm:$0xff]  }
 0x5ca   : > { %4439 = vmatprep.mubr.bf16.mxu0 %v3770_v41 }
 0x5cb   : > { %4440 = vmatmul.mubr.bf16.vlgmr.msra.gmra.mrb[192].mxu0 %v3668_v31 }
 0x5cc   : > { %4447 = vmatprep.mubr.bf16.mxu0 %v3771_v21  ;;  %v9786_v33 = vpop.f32.mrb[180].mxu0  ;;  %v9762_v45 = vpop.f32.mrb[164].mxu1 }
 0x5cd   : > { %v3755_v39 = vpop.f32.mrb[181].mxu0  ;;  %v3653_v57 = vpop.f32.mrb[165].mxu1 }
 0x5ce   : > { %v9787_v44 = vpop.f32.mrb[182].mxu0  ;;  %v9763_v0 = vpop.f32.mrb[166].mxu1 }
 0x5cf   : > { %v3773_v30 = vpack.c.bf16 %v9787_v44, %v9786_v33  ;;  %v3671_v8 = vpack.c.bf16 %v9763_v0, %v9762_v45  ;;  %v3758_v15 = vpop.f32.mrb[183].mxu0  ;;  %v3656_v58 = vpop.f32.mrb[167].mxu1 }
 0x5d0   : > { %v3772_v61 = vpack.c.bf16 %v3758_v15, %v3755_v39  ;;  %v3670_v62 = vpack.c.bf16 %v3656_v58, %v3653_v57 }
 0x5d3   : > { %4448 = vmatmul.mubr.bf16.gmra.mrb[196].mxu0 %v3669_v16 }
 0x5d4   : > { %4455 = vmatprep.mubr.bf16.mxu0 %v3772_v61 }
 0x5db   : > { %4456 = vmatmul.mubr.bf16.gmra.mrb[200].mxu0 %v3670_v62 }
 0x5dc   : > { %4463 = vmatprep.mubr.bf16.mxu0 %v3773_v30 }
 0x5e3   : > { %4464 = vmatmul.mubr.bf16.gmra.mrb[204].mxu0 %v3671_v8 }
 0x5e4   : > { %v9806_v63 = vpop.f32.mrb[168].mxu1  ;;  %v9830_v1 = vpop.f32.mrb[184].mxu0  ;;  %9908 = vmatprep.mubr.msk.bf16.mxu0 %vm4658_vm0, %v10418_v36 }
 0x5e5   : > { %v3841_v18 = vpop.f32.mrb[169].mxu1  ;;  %v3943_v38 = vpop.f32.mrb[185].mxu0 }
 0x5e6   : > { %v9807_v52 = vpop.f32.mrb[170].mxu1  ;;  %v9831_v40 = vpop.f32.mrb[186].mxu0 }
 0x5e7   : > { %v11610_v35 = vpack.c.bf16 %v9807_v52, %v9806_v63  ;;  %v3975_v19 = vpack.c.bf16 %v9831_v40, %v9830_v1  ;;  %v3844_v2 = vpop.f32.mrb[171].mxu1  ;;  %v3946_v29 = vpop.f32.mrb[187].mxu0  ;;  %v8195_v40 = vld [vmem:[%s10776_s14] ss:$0 sm:$0xff] }
 0x5e8   : > { %v11612_v47 = vpack.c.bf16 %v3844_v2, %v3841_v18  ;;  %v3974_v53 = vpack.c.bf16 %v3946_v29, %v3943_v38 }
 0x5ea   : > { %4504 = vmatprep.mubr.bf16.mxu1 %v3974_v53 }
 0x5eb   : > { %4505 = vmatmul.mubr.bf16.vlgmr.msra.gmra.mrb[184].mxu1 %v11612_v47 }
 0x5ec   : > { %4512 = vmatprep.mubr.bf16.mxu1 %v3975_v19  ;;  %9861 = vmatpush3.bf16.msra.mxu1 %v10409_v49  ;;  %v9834_v4 = vpop.f32.mrb[188].mxu0  ;;  %v9810_v10 = vpop.f32.mrb[172].mxu1 }
 0x5ed   : > { %9862 = vmatprep.subr.bf16.mxu1 %v10410_v3  ;;  %v3959_v55 = vpop.f32.mrb[189].mxu0  ;;  %v3857_v14 = vpop.f32.mrb[173].mxu1 }
 0x5ee   : > { %v9835_v60 = vpop.f32.mrb[190].mxu0  ;;  %v9811_v12 = vpop.f32.mrb[174].mxu1 }
 0x5ef   : > { %v3977_v6 = vpack.c.bf16 %v9835_v60, %v9834_v4  ;;  %v11617_v23 = vpack.c.bf16 %v9811_v12, %v9810_v10  ;;  %v3962_v59 = vpop.f32.mrb[191].mxu0  ;;  %v3860_v56 = vpop.f32.mrb[175].mxu1 }
 0x5f0   : > { %9863 = vmatpush3.bf16.msra.mxu1 %v10410_v3  ;;  %v3976_v43 = vpack.c.bf16 %v3962_v59, %v3959_v55  ;;  %v11619_v11 = vpack.c.bf16 %v3860_v56, %v3857_v14 }
 0x5f1   : > { %9864 = vmatprep.subr.bf16.mxu1 %v10411_v42 }
 0x5f3   : > { %4513 = vmatmul.mubr.bf16.gmra.mrb[188].mxu1 %v11610_v35 }
 0x5f4   : > { %9865 = vmatpush3.bf16.msra.mxu1 %v10411_v42  ;;  %4520 = vmatprep.mubr.bf16.mxu1 %v3976_v43 }
 0x5f5   : > { %9866 = vmatprep.subr.bf16.mxu1 %v10412_v13 }
 0x5f8   : > { %9867 = vmatpush3.bf16.msra.mxu1 %v10412_v13 }
 0x5f9   : > { %9868 = vmatprep.subr.bf16.mxu1 %v10413_v5 }
 0x5fb   : > { %4521 = vmatmul.mubr.bf16.gmra.mrb[192].mxu1 %v11619_v11 }
 0x5fc   : > { %4528 = vmatprep.mubr.bf16.mxu1 %v3977_v6  ;;  %9869 = vmatpush3.bf16.msra.mxu1 %v10413_v5 }
 0x5fd   : > { %9870 = vmatprep.subr.bf16.mxu1 %v10414_v7 }
 0x600   : > { %9871 = vmatpush3.bf16.msra.mxu1 %v10414_v7 }
 0x601   : > { %9872 = vmatprep.subr.bf16.mxu1 %v10415_v20 }
 0x603   : > { %4529 = vmatmul.mubr.bf16.gmra.mrb[196].mxu1 %v11617_v23 }
 0x604   : > { %v9854_v24 = vpop.f32.mrb[176].mxu1  ;;  %9873 = vmatpush3.bf16.msra.mxu1 %v10415_v20 }
 0x605   : > { %v4045_v25 = vpop.f32.mrb[177].mxu1  ;;  %9874 = vmatprep.subr.bf16.mxu1 %v10416_v48 }
 0x606   : > { %v9855_v51 = vpop.f32.mrb[178].mxu1 }
 0x607   : > { %v4077_v28 = vpack.c.bf16 %v9855_v51, %v9854_v24  ;;  %v4048_v32 = vpop.f32.mrb[179].mxu1 }
 0x608   : > { %v4076_v17 = vpack.c.bf16 %v4048_v32, %v4045_v25  ;;  %9875 = vmatpush3.bf16.msra.mxu1 %v10416_v48 }
 0x60a   : > { %9876 = vmatprep.mubr.bf16.mxu1 %v4076_v17 }
 0x60b   : > { %9877 = vmatmul.mubr.bf16.vlgmr.msra.gmra.mrb[200].mxu1 %v4077_v28 }
 0x60c   : > { %v9858_v34 = vpop.f32.mrb[180].mxu1 }
 0x60d   : > { %v4061_v37 = vpop.f32.mrb[181].mxu1 }
 0x60e   : > { %v9859_v49 = vpop.f32.mrb[182].mxu1 }
 0x60f   : > { %v4079_v27 = vpack.c.bf16 %v9859_v49, %v9858_v34  ;;  %v4064_v54 = vpop.f32.mrb[183].mxu1 }
 0x610   : > { %v4078_v46 = vpack.c.bf16 %v4064_v54, %v4061_v37 }
 0x612   : > { %9880 = vmatprep.mubr.bf16.mxu1 %v4078_v46 }
 0x613   : > { %9881 = vmatmul.mubr.bf16.gmra.mrb[204].mxu1 %v4079_v27 }
 0x614   : > { %9892 = vmatprep.mubr.msk.bf16.mxu1 %vm4658_vm0, %v10417_v9 }
 0x69e   : > { %v9207_v50 = vpop.f32.mrb[192].mxu0 }
 0x69f   : > { %v9208_v16 = vpop.f32.mrb[193].mxu0 }
 0x6a0   : > { %v9209_v21 = vadd.f32 %v9208_v16, %v9207_v50  ;;  %v9210_v22 = vpop.f32.mrb[194].mxu0 }
 0x6a1   : > { %v9211_v26 = vpop.f32.mrb[195].mxu0 }
 0x6a2   : > { %v9212_v31 = vadd.f32 %v9211_v26, %v9210_v22  ;;  %v4442_v29 = vadd.f32 %v9209_v21, %v8195_v40 }
 0x6a4   : > { %v4445_v10 = vadd.f32 %v9212_v31, %v8195_v40 }
 0x6a6   : > { %v9213_v41 = vpop.f32.mrb[196].mxu0 }
 0x6a7   : > { %v9214_v33 = vpop.f32.mrb[197].mxu0 }
 0x6a8   : > { %v9215_v45 = vadd.f32 %v9214_v33, %v9213_v41  ;;  %v9216_v39 = vpop.f32.mrb[198].mxu0 }
 0x6a9   : > { %v9217_v57 = vpop.f32.mrb[199].mxu0 }
 0x6aa   : > { %v9218_v44 = vadd.f32 %v9217_v57, %v9216_v39  ;;  %v4450_v6 = vadd.f32 %v9215_v45, %v8195_v40 }
 0x6ac   : > { %v4453_v13 = vadd.f32 %v9218_v44, %v8195_v40 }
 0x6ae   : > { %v9219_v0 = vpop.f32.mrb[200].mxu0 }
 0x6af   : > { %v9220_v30 = vpop.f32.mrb[201].mxu0 }
 0x6b0   : > { %v9221_v8 = vadd.f32 %v9220_v30, %v9219_v0  ;;  %v9222_v15 = vpop.f32.mrb[202].mxu0 }
 0x6b1   : > { %v9223_v58 = vpop.f32.mrb[203].mxu0 }
 0x6b2   : > { %v9224_v61 = vadd.f32 %v9223_v58, %v9222_v15  ;;  %v4458_v25 = vadd.f32 %v9221_v8, %v8195_v40 }
 0x6b4   : > { %v4461_v17 = vadd.f32 %v9224_v61, %v8195_v40 }
 0x6b6   : > { %v9225_v62 = vpop.f32.mrb[204].mxu0 }
 0x6b7   : > { %v9226_v63 = vpop.f32.mrb[205].mxu0 }
 0x6b8   : > { %v9227_v1 = vadd.f32 %v9226_v63, %v9225_v62  ;;  %v9228_v18 = vpop.f32.mrb[206].mxu0 }
 0x6b9   : > { %v9229_v38 = vpop.f32.mrb[207].mxu0 }
 0x6ba   : > { %v9230_v52 = vadd.f32 %v9229_v38, %v9228_v18  ;;  %v4466_v46 = vadd.f32 %v9227_v1, %v8195_v40 }
 0x6bc   : > { %v4469_v16 = vadd.f32 %v9230_v52, %v8195_v40 }
 0x6be   : > { %v9247_v19 = vpop.f32.mrb[184].mxu1 }
 0x6bf   : > { %v9248_v2 = vpop.f32.mrb[185].mxu1 }
 0x6c0   : > { %v9249_v53 = vadd.f32 %v9248_v2, %v9247_v19  ;;  %v9250_v3 = vpop.f32.mrb[186].mxu1 }
 0x6c1   : > { %v9251_v4 = vpop.f32.mrb[187].mxu1 }
 0x6c2   : > { %v9252_v55 = vadd.f32 %v9251_v4, %v9250_v3  ;;  %v4507_v14 = vadd.f32 %v9249_v53, %v4442_v29 }
 0x6c4   : > { %v4510_v42 = vadd.f32 %v9252_v55, %v4445_v10 }
 0x6c6   : > { %v9253_v60 = vpop.f32.mrb[188].mxu1 }
 0x6c7   : > { %v9254_v12 = vpop.f32.mrb[189].mxu1 }
 0x6c8   : > { %v9255_v59 = vadd.f32 %v9254_v12, %v9253_v60  ;;  %v9256_v56 = vpop.f32.mrb[190].mxu1 }
 0x6c9   : > { %v9257_v43 = vpop.f32.mrb[191].mxu1 }
 0x6ca   : > { %v9258_v5 = vadd.f32 %v9257_v43, %v9256_v56  ;;  %v4515_v7 = vadd.f32 %v9255_v59, %v4450_v6 }
 0x6cc   : > { %v4518_v20 = vadd.f32 %v9258_v5, %v4453_v13  ;;  %v10425_v13 = vld [vmem:[%s10786_s24 + $0x40] sm:$0xff]  }
 0x6cd   : > { %v10426_v5 = vld [vmem:[%s10786_s24 + $0xc0] sm:$0xff]  }
 0x6ce   : > { %v9259_v48 = vpop.f32.mrb[192].mxu1 }
 0x6cf   : > { %v9260_v24 = vpop.f32.mrb[193].mxu1 }
 0x6d0   : > { %v9261_v51 = vadd.f32 %v9260_v24, %v9259_v48  ;;  %v9262_v28 = vpop.f32.mrb[194].mxu1  ;;  %v10421_v48 = vld [vmem:[%s10781_s19 + $0x10] sm:$0xff]  }
 0x6d1   : > { %v9263_v32 = vpop.f32.mrb[195].mxu1  ;;  %v10422_v24 = vld [vmem:[%s10781_s19 + $0x30] sm:$0xff]  }
 0x6d2   : > { %v9264_v34 = vadd.f32 %v9263_v32, %v9262_v28  ;;  %v4523_v37 = vadd.f32 %v9261_v51, %v4458_v25  ;;  %v10427_v25 = vld [vmem:[%s10786_s24] sm:$0xff]   ;;  %v10429_v28 = vld [vmem:[%s10786_s24 + $0x48] sm:$0xff]  }
 0x6d3   : > { %v10428_v51 = vld [vmem:[%s10786_s24 + $0x80] sm:$0xff]   ;;  %v10430_v32 = vld [vmem:[%s10786_s24 + $0xc8] sm:$0xff]  }
 0x6d4   : > { %v4526_v49 = vadd.f32 %v9264_v34, %v4461_v17  ;;  %v10431_v17 = vld [vmem:[%s10786_s24 + $0x8] sm:$0xff]  }
 0x6d5   : > { %v10432_v34 = vld [vmem:[%s10786_s24 + $0x88] sm:$0xff]  }
 0x6d6   : > { %v9265_v27 = vpop.f32.mrb[196].mxu1 }
 0x6d7   : > { %v9266_v54 = vpop.f32.mrb[197].mxu1 }
 0x6d8   : > { %v9267_v9 = vadd.f32 %v9266_v54, %v9265_v27  ;;  %v9268_v36 = vpop.f32.mrb[198].mxu1  ;;  %v10423_v27 = vld [vmem:[%s10781_s19 + $0x18] sm:$0xff]  }
 0x6d9   : > { %v9269_v50 = vpop.f32.mrb[199].mxu1  ;;  %v10424_v54 = vld [vmem:[%s10781_s19 + $0x38] sm:$0xff]  }
 0x6da   : > { %v9270_v21 = vadd.f32 %v9269_v50, %v9268_v36  ;;  %v4531_v22 = vadd.f32 %v9267_v9, %v4466_v46  ;;  %v10435_v46 = vld [vmem:[%s10786_s24 + $0x10] sm:$0xff]   ;;  %v10437_v36 = vld [vmem:[%s10786_s24 + $0x58] sm:$0xff]  }
 0x6db   : > { %v10436_v9 = vld [vmem:[%s10786_s24 + $0x90] sm:$0xff]   ;;  %v10438_v50 = vld [vmem:[%s10786_s24 + $0xd8] sm:$0xff]  }
 0x6dc   : > { %v4534_v26 = vadd.f32 %v9270_v21, %v4469_v16  ;;  %v10439_v16 = vld [vmem:[%s10786_s24 + $0x18] sm:$0xff]  }
 0x6dd   : > { %v10440_v21 = vld [vmem:[%s10786_s24 + $0x98] sm:$0xff]  }
 0x6de   : > { %v9878_v31 = vpop.f32.mrb[200].mxu1 }
 0x6df   : > { %v4580_v41 = vadd.f32 %v9878_v31, %v4515_v7  ;;  %v4571_v33 = vpop.f32.mrb[201].mxu1  ;;  %v10419_v7 = vld [vmem:[%s10781_s19 + $0x8] sm:$0xff]   ;;  %v10443_v31 = vld [vmem:[%s10786_s24 + $0x20] sm:$0xff]  }
 0x6e0   : > { %v4572_v45 = vadd.f32 %v4571_v33, %v4507_v14  ;;  %v9879_v39 = vpop.f32.mrb[202].mxu1  ;;  %v10446_v33 = vld [vmem:[%s10786_s24 + $0xe8] sm:$0xff]  }
 0x6e1   : > { %v4612_v57 = vmul.f32 0.0001, %v4580_v41  ;;  %v4583_v44 = vadd.f32 %v9879_v39, %v4518_v20  ;;  %v4574_v0 = vpop.f32.mrb[203].mxu1  ;;  %vm4604_vm1 = vcmp.ge.f32.partialorder %v4580_v41, 0.0  ;;  %v10420_v20 = vld [vmem:[%s10781_s19 + $0x28] sm:$0xff]  }
 0x6e2   : > { %v4610_v30 = vmul.f32 0.0001, %v4572_v45  ;;  %v4575_v8 = vadd.f32 %v4574_v0, %v4510_v42  ;;  %vm4602_vm2 = vcmp.ge.f32.partialorder %v4572_v45, 0.0  ;;  %v10448_v39 = vld [vmem:[%s10786_s24 + $0xa8] sm:$0xff]   ;;  %v10451_v0 = vld [vmem:[%s10786_s24 + $0x30] sm:$0xff]  }
 0x6e3   : > { %vm4605_vm3 = vcmp.ge.f32.partialorder %v4583_v44, 0.0  ;;  %v4613_v15 = vmul.f32 0.0001, %v4583_v44  ;;  %v4620_v61 = vsel %vm4604_vm1, %v4580_v41, %v4612_v57  ;;  %v10444_v41 = vld [vmem:[%s10786_s24 + $0xa0] sm:$0xff]   ;;  %v10449_v57 = vld [vmem:[%s10786_s24 + $0x70] sm:$0xff]  }
 0x6e4   : > { %vm4603_vm4 = vcmp.ge.f32.partialorder %v4575_v8, 0.0  ;;  %v4611_v58 = vmul.f32 0.0001, %v4575_v8  ;;  %v4618_v63 = vsel %vm4602_vm2, %v4572_v45, %v4610_v30  ;;  %v10447_v45 = vld [vmem:[%s10786_s24 + $0x28] sm:$0xff]   ;;  %v10452_v30 = vld [vmem:[%s10786_s24 + $0xb0] sm:$0xff]  }
 0x6e5   : > { %v4621_v62 = vsel %vm4605_vm3, %v4583_v44, %v4613_v15  ;;  %v10450_v44 = vld [vmem:[%s10786_s24 + $0xf0] sm:$0xff]   ;;  %v10454_v15 = vld [vmem:[%s10786_s24 + $0xf8] sm:$0xff]  }
 0x6e6   : > { %v11634_v1 = vpack.c.bf16 %v4621_v62, %v4620_v61  ;;  %v4619_v18 = vsel %vm4603_vm4, %v4575_v8, %v4611_v58  ;;  %v9882_v38 = vpop.f32.mrb[204].mxu1  ;;  %v10453_v8 = vld [vmem:[%s10786_s24 + $0x78] sm:$0xff]  }
 0x6e7   : > { %v11636_v52 = vpack.c.bf16 %v4619_v18, %v4618_v63  ;;  %v4596_v40 = vadd.f32 %v9882_v38, %v4531_v22  ;;  %v4587_v19 = vpop.f32.mrb[205].mxu1  ;;  %v10441_v22 = vld [vmem:[%s10786_s24 + $0x60] sm:$0xff]   ;;  %v10455_v58 = vld [vmem:[%s10786_s24 + $0x38] sm:$0xff]  }
 0x6e8   : > { %v4588_v2 = vadd.f32 %v4587_v19, %v4523_v37  ;;  %v9883_v29 = vpop.f32.mrb[206].mxu1  ;;  %v10433_v37 = vld [vmem:[%s10786_s24 + $0x50] sm:$0xff]   ;;  %v10456_v61 = vld [vmem:[%s10786_s24 + $0xb8] sm:$0xff]  }
 0x6e9   : > { %v4616_v53 = vmul.f32 0.0001, %v4596_v40  ;;  %v4599_v3 = vadd.f32 %v9883_v29, %v4534_v26  ;;  %v4590_v4 = vpop.f32.mrb[207].mxu1  ;;  %9884 = vmatprep.subr.bf16.mxu1 %v11636_v52  ;;  %9900 = vmatprep.subr.bf16.mxu0 %v11636_v52  ;;  %vm4608_vm5 = vcmp.ge.f32.partialorder %v4596_v40, 0.0  ;;  %v10442_v26 = vld [vmem:[%s10786_s24 + $0xe0] sm:$0xff]  }
 0x6ea   : > { %v4614_v10 = vmul.f32 0.0001, %v4588_v2  ;;  %v4591_v55 = vadd.f32 %v4590_v4, %v4526_v49  ;;  %9885 = vmatpush3.bf16.msra.mxu1 %v11636_v52  ;;  %9901 = vmatpush3.bf16.msra.mxu0 %v11636_v52  ;;  %vm4606_vm6 = vcmp.ge.f32.partialorder %v4588_v2, 0.0  ;;  %v10434_v49 = vld [vmem:[%s10786_s24 + $0xd0] sm:$0xff]  }
 0x6eb   : > { %vm4609_vm7 = vcmp.ge.f32.partialorder %v4599_v3, 0.0  ;;  %v4617_v14 = vmul.f32 0.0001, %v4599_v3  ;;  %9886 = vmatprep.subr.bf16.mxu1 %v11634_v1  ;;  %9902 = vmatprep.subr.bf16.mxu0 %v11634_v1  ;;  %v4624_v60 = vsel %vm4608_vm5, %v4596_v40, %v4616_v53 }
 0x6ec   : > { %vm4607_vm8 = vcmp.ge.f32.partialorder %v4591_v55, 0.0  ;;  %v4615_v42 = vmul.f32 0.0001, %v4591_v55  ;;  %v4622_v6 = vsel %vm4606_vm6, %v4588_v2, %v4614_v10  ;;  %vm10721_vm6 = vmmov 0  }
 0x6ed   : > { %v4625_v12 = vsel %vm4609_vm7, %v4599_v3, %v4617_v14 }
 0x6ee   : > { %v11644_v59 = vpack.c.bf16 %v4625_v12, %v4624_v60  ;;  %v4623_v56 = vsel %vm4607_vm8, %v4591_v55, %v4615_v42  ;;  %9887 = vmatpush3.bf16.msra.mxu1 %v11634_v1  ;;  %9903 = vmatpush3.bf16.msra.mxu0 %v11634_v1 }
 0x6ef   : > { %v11648_v43 = vpack.c.bf16 %v4623_v56, %v4622_v6 }
 0x6f1   : > { %9888 = vmatprep.subr.bf16.mxu1 %v11648_v43  ;;  %9904 = vmatprep.subr.bf16.mxu0 %v11648_v43 }
 0x6f2   : > { %9889 = vmatpush3.bf16.msra.mxu1 %v11648_v43  ;;  %9905 = vmatpush3.bf16.msra.mxu0 %v11648_v43 }
 0x6f3   : > { %9890 = vmatprep.subr.bf16.mxu1 %v11644_v59  ;;  %9906 = vmatprep.subr.bf16.mxu0 %v11644_v59 }
 0x6f6   : > { %9891 = vmatpush3.bf16.msra.mxu1 %v11644_v59  ;;  %9907 = vmatpush3.bf16.msra.mxu0 %v11644_v59 }
 0x6f7   : > { %9299 = vmatprep.subr.bf16.mxu1 %v10425_v13  ;;  %9339 = vmatprep.subr.bf16.mxu0 %v10426_v5 }
 0x6f9   : > { %9893 = vmatmul.mubr.msk.bf16.vlgmr.msra.gmra.mrb[208].mxu1 %vm4658_vm0, %v10419_v7  ;;  %9909 = vmatmul.mubr.msk.bf16.vlgmr.msra.gmra.mrb[208].mxu0 %vm4658_vm0, %v10420_v20 }
 0x6fa   : > { %9896 = vmatprep.mubr.msk.bf16.mxu1 %vm4658_vm0, %v10421_v48  ;;  %9912 = vmatprep.mubr.msk.bf16.mxu0 %vm4658_vm0, %v10422_v24 }
 0x6fb   : > { %9300 = vmatpush3.bf16.msra.mxu1 %v10427_v25  ;;  %9340 = vmatpush3.bf16.msra.mxu0 %v10428_v51  ;;  %v11715_v25 = vld [vmem:[%s10791_s30] ss:$0 sm:$0xff] }
 0x6fc   : > { %9301 = vmatprep.subr.bf16.mxu1 %v10429_v28  ;;  %9341 = vmatprep.subr.bf16.mxu0 %v10430_v32 }
 0x6ff   : > { %9302 = vmatpush3.bf16.msra.mxu1 %v10431_v17  ;;  %9342 = vmatpush3.bf16.msra.mxu0 %v10432_v34 }
 0x700   : > { %9303 = vmatprep.subr.bf16.mxu1 %v10433_v37  ;;  %9343 = vmatprep.subr.bf16.mxu0 %v10434_v49 }
 0x701   : > { %9897 = vmatmul.mubr.msk.bf16.gmra.mrb[212].mxu1 %vm4658_vm0, %v10423_v27  ;;  %9913 = vmatmul.mubr.msk.bf16.gmra.mrb[212].mxu0 %vm4658_vm0, %v10424_v54 }
 0x702   : > { %5145 = vmatprep.mubr.bf16.mxu1 %v11636_v52  ;;  %5210 = vmatprep.mubr.bf16.mxu0 %v11612_v47  ;;  %v10445_v47 = vld [vmem:[%s10786_s24 + $0x68] sm:$0xff]  }
 0x703   : > { %9304 = vmatpush3.bf16.msra.mxu1 %v10435_v46  ;;  %9344 = vmatpush3.bf16.msra.mxu0 %v10436_v9 }
 0x704   : > { %9305 = vmatprep.subr.bf16.mxu1 %v10437_v36  ;;  %9345 = vmatprep.subr.bf16.mxu0 %v10438_v50 }
 0x707   : > { %9306 = vmatpush3.bf16.msra.mxu1 %v10439_v16  ;;  %9346 = vmatpush3.bf16.msra.mxu0 %v10440_v21 }
 0x708   : > { %9307 = vmatprep.subr.bf16.mxu1 %v10441_v22  ;;  %9347 = vmatprep.subr.bf16.mxu0 %v10442_v26 }
 0x70b   : > { %9308 = vmatpush3.bf16.msra.mxu1 %v10443_v31  ;;  %9348 = vmatpush3.bf16.msra.mxu0 %v10444_v41 }
 0x70c   : > { %9309 = vmatprep.subr.bf16.mxu1 %v10445_v47  ;;  %9349 = vmatprep.subr.bf16.mxu0 %v10446_v33 }
 0x70f   : > { %9310 = vmatpush3.bf16.msra.mxu1 %v10447_v45  ;;  %9350 = vmatpush3.bf16.msra.mxu0 %v10448_v39 }
 0x710   : > { %9311 = vmatprep.subr.bf16.mxu1 %v10449_v57  ;;  %9351 = vmatprep.subr.bf16.mxu0 %v10450_v44 }
 0x713   : > { %9312 = vmatpush3.bf16.msra.mxu1 %v10451_v0  ;;  %9352 = vmatpush3.bf16.msra.mxu0 %v10452_v30 }
 0x714   : > { %9313 = vmatprep.subr.bf16.mxu1 %v10453_v8  ;;  %9353 = vmatprep.subr.bf16.mxu0 %v10454_v15 }
 0x717   : > { %9314 = vmatpush3.bf16.msra.mxu1 %v10455_v58  ;;  %9354 = vmatpush3.bf16.msra.mxu0 %v10456_v61 }
 0x7cc   : > { %v9894_v62 = vpop.f32.mrb[208].mxu1  ;;  %v9910_v63 = vpop.f32.mrb[208].mxu0 }
 0x7cd   : > { %v4705_v18 = vpop.f32.mrb[209].mxu1  ;;  %v4815_v38 = vpop.f32.mrb[209].mxu0 }
 0x7ce   : > { %v9895_v52 = vpop.f32.mrb[210].mxu1  ;;  %v9911_v40 = vpop.f32.mrb[210].mxu0 }
 0x7cf   : > { %v4737_v19 = vpack.c.bf16 %v9895_v52, %v9894_v62  ;;  %v4847_v2 = vpack.c.bf16 %v9911_v40, %v9910_v63  ;;  %v4708_v29 = vpop.f32.mrb[211].mxu1  ;;  %v4818_v53 = vpop.f32.mrb[211].mxu0 }
 0x7d0   : > { %v4736_v3 = vpack.c.bf16 %v4708_v29, %v4705_v18  ;;  %v4846_v4 = vpack.c.bf16 %v4818_v53, %v4815_v38 }
 0x7d2   : > { %5146 = vmatmul.mubr.bf16.vlgmr.msra.gmra.mrb[216].mxu1 %v4736_v3  ;;  %5211 = vmatmul.mubr.bf16.vlgmr.msra.gmra.mrb[216].mxu0 %v4846_v4 }
 0x7d3   : > { %5153 = vmatprep.mubr.bf16.mxu1 %v11634_v1  ;;  %5218 = vmatprep.mubr.bf16.mxu0 %v11610_v35  ;;  %v10457_v35 = vld [vmem:[%s12073_s6 + $0x10] sm:$0xff]   ;;  %v10458_v1 = vld [vmem:[%s12073_s6] sm:$0xff]  }
 0x7d4   : > { %v9898_v10 = vpop.f32.mrb[212].mxu1  ;;  %v9914_v55 = vpop.f32.mrb[212].mxu0 }
 0x7d5   : > { %v4721_v14 = vpop.f32.mrb[213].mxu1  ;;  %v4831_v42 = vpop.f32.mrb[213].mxu0 }
 0x7d6   : > { %v9899_v60 = vpop.f32.mrb[214].mxu1  ;;  %v9915_v12 = vpop.f32.mrb[214].mxu0 }
 0x7d7   : > { %v4739_v6 = vpack.c.bf16 %v9899_v60, %v9898_v10  ;;  %v4849_v56 = vpack.c.bf16 %v9915_v12, %v9914_v55  ;;  %v4724_v13 = vpop.f32.mrb[215].mxu1  ;;  %v4834_v5 = vpop.f32.mrb[215].mxu0 }
 0x7d8   : > { %v4738_v7 = vpack.c.bf16 %v4724_v13, %v4721_v14  ;;  %v4848_v20 = vpack.c.bf16 %v4834_v5, %v4831_v42 }
 0x7da   : > { %5154 = vmatmul.mubr.bf16.gmra.mrb[220].mxu1 %v4737_v19  ;;  %5219 = vmatmul.mubr.bf16.gmra.mrb[220].mxu0 %v4847_v2 }
 0x7db   : > { %5161 = vmatprep.mubr.bf16.mxu1 %v11648_v43  ;;  %5226 = vmatprep.mubr.bf16.mxu0 %v11619_v11 }
 0x7e2   : > { %5162 = vmatmul.mubr.bf16.gmra.mrb[224].mxu1 %v4738_v7  ;;  %5227 = vmatmul.mubr.bf16.gmra.mrb[224].mxu0 %v4848_v20 }
 0x7e3   : > { %5169 = vmatprep.mubr.bf16.mxu1 %v11644_v59  ;;  %5234 = vmatprep.mubr.bf16.mxu0 %v11617_v23 }
 0x7ea   : > { %5170 = vmatmul.mubr.bf16.gmra.mrb[228].mxu1 %v4739_v6  ;;  %5235 = vmatmul.mubr.bf16.gmra.mrb[228].mxu0 %v4849_v56 }
 0x7eb   : > { %9936 = vmatprep.mubr.msk.bf16.mxu0 %vm4658_vm0, %v10457_v35  ;;  %9924 = vmatprep.mubr.msk.bf16.mxu1 %vm4658_vm0, %v10458_v1 }
 0x8a5   : > { %v9315_v48 = vpop.f32.mrb[216].mxu1  ;;  %v9355_v24 = vpop.f32.mrb[216].mxu0 }
 0x8a6   : > { %v9316_v43 = vpop.f32.mrb[217].mxu1  ;;  %v9356_v11 = vpop.f32.mrb[217].mxu0 }
 0x8a7   : > { %v9317_v51 = vadd.f32 %v9316_v43, %v9315_v48  ;;  %v9318_v28 = vpop.f32.mrb[218].mxu1  ;;  %v9357_v32 = vadd.f32 %v9356_v11, %v9355_v24  ;;  %v9358_v59 = vpop.f32.mrb[218].mxu0 }
 0x8a8   : > { %v9319_v17 = vpop.f32.mrb[219].mxu1  ;;  %v9359_v23 = vpop.f32.mrb[219].mxu0 }
 0x8a9   : > { %v5148_v34 = vadd.f32 %v9317_v51, %v11715_v25  ;;  %v9320_v37 = vadd.f32 %v9319_v17, %v9318_v28  ;;  %v9360_v49 = vadd.f32 %v9359_v23, %v9358_v59 }
 0x8ab   : > { %v5151_v27 = vadd.f32 %v9320_v37, %v11715_v25  ;;  %v5213_v54 = vadd.f32 %v9357_v32, %v5148_v34 }
 0x8ad   : > { %vm5243_vm9 = vcmp.ge.f32.partialorder %v5213_v54, 0.0  ;;  %v5251_v46 = vmul.f32 0.0001, %v5213_v54  ;;  %v5216_v9 = vadd.f32 %v9360_v49, %v5151_v27  ;;  %v9321_v36 = vpop.f32.mrb[220].mxu1  ;;  %v9361_v50 = vpop.f32.mrb[220].mxu0 }
 0x8ae   : > { %v9322_v16 = vpop.f32.mrb[221].mxu1  ;;  %v9362_v21 = vpop.f32.mrb[221].mxu0 }
 0x8af   : > { %vm5244_vm10 = vcmp.ge.f32.partialorder %v5216_v9, 0.0  ;;  %v5252_v22 = vmul.f32 0.0001, %v5216_v9  ;;  %v9323_v26 = vadd.f32 %v9322_v16, %v9321_v36  ;;  %v9324_v31 = vpop.f32.mrb[222].mxu1  ;;  %v9364_v41 = vpop.f32.mrb[222].mxu0  ;;  %v5259_v47 = vsel %vm5243_vm9, %v5213_v54, %v5251_v46 }
 0x8b0   : > { %v9363_v33 = vadd.f32 %v9362_v21, %v9361_v50  ;;  %v9325_v45 = vpop.f32.mrb[223].mxu1  ;;  %v9365_v39 = vpop.f32.mrb[223].mxu0 }
 0x8b1   : > { %v5260_v57 = vsel %vm5244_vm10, %v5216_v9, %v5252_v22  ;;  %v5156_v44 = vadd.f32 %v9323_v26, %v11715_v25  ;;  %v9326_v0 = vadd.f32 %v9325_v45, %v9324_v31  ;;  %v9366_v30 = vadd.f32 %v9365_v39, %v9364_v41  ;;  %v10463_v22 = vld [vmem:[%s12078_s16 + $0x40] sm:$0xff]   ;;  %v10460_v26 = vld [vmem:[%s12073_s6 + $0x8] sm:$0xff]   ;;  %v10467_v45 = vld [vmem:[%s12078_s16 + $0x50] sm:$0xff]  }
 0x8b2   : > { %v11720_v8 = vpack.c.bf16 %v5260_v57, %v5259_v47  ;;  %v10461_v31 = vld [vmem:[%s12073_s6 + $0x20] sm:$0xff]   ;;  %v10465_v47 = vld [vmem:[%s12078_s16 + $0x48] sm:$0xff]   ;;  %v10468_v39 = vld [vmem:[%s12078_s16 + $0x10] sm:$0xff]  }
 0x8b3   : > { %v5221_v15 = vadd.f32 %v9363_v33, %v5156_v44  ;;  %v5159_v58 = vadd.f32 %v9326_v0, %v11715_v25  ;;  %v10464_v41 = vld [vmem:[%s12078_s16] sm:$0xff]   ;;  %v10466_v33 = vld [vmem:[%s12078_s16 + $0x8] sm:$0xff]   ;;  %v10469_v57 = vld [vmem:[%s12078_s16 + $0x58] sm:$0xff]  }
 0x8b4   : > { %9916 = vmatprep.subr.bf16.mxu1 %v11720_v8  ;;  %9928 = vmatprep.subr.bf16.mxu0 %v11720_v8  ;;  %v10470_v44 = vld [vmem:[%s12078_s16 + $0x18] sm:$0xff]   ;;  %v10472_v0 = vld [vmem:[%s12078_s16 + $0x80] sm:$0xff]  }
 0x8b5   : > { %vm5245_vm11 = vcmp.ge.f32.partialorder %v5221_v15, 0.0  ;;  %v5253_v61 = vmul.f32 0.0001, %v5221_v15  ;;  %v5224_v62 = vadd.f32 %v9366_v30, %v5159_v58  ;;  %v9327_v63 = vpop.f32.mrb[224].mxu1  ;;  %9917 = vmatpush3.bf16.msra.mxu1 %v11720_v8  ;;  %9929 = vmatpush3.bf16.msra.mxu0 %v11720_v8  ;;  %v9367_v18 = vpop.f32.mrb[224].mxu0  ;;  %v10471_v30 = vld [vmem:[%s12078_s16 + $0x60] sm:$0xff]  }
 0x8b6   : > { %v9328_v38 = vpop.f32.mrb[225].mxu1  ;;  %v9368_v52 = vpop.f32.mrb[225].mxu0  ;;  %v10475_v58 = vld [vmem:[%s12078_s16 + $0x88] sm:$0xff]  }
 0x8b7   : > { %vm5246_vm12 = vcmp.ge.f32.partialorder %v5224_v62, 0.0  ;;  %v5254_v40 = vmul.f32 0.0001, %v5224_v62  ;;  %v9329_v19 = vadd.f32 %v9328_v38, %v9327_v63  ;;  %v9330_v2 = vpop.f32.mrb[226].mxu1  ;;  %v9370_v29 = vpop.f32.mrb[226].mxu0  ;;  %v5261_v53 = vsel %vm5245_vm11, %v5221_v15, %v5253_v61  ;;  %v10473_v15 = vld [vmem:[%s12078_s16 + $0x20] sm:$0xff]  }
 0x8b8   : > { %v9331_v3 = vpop.f32.mrb[227].mxu1  ;;  %v9369_v4 = vadd.f32 %v9368_v52, %v9367_v18  ;;  %v9371_v10 = vpop.f32.mrb[227].mxu0  ;;  %v10474_v61 = vld [vmem:[%s12078_s16 + $0x68] sm:$0xff]   ;;  %v10478_v63 = vld [vmem:[%s12078_s16 + $0x90] sm:$0xff]   ;;  %v10480_v52 = vld [vmem:[%s12078_s16 + $0x78] sm:$0xff]  }
 0x8b9   : > { %v5262_v55 = vsel %vm5246_vm12, %v5224_v62, %v5254_v40  ;;  %v5164_v14 = vadd.f32 %v9329_v19, %v11715_v25  ;;  %v9332_v42 = vadd.f32 %v9331_v3, %v9330_v2  ;;  %v9372_v60 = vadd.f32 %v9371_v10, %v9370_v29  ;;  %v10476_v62 = vld [vmem:[%s12078_s16 + $0x28] sm:$0xff]   ;;  %v10477_v18 = vld [vmem:[%s12078_s16 + $0x70] sm:$0xff]   ;;  %v10481_v40 = vld [vmem:[%s12078_s16 + $0x98] sm:$0xff]  }
 0x8ba   : > { %v5268_v12 = vpack.c.bf16 %v5262_v55, %v5261_v53  ;;  %v10479_v38 = vld [vmem:[%s12078_s16 + $0x30] sm:$0xff]   ;;  %v10482_v19 = vld [vmem:[%s12078_s16 + $0x38] sm:$0xff]   ;;  %v10483_v2 = vld [vmem:[%s12078_s16 + $0xa0] sm:$0xff]  }
 0x8bb   : > { %v5167_v6 = vadd.f32 %v9332_v42, %v11715_v25  ;;  %v5229_v56 = vadd.f32 %v9369_v4, %v5164_v14  ;;  %v10484_v29 = vld [vmem:[%s12078_s16 + $0xa8] sm:$0xff]   ;;  %v10485_v53 = vld [vmem:[%s12078_s16 + $0xb0] sm:$0xff]   ;;  %v10486_v3 = vld [vmem:[%s12078_s16 + $0xb8] sm:$0xff]  }
 0x8bc   : > { %9918 = vmatprep.subr.bf16.mxu1 %v5268_v12  ;;  %9930 = vmatprep.subr.bf16.mxu0 %v5268_v12 }
 0x8bd   : > { %vm5247_vm13 = vcmp.ge.f32.partialorder %v5229_v56, 0.0  ;;  %v5255_v13 = vmul.f32 0.0001, %v5229_v56  ;;  %v5232_v5 = vadd.f32 %v9372_v60, %v5167_v6  ;;  %v9333_v7 = vpop.f32.mrb[228].mxu1  ;;  %v9373_v20 = vpop.f32.mrb[228].mxu0  ;;  %9919 = vmatpush3.bf16.msra.mxu1 %v5268_v12  ;;  %9931 = vmatpush3.bf16.msra.mxu0 %v5268_v12 }
 0x8be   : > { %v9334_v35 = vpop.f32.mrb[229].mxu1  ;;  %v9374_v1 = vpop.f32.mrb[229].mxu0 }
 0x8bf   : > { %vm5248_vm14 = vcmp.ge.f32.partialorder %v5232_v5, 0.0  ;;  %v5256_v48 = vmul.f32 0.0001, %v5232_v5  ;;  %v9335_v24 = vadd.f32 %v9334_v35, %v9333_v7  ;;  %v9336_v43 = vpop.f32.mrb[230].mxu1  ;;  %v9376_v11 = vpop.f32.mrb[230].mxu0  ;;  %v5263_v51 = vsel %vm5247_vm13, %v5229_v56, %v5255_v13 }
 0x8c0   : > { %v9375_v28 = vadd.f32 %v9374_v1, %v9373_v20  ;;  %v9337_v32 = vpop.f32.mrb[231].mxu1  ;;  %v9377_v59 = vpop.f32.mrb[231].mxu0  ;;  %vm6769_vm13 = vcmask 130048  }
 0x8c1   : > { %v5264_v17 = vsel %vm5248_vm14, %v5232_v5, %v5256_v48  ;;  %v5172_v23 = vadd.f32 %v9335_v24, %v11715_v25  ;;  %v9338_v34 = vadd.f32 %v9337_v32, %v9336_v43  ;;  %v9378_v37 = vadd.f32 %v9377_v59, %v9376_v11  ;;  %v10487_v11 = vld [vmem:[%s12079_s26] sm:$0xff]  }
 0x8c2   : > { %v5269_v49 = vpack.c.bf16 %v5264_v17, %v5263_v51  ;;  %v10488_v51 = vld [vmem:[%s12079_s26 + $0x10] sm:$0xff]  }
 0x8c3   : > { %v5237_v27 = vadd.f32 %v9375_v28, %v5172_v23  ;;  %v5175_v54 = vadd.f32 %v9338_v34, %v11715_v25  ;;  %v10459_v25 = vld [vmem:[%s12073_s6 + $0x18] sm:$0xff]  }
 0x8c4   : > { %9920 = vmatprep.subr.bf16.mxu1 %v5269_v49  ;;  %9932 = vmatprep.subr.bf16.mxu0 %v5269_v49 }
 0x8c5   : > { %v5257_v46 = vmul.f32 0.0001, %v5237_v27  ;;  %v5240_v9 = vadd.f32 %v9378_v37, %v5175_v54  ;;  %9921 = vmatpush3.bf16.msra.mxu1 %v5269_v49  ;;  %9933 = vmatpush3.bf16.msra.mxu0 %v5269_v49  ;;  %vm5249_vm15 = vcmp.ge.f32.partialorder %v5237_v27, 0.0 }
 0x8c7   : > { %vm5250_vm1 = vcmp.ge.f32.partialorder %v5240_v9, 0.0  ;;  %v5258_v36 = vmul.f32 0.0001, %v5240_v9  ;;  %v5265_v50 = vsel %vm5249_vm15, %v5237_v27, %v5257_v46 }
 0x8c9   : > { %v5266_v16 = vsel %vm5250_vm1, %v5240_v9, %v5258_v36  ;;  %v8313_v36 = vld [vmem:[%s12080_s10] ss:$0 sm:$0xff]  ;;  %s12082_s10 = sld [smem:[#allocation15_spill]] }
 0x8ca   : > { %v5270_v21 = vpack.c.bf16 %v5266_v16, %v5265_v50 }
 0x8cc   : > { %9922 = vmatprep.subr.bf16.mxu1 %v5270_v21  ;;  %9934 = vmatprep.subr.bf16.mxu0 %v5270_v21 }
 0x8cd   : > { %9923 = vmatpush3.bf16.msra.mxu1 %v5270_v21  ;;  %9935 = vmatpush3.bf16.msra.mxu0 %v5270_v21 }
 0x8ce   : > { %9940 = vmatprep.subr.bf16.mxu1 %v11720_v8  ;;  %9397 = vmatprep.subr.bf16.mxu0 %v10463_v22 }
 0x8d0   : > { %9937 = vmatmul.mubr.msk.bf16.vlgmr.msra.gmra.mrb[232].mxu0 %vm4658_vm0, %v10459_v25  ;;  %9925 = vmatmul.mubr.msk.bf16.vlgmr.msra.gmra.mrb[232].mxu1 %vm4658_vm0, %v10460_v26 }
 0x8d1   : > { %9941 = vmatpush3.bf16.msra.mxu1 %v11720_v8  ;;  %9948 = vmatprep.mubr.msk.bf16.mxu1 %vm4658_vm0, %v10461_v31  ;;  %v10462_v8 = vld [vmem:[%s12073_s6 + $0x28] sm:$0xff]   ;;  %s12087_s6 = sld [smem:[#allocation19_spill]] }
 0x8d2   : > { %9942 = vmatprep.subr.bf16.mxu1 %v5268_v12  ;;  %9398 = vmatpush3.bf16.msra.mxu0 %v10464_v41 }
 0x8d3   : > { %9399 = vmatprep.subr.bf16.mxu0 %v10465_v47 }
 0x8d5   : > { %9943 = vmatpush3.bf16.msra.mxu1 %v5268_v12 }
 0x8d6   : > { %9944 = vmatprep.subr.bf16.mxu1 %v5269_v49  ;;  %9400 = vmatpush3.bf16.msra.mxu0 %v10466_v33 }
 0x8d7   : > { %9401 = vmatprep.subr.bf16.mxu0 %v10467_v45 }
 0x8d9   : > { %9945 = vmatpush3.bf16.msra.mxu1 %v5269_v49 }
 0x8da   : > { %9946 = vmatprep.subr.bf16.mxu1 %v5270_v21  ;;  %9402 = vmatpush3.bf16.msra.mxu0 %v10468_v39 }
 0x8db   : > { %9403 = vmatprep.subr.bf16.mxu0 %v10469_v57 }
 0x8dd   : > { %9947 = vmatpush3.bf16.msra.mxu1 %v5270_v21 }
 0x8de   : > { %9404 = vmatpush3.bf16.msra.mxu0 %v10470_v44  ;;  %9952 = vmatprep.subr.bf16.mxu1 %v10472_v0 }
 0x8df   : > { %9405 = vmatprep.subr.bf16.mxu0 %v10471_v30 }
 0x8e0   : > { %9949 = vmatmul.mubr.msk.bf16.vlgmr.msra.gmra.mrb[236].mxu1 %vm4658_vm0, %v10462_v8  ;;  %vm5811_vm0 = vcmask 261120  }
 0x8e1   : > { %9953 = vmatpush3.bf16.msra.mxu1 %v10472_v0 }
 0x8e2   : > { %9406 = vmatpush3.bf16.msra.mxu0 %v10473_v15  ;;  %9954 = vmatprep.subr.bf16.mxu1 %v10475_v58 }
 0x8e3   : > { %9407 = vmatprep.subr.bf16.mxu0 %v10474_v61 }
 0x8e5   : > { %9955 = vmatpush3.bf16.msra.mxu1 %v10475_v58 }
 0x8e6   : > { %9408 = vmatpush3.bf16.msra.mxu0 %v10476_v62  ;;  %9956 = vmatprep.subr.bf16.mxu1 %v10478_v63 }
 0x8e7   : > { %9409 = vmatprep.subr.bf16.mxu0 %v10477_v18  ;;  %v10491_v18 = vld [vmem:[%s12081_s15 + $0x40] sm:$0xff]  }
 0x8e9   : > { %9957 = vmatpush3.bf16.msra.mxu1 %v10478_v63 }
 0x8ea   : > { %9410 = vmatpush3.bf16.msra.mxu0 %v10479_v38  ;;  %9958 = vmatprep.subr.bf16.mxu1 %v10481_v40  ;;  %v10492_v38 = vld [vmem:[%s12081_s15 + $0xc0] sm:$0xff]  }
 0x8eb   : > { %9411 = vmatprep.subr.bf16.mxu0 %v10480_v52  ;;  %v10489_v52 = vld [vmem:[%s12079_s26 + $0x8] sm:$0xff]  }
 0x8ed   : > { %9959 = vmatpush3.bf16.msra.mxu1 %v10481_v40  ;;  %v10490_v40 = vld [vmem:[%s12079_s26 + $0x18] sm:$0xff]  }
 0x8ee   : > { %9412 = vmatpush3.bf16.msra.mxu0 %v10482_v19  ;;  %9960 = vmatprep.subr.bf16.mxu1 %v10483_v2  ;;  %v10493_v19 = vld [vmem:[%s12081_s15] sm:$0xff]  }
 0x8f1   : > { %9961 = vmatpush3.bf16.msra.mxu1 %v10483_v2  ;;  %v10494_v2 = vld [vmem:[%s12081_s15 + $0x80] sm:$0xff]  }
 0x8f2   : > { %9962 = vmatprep.subr.bf16.mxu1 %v10484_v29 }
 0x8f5   : > { %9963 = vmatpush3.bf16.msra.mxu1 %v10484_v29  ;;  %v10495_v29 = vld [vmem:[%s12081_s15 + $0x48] sm:$0xff]  }
 0x8f6   : > { %9964 = vmatprep.subr.bf16.mxu1 %v10485_v53 }
 0x8f9   : > { %9965 = vmatpush3.bf16.msra.mxu1 %v10485_v53  ;;  %v10496_v53 = vld [vmem:[%s12081_s15 + $0xc8] sm:$0xff]  }
 0x8fa   : > { %9966 = vmatprep.subr.bf16.mxu1 %v10486_v3 }
 0x8fd   : > { %9967 = vmatpush3.bf16.msra.mxu1 %v10486_v3  ;;  %v10497_v3 = vld [vmem:[%s12081_s15 + $0x8] sm:$0xff]  }
 0x9a3   : > { %v9938_v4 = vpop.f32.mrb[232].mxu0  ;;  %v9926_v10 = vpop.f32.mrb[232].mxu1 }
 0x9a4   : > { %v5397_v55 = vpop.f32.mrb[233].mxu0  ;;  %v5325_v14 = vpop.f32.mrb[233].mxu1 }
 0x9a5   : > { %v9939_v42 = vpop.f32.mrb[234].mxu0  ;;  %v9927_v60 = vpop.f32.mrb[234].mxu1 }
 0x9a6   : > { %v11765_v12 = vpack.c.bf16 %v9939_v42, %v9938_v4  ;;  %v5341_v6 = vpack.c.bf16 %v9927_v60, %v9926_v10  ;;  %v5400_v56 = vpop.f32.mrb[235].mxu0  ;;  %v5328_v13 = vpop.f32.mrb[235].mxu1  ;;  %v10498_v4 = vld [vmem:[%s12081_s15 + $0x88] sm:$0xff]   ;;  %v10499_v10 = vld [vmem:[%s12081_s15 + $0x50] sm:$0xff]   ;;  %v10503_v60 = vld [vmem:[%s12081_s15 + $0x58] sm:$0xff]  }
 0x9a7   : > { %v11767_v5 = vpack.c.bf16 %v5400_v56, %v5397_v55  ;;  %v5340_v7 = vpack.c.bf16 %v5328_v13, %v5325_v14  ;;  %v10500_v55 = vld [vmem:[%s12081_s15 + $0xd0] sm:$0xff]   ;;  %v10505_v56 = vld [vmem:[%s12081_s15 + $0x18] sm:$0xff]  }
 0x9a8   : > { %v10501_v14 = vld [vmem:[%s12081_s15 + $0x10] sm:$0xff]   ;;  %v10506_v13 = vld [vmem:[%s12081_s15 + $0x98] sm:$0xff]  }
 0x9a9   : > { %5717 = vmatprep.mubr.bf16.mxu0 %v11767_v5  ;;  %v10502_v42 = vld [vmem:[%s12081_s15 + $0x90] sm:$0xff]  }
 0x9aa   : > { %5718 = vmatmul.mubr.bf16.vlgmr.msra.gmra.mrb[236].mxu0 %v5340_v7  ;;  %v10508_v7 = vld [vmem:[%s12081_s15 + $0xe0] sm:$0xff]  }
 0x9ab   : > { %5725 = vmatprep.mubr.bf16.mxu0 %v11765_v12 }
 0x9b2   : > { %5726 = vmatmul.mubr.bf16.gmra.mrb[240].mxu0 %v5341_v6  ;;  %v10504_v6 = vld [vmem:[%s12081_s15 + $0xd8] sm:$0xff]  }
 0x9b3   : > { %v9950_v20 = vpop.f32.mrb[236].mxu1  ;;  %9984 = vmatprep.mubr.msk.bf16.mxu0 %vm5811_vm0, %v10488_v51  ;;  %v10516_v51 = vld [vmem:[%s12081_s15 + $0xf0] sm:$0xff]  }
 0x9b4   : > { %v5469_v35 = vpop.f32.mrb[237].mxu1 }
 0x9b5   : > { %v9951_v1 = vpop.f32.mrb[238].mxu1 }
 0x9b6   : > { %v5485_v48 = vpack.c.bf16 %v9951_v1, %v9950_v20  ;;  %v5472_v24 = vpop.f32.mrb[239].mxu1  ;;  %v10509_v20 = vld [vmem:[%s12081_s15 + $0x20] sm:$0xff]   ;;  %v10511_v1 = vld [vmem:[%s12081_s15 + $0x68] sm:$0xff]  }
 0x9b7   : > { %v5484_v43 = vpack.c.bf16 %v5472_v24, %v5469_v35  ;;  %v10510_v35 = vld [vmem:[%s12081_s15 + $0xa0] sm:$0xff]   ;;  %v10513_v24 = vld [vmem:[%s12081_s15 + $0x28] sm:$0xff]  }
 0x9b9   : > { %9968 = vmatprep.mubr.bf16.mxu1 %v5484_v43  ;;  %v10514_v43 = vld [vmem:[%s12081_s15 + $0xa8] sm:$0xff]  }
 0x9ba   : > { %9969 = vmatmul.mubr.bf16.vlgmr.msra.gmra.mrb[240].mxu1 %v5485_v48  ;;  %v10512_v48 = vld [vmem:[%s12081_s15 + $0xe8] sm:$0xff]  }
 0x9bb   : > { %9976 = vmatprep.mubr.msk.bf16.mxu1 %vm5811_vm0, %v10487_v11  ;;  %v10515_v11 = vld [vmem:[%s12081_s15 + $0x70] sm:$0xff]  }
 0xa7d   : > { %v9413_v28 = vpop.f32.mrb[236].mxu0 }
 0xa7e   : > { %v9414_v32 = vpop.f32.mrb[237].mxu0 }
 0xa7f   : > { %v9415_v59 = vadd.f32 %v9414_v32, %v9413_v28  ;;  %v9416_v17 = vpop.f32.mrb[238].mxu0  ;;  %v10517_v28 = vld [vmem:[%s12081_s15 + $0x30] sm:$0xff]  }
 0xa80   : > { %v9417_v23 = vpop.f32.mrb[239].mxu0  ;;  %v10518_v32 = vld [vmem:[%s12081_s15 + $0xb0] sm:$0xff]  }
 0xa81   : > { %v9418_v34 = vadd.f32 %v9417_v23, %v9416_v17  ;;  %v5720_v21 = vadd.f32 %v9415_v59, %v8313_v36  ;;  %v10519_v59 = vld [vmem:[%s12081_s15 + $0x78] sm:$0xff]  }
 0xa82   : > { %v10520_v17 = vld [vmem:[%s12081_s15 + $0xf8] sm:$0xff]  }
 0xa83   : > { %v5723_v47 = vadd.f32 %v9418_v34, %v8313_v36  ;;  %v10521_v23 = vld [vmem:[%s12081_s15 + $0x38] sm:$0xff]  }
 0xa84   : > { %v10522_v34 = vld [vmem:[%s12081_s15 + $0xb8] sm:$0xff]  }
 0xa85   : > { %v9419_v37 = vpop.f32.mrb[240].mxu0 }
 0xa86   : > { %v9420_v49 = vpop.f32.mrb[241].mxu0 }
 0xa87   : > { %v9421_v27 = vadd.f32 %v9420_v49, %v9419_v37  ;;  %v9422_v54 = vpop.f32.mrb[242].mxu0 }
 0xa88   : > { %v9423_v46 = vpop.f32.mrb[243].mxu0 }
 0xa89   : > { %v9424_v9 = vadd.f32 %v9423_v46, %v9422_v54  ;;  %v5728_v50 = vadd.f32 %v9421_v27, %v8313_v36 }
 0xa8b   : > { %v5731_v26 = vadd.f32 %v9424_v9, %v8313_v36 }
 0xa8d   : > { %v9970_v16 = vpop.f32.mrb[240].mxu1 }
 0xa8e   : > { %v5777_v22 = vadd.f32 %v9970_v16, %v5728_v50  ;;  %v5768_v25 = vpop.f32.mrb[241].mxu1 }
 0xa8f   : > { %v5769_v31 = vadd.f32 %v5768_v25, %v5720_v21  ;;  %v9971_v41 = vpop.f32.mrb[242].mxu1 }
 0xa90   : > { %v5789_v33 = vmul.f32 0.0001, %v5777_v22  ;;  %v5780_v45 = vadd.f32 %v9971_v41, %v5731_v26  ;;  %v5771_v39 = vpop.f32.mrb[243].mxu1  ;;  %vm5785_vm2 = vcmp.ge.f32.partialorder %v5777_v22, 0.0  ;;  %v10720_v26 = vmov 0.0  }
 0xa91   : > { %v5787_v57 = vmul.f32 0.0001, %v5769_v31  ;;  %v5772_v44 = vadd.f32 %v5771_v39, %v5723_v47  ;;  %vm5783_vm3 = vcmp.ge.f32.partialorder %v5769_v31, 0.0  ;;  %v8350_v47 = vld [vmem:[%s12082_s10] ss:$0 sm:$0xff]  ;;  %s12083_s10 = sld [smem:[#allocation17_spill]] }
 0xa92   : > { %vm5786_vm4 = vcmp.ge.f32.partialorder %v5780_v45, 0.0  ;;  %v5790_v0 = vmul.f32 0.0001, %v5780_v45  ;;  %v5793_v8 = vsel %vm5785_vm2, %v5777_v22, %v5789_v33 }
 0xa93   : > { %vm5784_vm5 = vcmp.ge.f32.partialorder %v5772_v44, 0.0  ;;  %v5788_v30 = vmul.f32 0.0001, %v5772_v44  ;;  %v5791_v58 = vsel %vm5783_vm3, %v5769_v31, %v5787_v57 }
 0xa94   : > { %v5794_v15 = vsel %vm5786_vm4, %v5780_v45, %v5790_v0 }
 0xa95   : > { %v11776_v61 = vpack.c.bf16 %v5794_v15, %v5793_v8  ;;  %v5792_v62 = vsel %vm5784_vm5, %v5772_v44, %v5788_v30 }
 0xa96   : > { %v5795_v63 = vpack.c.bf16 %v5792_v62, %v5791_v58 }
 0xa98   : > { %9972 = vmatprep.subr.bf16.mxu1 %v5795_v63  ;;  %9980 = vmatprep.subr.bf16.mxu0 %v5795_v63 }
 0xa99   : > { %9973 = vmatpush3.bf16.msra.mxu1 %v5795_v63  ;;  %9981 = vmatpush3.bf16.msra.mxu0 %v5795_v63 }
 0xa9a   : > { %9974 = vmatprep.subr.bf16.mxu1 %v11776_v61  ;;  %9982 = vmatprep.subr.bf16.mxu0 %v11776_v61 }
 0xa9d   : > { %9975 = vmatpush3.bf16.msra.mxu1 %v11776_v61  ;;  %9983 = vmatpush3.bf16.msra.mxu0 %v11776_v61 }
 0xa9e   : > { %9443 = vmatprep.subr.bf16.mxu1 %v10491_v18  ;;  %9471 = vmatprep.subr.bf16.mxu0 %v10492_v38 }
 0xaa0   : > { %9977 = vmatmul.mubr.msk.bf16.vlgmr.msra.gmra.mrb[244].mxu1 %vm5811_vm0, %v10489_v52  ;;  %9985 = vmatmul.mubr.msk.bf16.vlgmr.msra.gmra.mrb[244].mxu0 %vm5811_vm0, %v10490_v40 }
 0xaa1   : > { %6236 = vmatprep.mubr.bf16.mxu1 %v5795_v63  ;;  %6285 = vmatprep.mubr.bf16.mxu0 %v11767_v5  ;;  %v10507_v5 = vld [vmem:[%s12081_s15 + $0x60] sm:$0xff]  }
 0xaa2   : > { %9444 = vmatpush3.bf16.msra.mxu1 %v10493_v19  ;;  %9472 = vmatpush3.bf16.msra.mxu0 %v10494_v2 }
 0xaa3   : > { %9445 = vmatprep.subr.bf16.mxu1 %v10495_v29  ;;  %9473 = vmatprep.subr.bf16.mxu0 %v10496_v53 }
 0xaa6   : > { %9446 = vmatpush3.bf16.msra.mxu1 %v10497_v3  ;;  %9474 = vmatpush3.bf16.msra.mxu0 %v10498_v4 }
 0xaa7   : > { %9447 = vmatprep.subr.bf16.mxu1 %v10499_v10  ;;  %9475 = vmatprep.subr.bf16.mxu0 %v10500_v55 }
 0xaaa   : > { %9448 = vmatpush3.bf16.msra.mxu1 %v10501_v14  ;;  %9476 = vmatpush3.bf16.msra.mxu0 %v10502_v42 }
 0xaab   : > { %9449 = vmatprep.subr.bf16.mxu1 %v10503_v60  ;;  %9477 = vmatprep.subr.bf16.mxu0 %v10504_v6 }
 0xaae   : > { %9450 = vmatpush3.bf16.msra.mxu1 %v10505_v56  ;;  %9478 = vmatpush3.bf16.msra.mxu0 %v10506_v13 }
 0xaaf   : > { %9451 = vmatprep.subr.bf16.mxu1 %v10507_v5  ;;  %9479 = vmatprep.subr.bf16.mxu0 %v10508_v7 }
 0xab2   : > { %9452 = vmatpush3.bf16.msra.mxu1 %v10509_v20  ;;  %9480 = vmatpush3.bf16.msra.mxu0 %v10510_v35 }
 0xab3   : > { %9453 = vmatprep.subr.bf16.mxu1 %v10511_v1  ;;  %9481 = vmatprep.subr.bf16.mxu0 %v10512_v48 }
 0xab6   : > { %9454 = vmatpush3.bf16.msra.mxu1 %v10513_v24  ;;  %9482 = vmatpush3.bf16.msra.mxu0 %v10514_v43  ;;  %v10526_v43 = vld [vmem:[%s12083_s10 + $0x40] sm:$0xff]  }
 0xab7   : > { %9455 = vmatprep.subr.bf16.mxu1 %v10515_v11  ;;  %9483 = vmatprep.subr.bf16.mxu0 %v10516_v51  ;;  %v10523_v51 = vld [vmem:[%s12084_s3] sm:$0xff]  }
 0xaba   : > { %9456 = vmatpush3.bf16.msra.mxu1 %v10517_v28  ;;  %9484 = vmatpush3.bf16.msra.mxu0 %v10518_v32  ;;  %v10524_v28 = vld [vmem:[%s12084_s3 + $0x8] sm:$0xff]   ;;  %v10527_v32 = vld [vmem:[%s12083_s10] sm:$0xff]  }
 0xabb   : > { %9457 = vmatprep.subr.bf16.mxu1 %v10519_v59  ;;  %9485 = vmatprep.subr.bf16.mxu0 %v10520_v17  ;;  %v10528_v59 = vld [vmem:[%s12083_s10 + $0x48] sm:$0xff]  }
 0xabc   : > { %v10529_v17 = vld [vmem:[%s12083_s10 + $0x8] sm:$0xff]  }
 0xabe   : > { %9458 = vmatpush3.bf16.msra.mxu1 %v10521_v23  ;;  %9486 = vmatpush3.bf16.msra.mxu0 %v10522_v34  ;;  %v10531_v23 = vld [vmem:[%s12083_s10 + $0x50] sm:$0xff]  }
 0xabf   : > { %9988 = vmatprep.subr.bf16.mxu1 %v10720_v26  ;;  %9996 = vmatprep.subr.bf16.mxu0 %v10720_v26  ;;  %v10525_v34 = vld [vmem:[%s12084_s3 + $0x10] sm:$0xff]   ;;  %s12085_s3 = sld [smem:[#allocation18_spill]] }
 0xb73   : > { %v9978_v37 = vpop.f32.mrb[244].mxu1  ;;  %v9986_v49 = vpop.f32.mrb[244].mxu0 }
 0xb74   : > { %v5852_v27 = vpop.f32.mrb[245].mxu1  ;;  %v5924_v54 = vpop.f32.mrb[245].mxu0 }
 0xb75   : > { %v9979_v46 = vpop.f32.mrb[246].mxu1  ;;  %v9987_v9 = vpop.f32.mrb[246].mxu0 }
 0xb76   : > { %v5868_v36 = vpack.c.bf16 %v9979_v46, %v9978_v37  ;;  %v5940_v50 = vpack.c.bf16 %v9987_v9, %v9986_v49  ;;  %v5855_v16 = vpop.f32.mrb[247].mxu1  ;;  %v5927_v21 = vpop.f32.mrb[247].mxu0  ;;  %v10530_v37 = vld [vmem:[%s12083_s10 + $0x80] sm:$0xff]   ;;  %v10532_v49 = vld [vmem:[%s12083_s10 + $0x10] sm:$0xff]   ;;  %v10535_v46 = vld [vmem:[%s12083_s10 + $0x18] sm:$0xff]  }
 0xb77   : > { %v5867_v22 = vpack.c.bf16 %v5855_v16, %v5852_v27  ;;  %v5939_v25 = vpack.c.bf16 %v5927_v21, %v5924_v54  ;;  %v10534_v27 = vld [vmem:[%s12083_s10 + $0x58] sm:$0xff]   ;;  %v10533_v54 = vld [vmem:[%s12083_s10 + $0x88] sm:$0xff]   ;;  %v10537_v9 = vld [vmem:[%s12083_s10 + $0x60] sm:$0xff]  }
 0xb78   : > { %v10540_v16 = vld [vmem:[%s12083_s10 + $0x68] sm:$0xff]   ;;  %v10539_v21 = vld [vmem:[%s12083_s10 + $0x98] sm:$0xff]  }
 0xb79   : > { %6237 = vmatmul.mubr.bf16.vlgmr.msra.gmra.mrb[248].mxu1 %v5867_v22  ;;  %6286 = vmatmul.mubr.bf16.vlgmr.msra.gmra.mrb[248].mxu0 %v5939_v25  ;;  %v10541_v22 = vld [vmem:[%s12083_s10 + $0x28] sm:$0xff]   ;;  %v10543_v25 = vld [vmem:[%s12083_s10 + $0x70] sm:$0xff]  }
 0xb7a   : > { %6244 = vmatprep.mubr.bf16.mxu1 %v11776_v61  ;;  %6293 = vmatprep.mubr.bf16.mxu0 %v11765_v12 }
 0xb81   : > { %6245 = vmatmul.mubr.bf16.gmra.mrb[252].mxu1 %v5868_v36  ;;  %6294 = vmatmul.mubr.bf16.gmra.mrb[252].mxu0 %v5940_v50  ;;  %v10536_v36 = vld [vmem:[%s12083_s10 + $0x90] sm:$0xff]   ;;  %v10538_v50 = vld [vmem:[%s12083_s10 + $0x20] sm:$0xff]  }
 0xb82   : > { %9992 = vmatprep.mubr.msk.bf16.mxu1 %vm10721_vm6, %v10720_v26  ;;  %10000 = vmatprep.mubr.msk.bf16.mxu0 %vm10721_vm6, %v10720_v26 }
 0xc4c   : > { %v9459_v31 = vpop.f32.mrb[248].mxu1  ;;  %v9487_v41 = vpop.f32.mrb[248].mxu0 }
 0xc4d   : > { %v9460_v33 = vpop.f32.mrb[249].mxu1  ;;  %v9488_v45 = vpop.f32.mrb[249].mxu0 }
 0xc4e   : > { %v9461_v12 = vadd.f32 %v9460_v33, %v9459_v31  ;;  %v9462_v39 = vpop.f32.mrb[250].mxu1  ;;  %v9489_v57 = vadd.f32 %v9488_v45, %v9487_v41  ;;  %v9490_v44 = vpop.f32.mrb[250].mxu0  ;;  %v10542_v31 = vld [vmem:[%s12083_s10 + $0xa0] sm:$0xff]   ;;  %v10544_v41 = vld [vmem:[%s12083_s10 + $0x30] sm:$0xff]   ;;  %v10546_v33 = vld [vmem:[%s12083_s10 + $0x78] sm:$0xff]  }
 0xc4f   : > { %v9463_v0 = vpop.f32.mrb[251].mxu1  ;;  %v9491_v30 = vpop.f32.mrb[251].mxu0  ;;  %v10547_v45 = vld [vmem:[%s12083_s10 + $0x38] sm:$0xff]  }
 0xc50   : > { %v6239_v8 = vadd.f32 %v9461_v12, %v8350_v47  ;;  %v9464_v15 = vadd.f32 %v9463_v0, %v9462_v39  ;;  %v9492_v58 = vadd.f32 %v9491_v30, %v9490_v44  ;;  %v10548_v12 = vld [vmem:[%s12083_s10 + $0xb0] sm:$0xff]   ;;  %v10549_v39 = vld [vmem:[%s12083_s10 + $0xb8] sm:$0xff]  }
 0xc52   : > { %v6242_v61 = vadd.f32 %v9464_v15, %v8350_v47  ;;  %v6288_v62 = vadd.f32 %v9489_v57, %v6239_v8 }
 0xc54   : > { %vm6302_vm7 = vcmp.ge.f32.partialorder %v6288_v62, 0.0  ;;  %v6306_v63 = vmul.f32 0.0001, %v6288_v62  ;;  %v6291_v18 = vadd.f32 %v9492_v58, %v6242_v61  ;;  %v9465_v38 = vpop.f32.mrb[252].mxu1  ;;  %v9493_v52 = vpop.f32.mrb[252].mxu0 }
 0xc55   : > { %v9466_v40 = vpop.f32.mrb[253].mxu1  ;;  %v9494_v19 = vpop.f32.mrb[253].mxu0 }
 0xc56   : > { %vm6303_vm8 = vcmp.ge.f32.partialorder %v6291_v18, 0.0  ;;  %v6307_v2 = vmul.f32 0.0001, %v6291_v18  ;;  %v9467_v29 = vadd.f32 %v9466_v40, %v9465_v38  ;;  %v9468_v53 = vpop.f32.mrb[254].mxu1  ;;  %v9496_v3 = vpop.f32.mrb[254].mxu0  ;;  %v6310_v4 = vsel %vm6302_vm7, %v6288_v62, %v6306_v63 }
 0xc57   : > { %v9495_v10 = vadd.f32 %v9494_v19, %v9493_v52  ;;  %v9469_v55 = vpop.f32.mrb[255].mxu1  ;;  %v9497_v14 = vpop.f32.mrb[255].mxu0 }
 0xc58   : > { %v6311_v42 = vsel %vm6303_vm8, %v6291_v18, %v6307_v2  ;;  %v6247_v60 = vadd.f32 %v9467_v29, %v8350_v47  ;;  %v9470_v6 = vadd.f32 %v9469_v55, %v9468_v53  ;;  %v9498_v56 = vadd.f32 %v9497_v14, %v9496_v3 }
 0xc59   : > { %v6314_v13 = vpack.c.bf16 %v6311_v42, %v6310_v4 }
 0xc5a   : > { %v6296_v5 = vadd.f32 %v9495_v10, %v6247_v60  ;;  %v6250_v7 = vadd.f32 %v9470_v6, %v8350_v47  ;;  %v10545_v47 = vld [vmem:[%s12083_s10 + $0xa8] sm:$0xff]   ;;  %v8393_v10 = vld [vmem:[%s12085_s3] ss:$0 sm:$0xff]  ;;  %s12088_s3 = sld [smem:[#allocation21_spill]] }
 0xc5b   : > { %9989 = vmatpush3.bf16.msra.mxu1 %v6314_v13  ;;  %9997 = vmatpush3.bf16.msra.mxu0 %v6314_v13 }
 0xc5c   : > { %v6308_v20 = vmul.f32 0.0001, %v6296_v5  ;;  %v6299_v35 = vadd.f32 %v9498_v56, %v6250_v7  ;;  %9990 = vmatprep.subr.bf16.mxu1 %v10720_v26  ;;  %9998 = vmatprep.subr.bf16.mxu0 %v10720_v26  ;;  %vm6304_vm9 = vcmp.ge.f32.partialorder %v6296_v5, 0.0 }
 0xc5e   : > { %vm6305_vm10 = vcmp.ge.f32.partialorder %v6299_v35, 0.0  ;;  %v6309_v1 = vmul.f32 0.0001, %v6299_v35  ;;  %v6312_v48 = vsel %vm6304_vm9, %v6296_v5, %v6308_v20 }
 0xc60   : > { %v6313_v24 = vsel %vm6305_vm10, %v6299_v35, %v6309_v1 }
 0xc61   : > { %v6315_v11 = vpack.c.bf16 %v6313_v24, %v6312_v48  ;;  %v10552_v24 = vld [vmem:[%s12086_s5 + $0x40] sm:$0xff]  }
 0xc63   : > { %9991 = vmatpush3.bf16.msra.mxu1 %v6315_v11  ;;  %9999 = vmatpush3.bf16.msra.mxu0 %v6315_v11 }
 0xc64   : > { %10004 = vmatprep.subr.bf16.mxu1 %v10720_v26  ;;  %9508 = vmatprep.subr.bf16.mxu0 %v10526_v43  ;;  %v10554_v43 = vld [vmem:[%s12086_s5 + $0xc0] sm:$0xff]  }
 0xc66   : > { %9993 = vmatmul.mubr.msk.bf16.vlgmr.msra.gmra.mrb[0].mxu1 %vm5811_vm0, %v10523_v51  ;;  %10001 = vmatmul.mubr.msk.bf16.vlgmr.msra.gmra.mrb[0].mxu0 %vm5811_vm0, %v10524_v28  ;;  %v10550_v51 = vld [vmem:[%s12087_s6] sm:$0xff]   ;;  %v10551_v28 = vld [vmem:[%s12087_s6 + $0x8] sm:$0xff]   ;;  %s12090_s6 = sld [smem:[#allocation22_spill]] }
 0xc67   : > { %10005 = vmatpush3.bf16.msra.mxu1 %v6314_v13  ;;  %10008 = vmatprep.mubr.msk.bf16.mxu1 %vm10721_vm6, %v10720_v26 }
 0xc68   : > { %10006 = vmatprep.subr.bf16.mxu1 %v10720_v26  ;;  %9509 = vmatpush3.bf16.msra.mxu0 %v10527_v32  ;;  %v10553_v32 = vld [vmem:[%s12086_s5] sm:$0xff]  }
 0xc69   : > { %9510 = vmatprep.subr.bf16.mxu0 %v10528_v59  ;;  %v10555_v59 = vld [vmem:[%s12086_s5 + $0x80] sm:$0xff]  }
 0xc6b   : > { %10007 = vmatpush3.bf16.msra.mxu1 %v6315_v11 }
 0xc6c   : > { %9511 = vmatpush3.bf16.msra.mxu0 %v10529_v17  ;;  %10012 = vmatprep.subr.bf16.mxu1 %v10720_v26  ;;  %v10556_v17 = vld [vmem:[%s12086_s5 + $0x48] sm:$0xff]  }
 0xc6d   : > { %9512 = vmatprep.subr.bf16.mxu0 %v10531_v23  ;;  %v10558_v23 = vld [vmem:[%s12086_s5 + $0xc8] sm:$0xff]  }
 0xc6e   : > { %10009 = vmatmul.mubr.msk.bf16.vlgmr.msra.gmra.mrb[4].mxu1 %vm5811_vm0, %v10525_v34  ;;  %v10557_v34 = vld [vmem:[%s12086_s5 + $0x8] sm:$0xff]  }
 0xc6f   : > { %10013 = vmatpush3.bf16.msra.mxu1 %v10530_v37  ;;  %10028 = vmatprep.mubr.msk.bf16.mxu1 %vm10721_vm6, %v10720_v26  ;;  %v10559_v37 = vld [vmem:[%s12086_s5 + $0x88] sm:$0xff]  }
 0xc70   : > { %9513 = vmatpush3.bf16.msra.mxu0 %v10532_v49  ;;  %10014 = vmatprep.subr.bf16.mxu1 %v10720_v26  ;;  %v10560_v49 = vld [vmem:[%s12086_s5 + $0x50] sm:$0xff]  }
 0xc71   : > { %9514 = vmatprep.subr.bf16.mxu0 %v10534_v27  ;;  %v10562_v27 = vld [vmem:[%s12086_s5 + $0xd0] sm:$0xff]  }
 0xc73   : > { %10015 = vmatpush3.bf16.msra.mxu1 %v10533_v54  ;;  %v10561_v54 = vld [vmem:[%s12086_s5 + $0x10] sm:$0xff]  }
 0xc74   : > { %9515 = vmatpush3.bf16.msra.mxu0 %v10535_v46  ;;  %10016 = vmatprep.subr.bf16.mxu1 %v10720_v26  ;;  %v10563_v46 = vld [vmem:[%s12086_s5 + $0x90] sm:$0xff]  }
 0xc75   : > { %9516 = vmatprep.subr.bf16.mxu0 %v10537_v9  ;;  %v10564_v9 = vld [vmem:[%s12086_s5 + $0x58] sm:$0xff]  }
 0xc77   : > { %10017 = vmatpush3.bf16.msra.mxu1 %v10536_v36  ;;  %v10566_v36 = vld [vmem:[%s12086_s5 + $0xd8] sm:$0xff]  }
 0xc78   : > { %9517 = vmatpush3.bf16.msra.mxu0 %v10538_v50  ;;  %10018 = vmatprep.subr.bf16.mxu1 %v10720_v26  ;;  %v10565_v50 = vld [vmem:[%s12086_s5 + $0x18] sm:$0xff]  }
 0xc79   : > { %9518 = vmatprep.subr.bf16.mxu0 %v10540_v16  ;;  %v10567_v16 = vld [vmem:[%s12086_s5 + $0x98] sm:$0xff]  }
 0xc7b   : > { %10019 = vmatpush3.bf16.msra.mxu1 %v10539_v21  ;;  %v10568_v21 = vld [vmem:[%s12086_s5 + $0x60] sm:$0xff]  }
 0xc7c   : > { %9519 = vmatpush3.bf16.msra.mxu0 %v10541_v22  ;;  %10020 = vmatprep.subr.bf16.mxu1 %v10720_v26  ;;  %v10570_v22 = vld [vmem:[%s12086_s5 + $0xe0] sm:$0xff]  }
 0xc7d   : > { %9520 = vmatprep.subr.bf16.mxu0 %v10543_v25  ;;  %v10569_v25 = vld [vmem:[%s12086_s5 + $0x20] sm:$0xff]  }
 0xc7f   : > { %10021 = vmatpush3.bf16.msra.mxu1 %v10542_v31  ;;  %v10571_v31 = vld [vmem:[%s12086_s5 + $0xa0] sm:$0xff]  }
 0xc80   : > { %9521 = vmatpush3.bf16.msra.mxu0 %v10544_v41  ;;  %10022 = vmatprep.subr.bf16.mxu1 %v10720_v26  ;;  %v10572_v41 = vld [vmem:[%s12086_s5 + $0x68] sm:$0xff]  }
 0xc81   : > { %9522 = vmatprep.subr.bf16.mxu0 %v10546_v33  ;;  %v10573_v33 = vld [vmem:[%s12086_s5 + $0x28] sm:$0xff]  }
 0xc83   : > { %10023 = vmatpush3.bf16.msra.mxu1 %v10545_v47  ;;  %v10574_v47 = vld [vmem:[%s12086_s5 + $0xe8] sm:$0xff]  }
 0xc84   : > { %10024 = vmatprep.subr.bf16.mxu1 %v10720_v26  ;;  %9523 = vmatpush3.bf16.msra.mxu0 %v10547_v45  ;;  %v10575_v45 = vld [vmem:[%s12086_s5 + $0xa8] sm:$0xff]  }
 0xc85   : > { %10032 = vmatprep.subr.bf16.mxu0 %v10720_v26 }
 0xc87   : > { %10025 = vmatpush3.bf16.msra.mxu1 %v10548_v12  ;;  %v10576_v12 = vld [vmem:[%s12086_s5 + $0x70] sm:$0xff]  }
 0xc88   : > { %10026 = vmatprep.subr.bf16.mxu1 %v10720_v26 }
 0xc8b   : > { %10027 = vmatpush3.bf16.msra.mxu1 %v10549_v39  ;;  %v10578_v39 = vld [vmem:[%s12086_s5 + $0xf0] sm:$0xff]  }
 0xc8c   : > { %10038 = vmatprep.subr.bf16.mxu1 %v10720_v26 }
 0xd39   : > { %v6413_v57 = vpop.f32.mrb[0].mxu0  ;;  %v6360_v44 = vpop.f32.mrb[0].mxu1 }
 0xd3a   : > { %v10002_v0 = vpop.f32.mrb[1].mxu0  ;;  %v9994_v30 = vpop.f32.mrb[1].mxu1 }
 0xd3b   : > { %v6416_v8 = vpop.f32.mrb[2].mxu0  ;;  %v6363_v15 = vpop.f32.mrb[2].mxu1  ;;  %v10580_v0 = vld [vmem:[%s12086_s5 + $0x78] sm:$0xff]  }
 0xd3c   : > { %v6420_v58 = vpack.c.bf16 %v6416_v8, %v6413_v57  ;;  %v6367_v61 = vpack.c.bf16 %v6363_v15, %v6360_v44  ;;  %v9995_v62 = vpop.f32.mrb[3].mxu1  ;;  %v10003_v63 = vpop.f32.mrb[3].mxu0  ;;  %v10577_v57 = vld [vmem:[%s12086_s5 + $0x30] sm:$0xff]   ;;  %v10582_v30 = vld [vmem:[%s12086_s5 + $0xf8] sm:$0xff]  }
 0xd3d   : > { %v10579_v44 = vld [vmem:[%s12086_s5 + $0xb0] sm:$0xff]   ;;  %v10581_v8 = vld [vmem:[%s12086_s5 + $0x38] sm:$0xff]  }
 0xd3e   : > { %6705 = vmatprep.mubr.bf16.mxu0 %v6420_v58  ;;  %v10583_v15 = vld [vmem:[%s12086_s5 + $0xb8] sm:$0xff]   ;;  %s12089_s5 = sld [smem:[#allocation23_spill]] }
 0xd3f   : > { %6706 = vmatmul.mubr.bf16.vlgmr.msra.gmra.mrb[4].mxu0 %v6367_v61 }
 0xd40   : > { %10034 = vmatprep.mubr.msk.bf16.mxu0 %vm10721_vm6, %v10720_v26 }
 0xd41   : > { %v6466_v18 = vpop.f32.mrb[4].mxu1 }
 0xd42   : > { %v10010_v38 = vpop.f32.mrb[5].mxu1 }
 0xd43   : > { %v6469_v52 = vpop.f32.mrb[6].mxu1 }
 0xd44   : > { %v6473_v40 = vpack.c.bf16 %v6469_v52, %v6466_v18  ;;  %v10011_v19 = vpop.f32.mrb[7].mxu1 }
 0xd46   : > { %10029 = vmatmul.mubr.bf16.vlgmr.msra.gmra.mrb[8].mxu1 %v6473_v40 }
 0xd47   : > { %10040 = vmatprep.mubr.msk.bf16.mxu1 %vm10721_vm6, %v10720_v26 }
 0xe12   : > { %v9524_v2 = vpop.f32.mrb[4].mxu0 }
 0xe13   : > { %v9525_v29 = vpop.f32.mrb[5].mxu0 }
 0xe14   : > { %v9526_v53 = vadd.f32 %v9525_v29, %v9524_v2  ;;  %v9527_v3 = vpop.f32.mrb[6].mxu0 }
 0xe15   : > { %v9528_v4 = vpop.f32.mrb[7].mxu0 }
 0xe16   : > { %v9529_v55 = vadd.f32 %v9528_v4, %v9527_v3  ;;  %v6708_v14 = vadd.f32 %v9526_v53, %v8393_v10  ;;  %v8424_v3 = vld [vmem:[%s12088_s3] ss:$0 sm:$0xff]  ;;  %s12091_s3 = sld [smem:[#allocation25_spill]] }
 0xe18   : > { %v6711_v56 = vadd.f32 %v9529_v55, %v8393_v10 }
 0xe19   : > { %v6748_v42 = vpop.f32.mrb[8].mxu1 }
 0xe1a   : > { %v6749_v60 = vadd.f32 %v6748_v42, %v6708_v14  ;;  %v10030_v6 = vpop.f32.mrb[9].mxu1 }
 0xe1b   : > { %v6751_v13 = vpop.f32.mrb[10].mxu1 }
 0xe1c   : > { %v6757_v5 = vmul.f32 0.0001, %v6749_v60  ;;  %v6752_v7 = vadd.f32 %v6751_v13, %v6711_v56  ;;  %v10031_v20 = vpop.f32.mrb[11].mxu1  ;;  %vm6755_vm11 = vcmp.ge.f32.partialorder %v6749_v60, 0.0 }
 0xe1e   : > { %vm6756_vm12 = vcmp.ge.f32.partialorder %v6752_v7, 0.0  ;;  %v6758_v35 = vmul.f32 0.0001, %v6752_v7  ;;  %v6759_v1 = vsel %vm6755_vm11, %v6749_v60, %v6757_v5 }
 0xe20   : > { %v6760_v48 = vsel %vm6756_vm12, %v6752_v7, %v6758_v35 }
 0xe21   : > { %v6761_v11 = vpack.c.bf16 %v6760_v48, %v6759_v1 }
 0xe23   : > { %10033 = vmatpush3.bf16.msra.mxu0 %v6761_v11  ;;  %10039 = vmatpush3.bf16.msra.mxu1 %v6761_v11 }
 0xe24   : > { %9543 = vmatprep.subr.bf16.mxu0 %v10552_v24  ;;  %9565 = vmatprep.subr.bf16.mxu1 %v10554_v43 }
 0xe26   : > { %10035 = vmatmul.mubr.msk.bf16.vlgmr.msra.gmra.mrb[8].mxu0 %vm6769_vm13, %v10550_v51  ;;  %10041 = vmatmul.mubr.msk.bf16.vlgmr.msra.gmra.mrb[12].mxu1 %vm6769_vm13, %v10551_v28  ;;  %v10584_v51 = vld [vmem:[%s12089_s5 + $0x40] sm:$0xff]  }
 0xe27   : > { %7163 = vmatprep.mubr.bf16.mxu0 %v6761_v11  ;;  %7204 = vmatprep.mubr.bf16.mxu1 %v6420_v58 }
 0xe28   : > { %9544 = vmatpush3.bf16.msra.mxu0 %v10553_v32  ;;  %9566 = vmatpush3.bf16.msra.mxu1 %v10555_v59  ;;  %v8458_v32 = vld [vmem:[%s12090_s6 + $0x4] sm:$0xf]  ;;  %v7220_v59 = vld [vmem:[%s12090_s6] sm:$0xf]  ;;  %s8504_s6 = sshll.u32 %s10914_s0, 7  ;;  %s10722_s0 = smov [#allocation2]  }
 0xe29   : > { %9545 = vmatprep.subr.bf16.mxu0 %v10556_v17  ;;  %9567 = vmatprep.subr.bf16.mxu1 %v10558_v23  ;;  %v10585_v17 = vld [vmem:[%s12089_s5] sm:$0xff]   ;;  %v10586_v23 = vld [vmem:[%s12089_s5 + $0x48] sm:$0xff]  }
 0xe2c   : > { %9546 = vmatpush3.bf16.msra.mxu0 %v10557_v34  ;;  %9568 = vmatpush3.bf16.msra.mxu1 %v10559_v37  ;;  %v10587_v34 = vld [vmem:[%s12089_s5 + $0x8] sm:$0xff]   ;;  %v10588_v37 = vld [vmem:[%s12089_s5 + $0x50] sm:$0xff]  }
 0xe2d   : > { %9547 = vmatprep.subr.bf16.mxu0 %v10560_v49  ;;  %9569 = vmatprep.subr.bf16.mxu1 %v10562_v27  ;;  %v10589_v49 = vld [vmem:[%s12089_s5 + $0x10] sm:$0xff]   ;;  %v10590_v27 = vld [vmem:[%s12089_s5 + $0x58] sm:$0xff]  }
 0xe30   : > { %9548 = vmatpush3.bf16.msra.mxu0 %v10561_v54  ;;  %9570 = vmatpush3.bf16.msra.mxu1 %v10563_v46  ;;  %v10591_v54 = vld [vmem:[%s12089_s5 + $0x18] sm:$0xff]   ;;  %v10592_v46 = vld [vmem:[%s12089_s5 + $0x60] sm:$0xff]  }
 0xe31   : > { %9549 = vmatprep.subr.bf16.mxu0 %v10564_v9  ;;  %9571 = vmatprep.subr.bf16.mxu1 %v10566_v36  ;;  %v10593_v9 = vld [vmem:[%s12089_s5 + $0x20] sm:$0xff]   ;;  %v10594_v36 = vld [vmem:[%s12089_s5 + $0x68] sm:$0xff]  }
 0xe34   : > { %9550 = vmatpush3.bf16.msra.mxu0 %v10565_v50  ;;  %9572 = vmatpush3.bf16.msra.mxu1 %v10567_v16  ;;  %v10595_v50 = vld [vmem:[%s12089_s5 + $0x28] sm:$0xff]   ;;  %v10596_v16 = vld [vmem:[%s12089_s5 + $0x70] sm:$0xff]  }
 0xe35   : > { %9551 = vmatprep.subr.bf16.mxu0 %v10568_v21  ;;  %9573 = vmatprep.subr.bf16.mxu1 %v10570_v22  ;;  %v10597_v21 = vld [vmem:[%s12089_s5 + $0x30] sm:$0xff]   ;;  %v10598_v22 = vld [vmem:[%s12089_s5 + $0x78] sm:$0xff]  }
 0xe38   : > { %9552 = vmatpush3.bf16.msra.mxu0 %v10569_v25  ;;  %9574 = vmatpush3.bf16.msra.mxu1 %v10571_v31  ;;  %v10599_v25 = vld [vmem:[%s12089_s5 + $0x38] sm:$0xff]   ;;  %v10600_v31 = vld [vmem:[%s12091_s3 + $0x40] sm:$0xff]   ;;  %s12092_s5 = sld [smem:[#allocation24_spill]] }
 0xe39   : > { %9553 = vmatprep.subr.bf16.mxu0 %v10572_v41  ;;  %9575 = vmatprep.subr.bf16.mxu1 %v10574_v47  ;;  %v10601_v41 = vld [vmem:[%s12091_s3] sm:$0xff]   ;;  %v10602_v47 = vld [vmem:[%s12091_s3 + $0x48] sm:$0xff]  }
 0xe3c   : > { %9554 = vmatpush3.bf16.msra.mxu0 %v10573_v33  ;;  %9576 = vmatpush3.bf16.msra.mxu1 %v10575_v45  ;;  %v10603_v33 = vld [vmem:[%s12091_s3 + $0x8] sm:$0xff]   ;;  %v10604_v45 = vld [vmem:[%s12091_s3 + $0x50] sm:$0xff]  }
 0xe3d   : > { %9555 = vmatprep.subr.bf16.mxu0 %v10576_v12  ;;  %9577 = vmatprep.subr.bf16.mxu1 %v10578_v39  ;;  %v10605_v12 = vld [vmem:[%s12091_s3 + $0x10] sm:$0xff]   ;;  %v10606_v39 = vld [vmem:[%s12091_s3 + $0x58] sm:$0xff]  }
 0xe40   : > { %9556 = vmatpush3.bf16.msra.mxu0 %v10577_v57  ;;  %9578 = vmatpush3.bf16.msra.mxu1 %v10579_v44  ;;  %v10607_v57 = vld [vmem:[%s12091_s3 + $0x18] sm:$0xff]   ;;  %v10608_v44 = vld [vmem:[%s12091_s3 + $0x60] sm:$0xff]  }
 0xe41   : > { %9557 = vmatprep.subr.bf16.mxu0 %v10580_v0  ;;  %9579 = vmatprep.subr.bf16.mxu1 %v10582_v30  ;;  %v10609_v0 = vld [vmem:[%s12091_s3 + $0x20] sm:$0xff]   ;;  %v10610_v30 = vld [vmem:[%s12091_s3 + $0x68] sm:$0xff]  }
 0xe44   : > { %9558 = vmatpush3.bf16.msra.mxu0 %v10581_v8  ;;  %9580 = vmatpush3.bf16.msra.mxu1 %v10583_v15 }
 0xe45   : > { %10044 = vmatprep.subr.bf16.mxu0 %v10720_v26  ;;  %10050 = vmatprep.subr.bf16.mxu1 %v10720_v26 }
 0xef9   : > { %v6807_v58 = vpop.f32.mrb[8].mxu0  ;;  %v6860_v61 = vpop.f32.mrb[12].mxu1 }
 0xefa   : > { %v10036_v62 = vpop.f32.mrb[9].mxu0  ;;  %v10042_v63 = vpop.f32.mrb[13].mxu1 }
 0xefb   : > { %v6810_v18 = vpop.f32.mrb[10].mxu0  ;;  %v6863_v38 = vpop.f32.mrb[14].mxu1 }
 0xefc   : > { %v6814_v52 = vpack.c.bf16 %v6810_v18, %v6807_v58  ;;  %v6867_v40 = vpack.c.bf16 %v6863_v38, %v6860_v61  ;;  %v10037_v19 = vpop.f32.mrb[11].mxu0  ;;  %v10043_v2 = vpop.f32.mrb[15].mxu1 }
 0xefd   : > { %v10611_v19 = vld [vmem:[%s12091_s3 + $0x28] sm:$0xff]   ;;  %v10612_v2 = vld [vmem:[%s12091_s3 + $0x70] sm:$0xff]  }
 0xefe   : > { %7164 = vmatmul.mubr.bf16.vlgmr.msra.gmra.mrb[12].mxu0 %v6814_v52  ;;  %7205 = vmatmul.mubr.bf16.vlgmr.msra.gmra.mrb[16].mxu1 %v6867_v40 }
 0xeff   : > { %10052 = vmatprep.mubr.msk.bf16.mxu1 %vm10721_vm6, %v10720_v26  ;;  %10046 = vmatprep.mubr.msk.bf16.mxu0 %vm10721_vm6, %v10720_v26 }
 0xfd1   : > { %v9559_v29 = vpop.f32.mrb[12].mxu0  ;;  %v9581_v53 = vpop.f32.mrb[16].mxu1 }
 0xfd2   : > { %v9560_v4 = vpop.f32.mrb[13].mxu0  ;;  %v9582_v10 = vpop.f32.mrb[17].mxu1 }
 0xfd3   : > { %v9561_v55 = vadd.f32 %v9560_v4, %v9559_v29  ;;  %v9562_v14 = vpop.f32.mrb[14].mxu0  ;;  %v9583_v42 = vadd.f32 %v9582_v10, %v9581_v53  ;;  %v9584_v60 = vpop.f32.mrb[18].mxu1  ;;  %v10613_v29 = vld [vmem:[%s12091_s3 + $0x30] sm:$0xff]   ;;  %v10614_v53 = vld [vmem:[%s12091_s3 + $0x78] sm:$0xff]   ;;  %v10616_v4 = vld [vmem:[%s12070_s12] sm:$0xff]  }
 0xfd4   : > { %v9563_v6 = vpop.f32.mrb[15].mxu0  ;;  %v9585_v56 = vpop.f32.mrb[19].mxu1  ;;  %v10617_v10 = vld [vmem:[%s12070_s12 + $0x8] sm:$0xff]  }
 0xfd5   : > { %v7166_v13 = vadd.f32 %v9561_v55, %v8424_v3  ;;  %v9564_v5 = vadd.f32 %v9563_v6, %v9562_v14  ;;  %v9586_v7 = vadd.f32 %v9585_v56, %v9584_v60  ;;  %v10618_v55 = vld [vmem:[%s12070_s12 + $0x10] sm:$0xff]   ;;  %v10619_v14 = vld [vmem:[%s12070_s12 + $0x18] sm:$0xff]   ;;  %v8460_v6 = vld [vmem:[%s12092_s5] ss:$0 sm:$0xff]  ;;  %s978_s5 = sand.u32 1, %s10678_s1  }
 0xfd6   : > { %s7782_s10 = scalar_lea.sflag [#allocation3], %s978_s5 }
 0xfd7   : > { %v7169_v20 = vadd.f32 %v9564_v5, %v8424_v3  ;;  %v7207_v35 = vadd.f32 %v9583_v42, %v7166_v13  ;;  %v10615_v3 = vld [vmem:[%s12091_s3 + $0x38] sm:$0xff]   ;;  %v10620_v42 = vld [vmem:[%s12070_s12 + $0x20] sm:$0xff]   ;;  %s7890_s3 = sshll.u32 %s978_s5, 3 }
 0xfd8   : > { %s980_s8 = scalar_lea.vmem [#allocation2], %s7890_s3  ;;  %s10628_s3 = sshll.u32 %s10722_s0, 4  ;;  %s10629_s3 = int_to_ptr.vmem [resolvable:$false] %s10628_s3 }
 0xfd9   : > { %v7215_v1 = vmul.f32 0.0001, %v7207_v35  ;;  %v7210_v48 = vadd.f32 %v9586_v7, %v7169_v20  ;;  %vm7213_vm14 = vcmp.ge.f32.partialorder %v7207_v35, 0.0  ;;  %s7795_s9 = sshll.u32 %s980_s8, 4  ;;  %s10630_s13 = scalar_lea.vmem %s10629_s3, 256  ;;  %s11986_s9 = int_to_ptr.vmem [resolvable:$true] %s7795_s9 }
 0xfda   : > { %p10631_p0 = scmp.lt.s32.totalorder %s11986_s9, %s10629_s3 }
 0xfdb   : > { %vm7214_vm15 = vcmp.ge.f32.partialorder %v7210_v48, 0.0  ;;  %v7216_v24 = vmul.f32 0.0001, %v7210_v48  ;;  %v7217_v43 = vsel %vm7213_vm14, %v7207_v35, %v7215_v1 }
 0xfdd   : > { %v7218_v11 = vsel %vm7214_vm15, %v7210_v48, %v7216_v24  ;;  %v10621_v24 = vld [vmem:[%s12070_s12 + $0x28] sm:$0xff]  }
 0xfde   : > { %v7219_v28 = vpack.c.bf16 %v7218_v11, %v7217_v43  ;;  %v10622_v43 = vld [vmem:[%s12070_s12 + $0x30] sm:$0xff]   ;;  %v10623_v11 = vld [vmem:[%s12070_s12 + $0x38] sm:$0xff]   ;;  %s10624_s12 = scalar_lea.vmem %s11986_s9, 128 }
 0xfdf   : > { %p10625_p11 = scmp.ne.s32.totalorder %s11986_s9, %s10624_s12  ;;  %p10632_p1 = scmp.lt.s32.totalorder %s10630_s13, %s10624_s12 }
 0xfe0   : > { %10045 = vmatpush3.bf16.msra.mxu0 %v7219_v28  ;;  %10051 = vmatpush3.bf16.msra.mxu1 %v7219_v28  ;;  %v8477_v28 = vld [vmem:[%s12093_s4] ss:$0 sm:$0xff]  ;;  %s11984_s4 = scalar_lea.hbm %s10891_s27, %s8504_s6 }
 0xfe1   : > { %9591 = vmatprep.subr.bf16.mxu0 %v10584_v51  ;;  %9613 = vmatprep.subr.bf16.mxu1 %v10600_v31  ;;  %p10626_p12 = pnand %p10625_p11, %p10931_p5  ;;  %p10633_p2 = por %p10632_p1, %p10631_p0 }
 0xfe3   : > { %10053 = vmatmul.mubr.msk.bf16.vlgmr.msra.gmra.mrb[20].mxu1 %vm6769_vm13, %v8458_v32  ;;  %10047 = vmatmul.mubr.msk.bf16.vlgmr.msra.gmra.mrb[16].mxu0 %vm6769_vm13, %v7220_v59  ;;  %p10627_p13 = pneg %p10626_p12 }
 0xfe4   : > { %9592 = vmatpush3.bf16.msra.mxu0 %v10585_v17  ;;  %9614 = vmatpush3.bf16.msra.mxu1 %v10601_v41 }
 0xfe5   : > { %9593 = vmatprep.subr.bf16.mxu0 %v10586_v23  ;;  %9615 = vmatprep.subr.bf16.mxu1 %v10602_v47  ;;  %p10634_p3 = pnand %p10633_p2, %p10627_p13 }
 0xfe8   : > { %9594 = vmatpush3.bf16.msra.mxu0 %v10587_v34  ;;  %9616 = vmatpush3.bf16.msra.mxu1 %v10603_v33 }
 0xfe9   : > { %9595 = vmatprep.subr.bf16.mxu0 %v10588_v37  ;;  %9617 = vmatprep.subr.bf16.mxu1 %v10604_v45 }
 0xfec   : > { %9596 = vmatpush3.bf16.msra.mxu0 %v10589_v49  ;;  %9618 = vmatpush3.bf16.msra.mxu1 %v10605_v12 }
 0xfed   : > { %9597 = vmatprep.subr.bf16.mxu0 %v10590_v27  ;;  %9619 = vmatprep.subr.bf16.mxu1 %v10606_v39 }
 0xff0   : > { %9598 = vmatpush3.bf16.msra.mxu0 %v10591_v54  ;;  %9620 = vmatpush3.bf16.msra.mxu1 %v10607_v57 }
 0xff1   : > { %9599 = vmatprep.subr.bf16.mxu0 %v10592_v46  ;;  %9621 = vmatprep.subr.bf16.mxu1 %v10608_v44 }
 0xff4   : > { %9600 = vmatpush3.bf16.msra.mxu0 %v10593_v9  ;;  %9622 = vmatpush3.bf16.msra.mxu1 %v10609_v0 }
 0xff5   : > { %9601 = vmatprep.subr.bf16.mxu0 %v10594_v36  ;;  %9623 = vmatprep.subr.bf16.mxu1 %v10610_v30 }
 0xff8   : > { %9602 = vmatpush3.bf16.msra.mxu0 %v10595_v50  ;;  %9624 = vmatpush3.bf16.msra.mxu1 %v10611_v19 }
 0xff9   : > { %9603 = vmatprep.subr.bf16.mxu0 %v10596_v16  ;;  %9625 = vmatprep.subr.bf16.mxu1 %v10612_v2 }
 0xffc   : > { %9604 = vmatpush3.bf16.msra.mxu0 %v10597_v21  ;;  %9626 = vmatpush3.bf16.msra.mxu1 %v10613_v29 }
 0xffd   : > { %9605 = vmatprep.subr.bf16.mxu0 %v10598_v22  ;;  %9627 = vmatprep.subr.bf16.mxu1 %v10614_v53 }
0x1000   : > { %9606 = vmatpush3.bf16.msra.mxu0 %v10599_v25  ;;  %9628 = vmatpush3.bf16.msra.mxu1 %v10615_v3 }
0x1001   : > { %10056 = vmatprep.subr.bf16.mxu0 %v10720_v26 }
0x10b6   : > { %v7304_v8 = vpop.f32.mrb[20].mxu1  ;;  %v7258_v15 = vpop.f32.mrb[16].mxu0 }
0x10b7   : > { %v7310_v58 = vpack.c.bf16 %v7304_v8, %v7304_v8  ;;  %v7264_v61 = vpack.c.bf16 %v7258_v15, %v7258_v15  ;;  %v10054_v62 = vpop.f32.mrb[21].mxu1  ;;  %v10048_v63 = vpop.f32.mrb[17].mxu0 }
0x10b8   : > { %v7307_v18 = vpop.f32.mrb[22].mxu1  ;;  %v7261_v38 = vpop.f32.mrb[18].mxu0 }
0x10b9   : > { %7478 = vmatprep.mubr.bf16.mxu0 %v7310_v58  ;;  %v10055_v52 = vpop.f32.mrb[23].mxu1  ;;  %v10049_v40 = vpop.f32.mrb[19].mxu0  ;;  %7657 = vmatprep.mubr.bf16.mxu1 %v7264_v61 }
0x10ba   : > { %7479 = vmatmul.mubr.bf16.vlgmr.msra.gmra.mrb[20].mxu0 %v7264_v61 }
0x10bb   : > { %10072 = vmatprep.mubr.msk.bf16.mxu0 %vm10721_vm6, %v10720_v26  ;;  %10057 = vmatpush3.bf16.msra.mxu0 %v10616_v4 }
0x10bc   : > { %10058 = vmatprep.subr.bf16.mxu0 %v10720_v26 }
0x10bf   : > { %10059 = vmatpush3.bf16.msra.mxu0 %v10617_v10 }
0x10c0   : > { %10060 = vmatprep.subr.bf16.mxu0 %v10720_v26 }
0x10c3   : > { %10061 = vmatpush3.bf16.msra.mxu0 %v10618_v55 }
0x10c4   : > { %10062 = vmatprep.subr.bf16.mxu0 %v10720_v26 }
0x10c7   : > { %10063 = vmatpush3.bf16.msra.mxu0 %v10619_v14 }
0x10c8   : > { %10064 = vmatprep.subr.bf16.mxu0 %v10720_v26 }
0x10cb   : > { %10065 = vmatpush3.bf16.msra.mxu0 %v10620_v42 }
0x10cc   : > { %10066 = vmatprep.subr.bf16.mxu0 %v10720_v26 }
0x10cf   : > { %10067 = vmatpush3.bf16.msra.mxu0 %v10621_v24 }
0x10d0   : > { %10068 = vmatprep.subr.bf16.mxu0 %v10720_v26 }
0x10d3   : > { %10069 = vmatpush3.bf16.msra.mxu0 %v10622_v43 }
0x10d4   : > { %10070 = vmatprep.subr.bf16.mxu0 %v10720_v26  ;;  %v8494_v26 = vld [vmem:[%s10886_s20] ss:$0 sm:$0xff] }
0x10d7   : > { %10071 = vmatpush3.bf16.msra.mxu0 %v10623_v11 }
0x118d   : > { %v9607_v60 = vpop.f32.mrb[20].mxu0 }
0x118e   : > { %v9608_v56 = vpop.f32.mrb[21].mxu0 }
0x118f   : > { %v9609_v13 = vadd.f32 %v9608_v56, %v9607_v60  ;;  %v9610_v5 = vpop.f32.mrb[22].mxu0 }
0x1190   : > { %v9611_v7 = vpop.f32.mrb[23].mxu0 }
0x1191   : > { %v7481_v20 = vadd.f32 %v9609_v13, %v8460_v6 }
0x1193   : > { %vm7486_vm1 = vcmp.ge.f32.partialorder %v7481_v20, 0.0  ;;  %v7487_v35 = vmul.f32 0.0001, %v7481_v20 }
0x1195   : > { %v7488_v1 = vsel %vm7486_vm1, %v7481_v20, %v7487_v35 }
0x1196   : > { %v7489_v48 = vpack.c.bf16 %v7488_v1, %v7488_v1 }
0x1198   : > { %7658 = vmatmul.mubr.bf16.vlgmr.msra.gmra.mrb[24].mxu1 %v7489_v48 }
0x126b   : > { %v9629_v51 = vpop.f32.mrb[24].mxu1 }
0x126c   : > { %v9630_v32 = vpop.f32.mrb[25].mxu1 }
0x126d   : > { %v9631_v59 = vadd.f32 %v9630_v32, %v9629_v51  ;;  %v9632_v17 = vpop.f32.mrb[26].mxu1 }
0x126e   : > { %v9633_v23 = vpop.f32.mrb[27].mxu1 }
0x126f   : > { %v7660_v34 = vadd.f32 %v9631_v59, %v8477_v28 }
0x1271   : > { %vm7665_vm0 = vcmp.ge.f32.partialorder %v7660_v34, 0.0  ;;  %v7666_v37 = vmul.f32 0.0001, %v7660_v34 }
0x1273   : > { %v7667_v49 = vsel %vm7665_vm0, %v7660_v34, %v7666_v37 }
0x1274   : > { %v7668_v27 = vpack.c.bf16 %v7667_v49, %v7667_v49 }
0x1276   : > { %10073 = vmatmul.mubr.bf16.vlgmr.msra.gmra.mrb[24].mxu0 %v7668_v27 }
0x1349   : > { %v7774_v54 = vpop.f32.mrb[24].mxu0 }
0x134a   : > { %v7775_v46 = vadd.f32 %v8494_v26, %v7774_v54  ;;  %v10074_v9 = vpop.f32.mrb[25].mxu0 }
0x134b   : > { %v7777_v36 = vpop.f32.mrb[26].mxu0 }
0x134c   : > { %7780 = vst [vmem:[%s980_s8] sm:$0xff] %v7775_v46  ;;  %v10075_v50 = vpop.f32.mrb[27].mxu0 }
0x134d   : > { %10637 = shalt.err (!%p10634_p3)
}
0x134e   : > { %s10638_s8 = scalar_lea.hbm %s11984_s4, 128  ;;  %s10642_s6 = scalar_lea.hbm %s10891_s27, 256 }
0x134f   : > { %p10639_p4 = scmp.ne.s32.totalorder %s11984_s4, %s10638_s8  ;;  %p10643_p9 = scmp.lt.u32.totalorder %s11984_s4, %s10891_s27 }
0x1350   : > { %p10644_p10 = scmp.lt.u32.totalorder %s10642_s6, %s10638_s8  ;;  %p10646_p12 = scmp.lt.u32.totalorder %s10638_s8, %s11984_s4 }
0x1351   : > { %p10640_p7 = pnand %p10639_p4, %p10931_p5 }
0x1352   : > { %p10645_p11 = por %p10644_p10, %p10643_p9 }
0x1353   : > { %p10641_p8 = pneg %p10640_p7 }
0x1354   : > { %p10647_p0 = por %p10646_p12, %p10645_p11 }
0x1356   : > { %p10648_p13 = pnand %p10647_p0, %p10641_p8 }
0x1358   : > { %10651 = shalt.err (!%p10648_p13)
}
0x1359   : > { %10076 = dma.vmem_to_hbm [thread:$0]  (%p10931_p5), %s11986_s9, 128, %s11984_s4, %s7782_s10  }
0x135a PF: > { %p10082_p1 = scmp.ge.s32.totalorder %s10686_s7, 2  ;;  %s7807_s13 = sand.u32 1, %s10674_s28  }
0x135b   : > { %s7808_s12 = scalar_lea.sflag [#allocation3], %s7807_s13 }
0x135c   : > { %p10079_p2 = pnand %p10082_p1, %p10935_p6 }
0x135e   : > { %10669 = dma.done.wait (!%p10079_p2), %s7808_s12, 128  }
0x135f   : > { %10671 = vsyncadd (!%p10079_p2), %s7808_s12, 4294967168  ;;  %p75_p3 = scmp.ge.s32.totalorder %s10918_s11, 4   ;;  %s12094_s28 = smov %s10678_s1 }
0x1360   : > { %s12095_s1 = smov %s10682_s2  ;;  %s12096_s2 = smov %s10929_s18 }
0x1361   : > { %s12097_s7 = smov %s10918_s11  ;;  %77 = sbr.rel (!%p75_p3) target bundleno = 70 (0x46), region = 232 }
0x1368   :  { %7813 = vsyncpa [#allocation3], 1 }
0x1369   :  { %7815 = vsyncpa [#allocation3 + $0x1], 1 }

</bundles_post_ra>
